<compile_context>
chip_gen: v5e
topology: v5e:2x2
jax: 0.10.0
libtpu: 0.0.40
codegen_flags: <defaults>
</compile_context>

<pallas_src>
import jax
import jax.numpy as jnp
from jax import lax
from jax.experimental import pallas as pl
from jax.experimental.pallas import tpu as pltpu


def _layer_norm(z, gamma, beta, eps=1e-5):
    mu = jnp.mean(z, axis=-1, keepdims=True)
    var = jnp.mean((z - mu) ** 2, axis=-1, keepdims=True)
    return (z - mu) * lax.rsqrt(var + eps) * gamma + beta


def transformer_block_kernel(
    x_ref,
    wqkv_ref, bqkv_ref,          # (3H, F, d) cd   / (3H, 1, d) f32  (head-major, scale folded into Q)
    wo3_ref, bo_ref,             # (H, d, F)  cd   / (1, F) f32
    g1_ref, be1_ref, g2_ref, be2_ref,
    w1_ref, b1_ref, w2_ref, b2_ref,
    out_ref,
    q_scr, k_scr, v_scr, acc_scr,
):
    _, S, F = x_ref.shape
    H = wo3_ref.shape[0]
    d = wo3_ref.shape[1]
    num_kv, _, tkv, _ = k_scr.shape
    cd = wqkv_ref.dtype                                  # matmul / exp compute dtype
    approx = jnp.dtype(cd) == jnp.dtype(jnp.bfloat16)    # EUP approx recip on bf16 path only

    x2d = x_ref[0].astype(jnp.float32)                   # (S, F); residual carried in f32
    x2d_c = x2d.astype(cd)

    # --- QKV projections, head-major (review item 1, option a) --------------
    # Full-F contraction per head, results written directly into head-major
    # scratch (no lane slicing, no stack, no (S, 3F) -> (3H, S, d) relayout).
    for h in range(H):
        q_scr[h] = (jnp.dot(x2d_c, wqkv_ref[h], preferred_element_type=jnp.float32)
                    + bqkv_ref[h]).astype(cd)
    for h in range(H):
        k_h = (jnp.dot(x2d_c, wqkv_ref[H + h], preferred_element_type=jnp.float32)
               + bqkv_ref[H + h]).astype(cd)
        v_h = (jnp.dot(x2d_c, wqkv_ref[2 * H + h], preferred_element_type=jnp.float32)
               + bqkv_ref[2 * H + h]).astype(cd)
        for j in range(num_kv):                           # static copies into KV blocks
            k_scr[j, h] = k_h[j * tkv:(j + 1) * tkv, :]
            v_scr[j, h] = v_h[j * tkv:(j + 1) * tkv, :]

    q = q_scr[...]                                        # (H, S, d), compute dtype

    # --- flash-style online softmax over KV blocks (review item 4) ----------
    acc_scr[...] = jnp.zeros_like(acc_scr)
    m0 = jnp.full((H, S, 1), -1e30, jnp.float32)
    l0 = jnp.zeros((H, S, 1), jnp.float32)

    def kv_step(i, carry):
        m_prev, l_prev = carry
        kb = k_scr[i]                                     # (H, tkv, d)
        vb = v_scr[i]
        # 1/sqrt(d) already folded into Wq (item 5) -> no score scaling here.
        s = jnp.einsum("hqd,hkd->hqk", q, kb,
                       preferred_element_type=jnp.float32)        # (H, S, tkv) f32
        m_new = jnp.maximum(m_prev, jnp.max(s, axis=-1, keepdims=True))
        alpha = jnp.exp(m_prev - m_new)                            # f32
        p = jnp.exp((s - m_new).astype(cd))                        # exp in compute dtype (item 7)
        l_new = alpha * l_prev + jnp.sum(p, axis=-1, keepdims=True).astype(jnp.float32)
        acc_scr[...] = alpha * acc_scr[...] + jnp.einsum(
            "hqk,hkd->hqd", p, vb, preferred_element_type=jnp.float32)
        return m_new, l_new

    _, l_fin = lax.fori_loop(0, num_kv, kv_step, (m0, l0))

    # Deferred normalization (item 6): one pass over (H, S, d), EUP reciprocal.
    acc_scr[...] = acc_scr[...] * pl.reciprocal(l_fin, approx=approx)

    # --- output projection with fused head reduction (item 2) ---------------
    def proj_step(h, o_acc):
        return o_acc + jnp.dot(acc_scr[h].astype(cd), wo3_ref[h],
                               preferred_element_type=jnp.float32)

    attn_out = lax.fori_loop(0, H, proj_step,
                             jnp.zeros((S, F), jnp.float32), unroll=True)
    attn_out = attn_out + bo_ref[...]

    # --- residual + LayerNorm 1 (f32) ----------------------------------------
    y1 = _layer_norm(x2d + attn_out, g1_ref[...], be1_ref[...])

    # --- MLP: Linear -> ReLU -> Linear ---------------------------------------
    h1 = jnp.dot(y1.astype(cd), w1_ref[...],
                 preferred_element_type=jnp.float32) + b1_ref[...]
    h1 = jnp.maximum(h1, 0.0)
    h2 = jnp.dot(h1.astype(cd), w2_ref[...],
                 preferred_element_type=jnp.float32) + b2_ref[...]

    # --- residual + LayerNorm 2 (f32) ----------------------------------------
    y2 = _layer_norm(y1 + h2, g2_ref[...], be2_ref[...])
    out_ref[0] = y2.astype(out_ref.dtype)


def transformer_block(x, params, n_heads, *, compute_dtype=jnp.bfloat16,
                      kv_block_size=512):
    B, S, F = x.shape
    assert F % n_heads == 0, "n_features must be divisible by n_heads"
    H = n_heads
    d = F // H
    cd = jnp.dtype(compute_dtype)
    scale = 1.0 / (d ** 0.5)

    # ---- host-side weight prep: head-major split, scale folded into Q ------
    def w_heads(w):                       # (F, F) -> (H, F, d)
        return jnp.transpose(w.reshape(F, H, d), (1, 0, 2))

    def b_heads(b):                       # (1, F) -> (H, 1, d)
        return b.reshape(H, d)[:, None, :]

    wqkv = jnp.concatenate([w_heads(params["wq"] * scale),
                            w_heads(params["wk"]),
                            w_heads(params["wv"])], axis=0).astype(cd)          # (3H, F, d)
    bqkv = jnp.concatenate([b_heads(params["bq"] * scale),
                            b_heads(params["bk"]),
                            b_heads(params["bv"])], axis=0).astype(jnp.float32)  # (3H, 1, d)
    wo3 = params["wo"].reshape(H, d, F).astype(cd)                               # (H, d, F)

    weight_list = [
        wqkv, bqkv, wo3, params["bo"].astype(jnp.float32),
        params["g1"].astype(jnp.float32), params["be1"].astype(jnp.float32),
        params["g2"].astype(jnp.float32), params["be2"].astype(jnp.float32),
        params["w1"].astype(cd), params["b1"].astype(jnp.float32),
        params["w2"].astype(cd), params["b2"].astype(jnp.float32),
    ]

    # ---- KV tiling -----------------------------------------------------------
    tkv = min(kv_block_size, S)
    if S % tkv != 0:
        tkv = S   # TODO(synk): pad/mask a ragged KV tail instead of densifying.
    num_kv = S // tkv

    scratch_shapes = [
        pltpu.VMEM((H, S, d), cd),               # q (head-major)
        pltpu.VMEM((num_kv, H, tkv, d), cd),     # K blocks
        pltpu.VMEM((num_kv, H, tkv, d), cd),     # V blocks
        pltpu.VMEM((H, S, d), jnp.float32),      # attention accumulator
    ]

    # ---- generation-aware VMEM budget (items 3 / 13) ------------------------
    try:
        vmem_cap = int(pltpu.get_tpu_info().vmem_capacity_bytes)
    except Exception:
        vmem_cap = 64 << 20                      # v7x per-core; conservative default

    def rup(v, m):
        return (v + m - 1) // m * m

    d_pad, s_pad, f_pad = rup(d, 128), rup(S, 8), rup(F, 128)
    tkv_pad, tkv_lane = rup(tkv, 8), rup(tkv, 128)
    cdb = cd.itemsize
    weight_bytes = sum(w.size * w.dtype.itemsize for w in weight_list)
    io_bytes = 2 * 2 * s_pad * f_pad * x.dtype.itemsize            # dbl-buffered in/out
    scratch_bytes = (H * s_pad * d_pad * cdb                       # q
                     + 2 * num_kv * H * tkv_pad * d_pad * cdb      # k, v
                     + H * s_pad * d_pad * 4)                      # acc (f32)
    live_bytes = (6 * s_pad * f_pad * 4                            # x, attn_out, y1, mlp, y2 (f32)
                  + H * s_pad * tkv_lane * (4 + cdb)               # one score + prob block
                  + 4 * H * s_pad * 128 * 4)                       # m / l / alpha

    def make_call(single_buffer_weights):
        wfactor = 1 if single_buffer_weights else 2
        est = wfactor * weight_bytes + io_bytes + scratch_bytes + live_bytes
        vmem_limit = int(1.4 * est) + (4 << 20)
        vmem_limit = max(vmem_limit, 32 << 20)
        vmem_limit = min(vmem_limit, (vmem_cap * 9) // 10)

        def wspec(arr):
            nd = arr.ndim
            if single_buffer_weights:
                return pl.BlockSpec(arr.shape, lambda b, nd=nd: (0,) * nd,
                                    pipeline_mode=pl.Buffered(buffer_count=1))
            return pl.BlockSpec(arr.shape, lambda b, nd=nd: (0,) * nd)

        return pl.pallas_call(
            transformer_block_kernel,
            out_shape=jax.ShapeDtypeStruct((B, S, F), x.dtype),
            grid_spec=pltpu.PrefetchScalarGridSpec(
                num_scalar_prefetch=0,
                grid=(B,),
                in_specs=[pl.BlockSpec((1, S, F), lambda b: (b, 0, 0))]
                         + [wspec(w) for w in weight_list],
                out_specs=pl.BlockSpec((1, S, F), lambda b: (b, 0, 0)),
                scratch_shapes=scratch_shapes),
            compiler_params=pltpu.CompilerParams(
                dimension_semantics=("parallel",),
                vmem_limit_bytes=vmem_limit),
        )

    try:
        # Grid-invariant weights single-buffered (item 8).
        return make_call(True)(x, *weight_list)
    except Exception:
        # TODO(synk): pl.Buffered(1) not available on this JAX version; fall
        # back to default (double-buffered) weight blocks.
        return make_call(False)(x, *weight_list)


def init_params(key, n_features):
    F = n_features
    ks = jax.random.split(key, 6)

    def lin(k):
        return 0.05 * jax.random.normal(k, (F, F), jnp.float32)

    return {
        "wq": lin(ks[0]), "bq": jnp.zeros((1, F), jnp.float32),
        "wk": lin(ks[1]), "bk": jnp.zeros((1, F), jnp.float32),
        "wv": lin(ks[2]), "bv": jnp.zeros((1, F), jnp.float32),
        "wo": lin(ks[3]), "bo": jnp.zeros((1, F), jnp.float32),
        "g1": jnp.ones((1, F), jnp.float32), "be1": jnp.zeros((1, F), jnp.float32),
        "g2": jnp.ones((1, F), jnp.float32), "be2": jnp.zeros((1, F), jnp.float32),
        "w1": lin(ks[4]), "b1": 0.01 * jnp.ones((1, F), jnp.float32),
        "w2": lin(ks[5]), "b2": 0.01 * jnp.ones((1, F), jnp.float32),
    }


def reference(x, p, n_heads):
    # Pure-JAX f32 reference (matches the PyTorch forward semantics).
    B, S, F = x.shape
    dh = F // n_heads
    q = x @ p["wq"] + p["bq"]
    k = x @ p["wk"] + p["bk"]
    v = x @ p["wv"] + p["bv"]
    q = q.reshape(B, S, n_heads, dh).transpose(0, 2, 1, 3)
    k = k.reshape(B, S, n_heads, dh).transpose(0, 2, 1, 3)
    v = v.reshape(B, S, n_heads, dh).transpose(0, 2, 1, 3)
    s = jnp.einsum("bhqd,bhkd->bhqk", q, k) / (dh ** 0.5)
    pattn = jax.nn.softmax(s, axis=-1)
    a = jnp.einsum("bhqk,bhkd->bhqd", pattn, v).transpose(0, 2, 1, 3).reshape(B, S, F)
    a = a @ p["wo"] + p["bo"]

    def ln(z, g, b):
        mu = jnp.mean(z, -1, keepdims=True)
        var = jnp.mean((z - mu) ** 2, -1, keepdims=True)
        return (z - mu) / jnp.sqrt(var + 1e-5) * g + b

    y1 = ln(x + a, p["g1"], p["be1"])
    m = jnp.maximum(y1 @ p["w1"] + p["b1"], 0.0) @ p["w2"] + p["b2"]
    return ln(y1 + m, p["g2"], p["be2"])


if __name__ == "__main__":
    B, S, F, H = 2, 8, 32, 4
    key = jax.random.PRNGKey(0)
    kx, kp, kx2 = jax.random.split(key, 3)
    x = jax.random.normal(kx, (B, S, F), jnp.float32)
    params = init_params(kp, F)
    ref = reference(x, params, H)

    # Exact-math check (f32 compute, single KV block).
    out_f32 = jax.block_until_ready(
        transformer_block(x, params, n_heads=H, compute_dtype=jnp.float32))
    assert out_f32.shape == (B, S, F)
    assert jnp.allclose(out_f32, ref, atol=2e-4, rtol=2e-4), \
        f"f32 path max abs err {jnp.max(jnp.abs(out_f32 - ref))}"

    # Exact-math check of the flash KV-tiled path (S=16 with two KV blocks).
    x2 = jax.random.normal(kx2, (B, 16, F), jnp.float32)
    ref2 = reference(x2, params, H)
    out_kv = jax.block_until_ready(
        transformer_block(x2, params, n_heads=H, compute_dtype=jnp.float32,
                          kv_block_size=8))
    assert out_kv.shape == (B, 16, F)
    assert jnp.allclose(out_kv, ref2, atol=2e-4, rtol=2e-4), \
        f"kv-tiled path max abs err {jnp.max(jnp.abs(out_kv - ref2))}"

    # Performance path: bf16 matmul/exp, f32 accumulation, approx reciprocal.
    out_bf16 = jax.block_until_ready(
        transformer_block(x, params, n_heads=H, compute_dtype=jnp.bfloat16))
    assert out_bf16.shape == (B, S, F)
    assert jnp.allclose(out_bf16, ref, atol=1e-1, rtol=1e-1), \
        f"bf16 path max abs err {jnp.max(jnp.abs(out_bf16 - ref))}"

    print("KERNEL_OK")
</pallas_src>

<mosaic_0001>
module attributes {stable_mosaic.version = 11 : i64} {
  func.func @transformer_block_kernel(%arg0: i32, %arg1: memref<1x8x32xf32, #tpu.memory_space<vmem>>, %arg2: memref<12x32x8xf32, #tpu.memory_space<vmem>>, %arg3: memref<12x1x8xf32, #tpu.memory_space<vmem>>, %arg4: memref<4x8x32xf32, #tpu.memory_space<vmem>>, %arg5: memref<1x32xf32, #tpu.memory_space<vmem>>, %arg6: memref<1x32xf32, #tpu.memory_space<vmem>>, %arg7: memref<1x32xf32, #tpu.memory_space<vmem>>, %arg8: memref<1x32xf32, #tpu.memory_space<vmem>>, %arg9: memref<1x32xf32, #tpu.memory_space<vmem>>, %arg10: memref<32x32xf32, #tpu.memory_space<vmem>>, %arg11: memref<1x32xf32, #tpu.memory_space<vmem>>, %arg12: memref<32x32xf32, #tpu.memory_space<vmem>>, %arg13: memref<1x32xf32, #tpu.memory_space<vmem>>, %arg14: memref<1x8x32xf32, #tpu.memory_space<vmem>>, %arg15: memref<4x8x8xf32, #tpu.memory_space<vmem>>, %arg16: memref<1x4x8x8xf32, #tpu.memory_space<vmem>>, %arg17: memref<1x4x8x8xf32, #tpu.memory_space<vmem>>, %arg18: memref<4x8x8xf32, #tpu.memory_space<vmem>>) attributes {dimension_semantics = [#tpu.dimension_semantics<parallel>], iteration_bounds = array<i64: 2>, scalar_prefetch = 0 : i64, scratch_operands = 4 : i64, tpu.core_type = #tpu.core_type<tc>, window_params = [{transform_indices = @transform_0, window_bounds = array<i64: 1, 8, 32>}, {pipeline_mode = #tpu.pipeline_mode<synchronous>, transform_indices = @transform_1, window_bounds = array<i64: 12, 32, 8>}, {pipeline_mode = #tpu.pipeline_mode<synchronous>, transform_indices = @transform_2, window_bounds = array<i64: 12, 1, 8>}, {pipeline_mode = #tpu.pipeline_mode<synchronous>, transform_indices = @transform_3, window_bounds = array<i64: 4, 8, 32>}, {pipeline_mode = #tpu.pipeline_mode<synchronous>, transform_indices = @transform_4, window_bounds = array<i64: 1, 32>}, {pipeline_mode = #tpu.pipeline_mode<synchronous>, transform_indices = @transform_5, window_bounds = array<i64: 1, 32>}, {pipeline_mode = #tpu.pipeline_mode<synchronous>, transform_indices = @transform_6, window_bounds = array<i64: 1, 32>}, {pipeline_mode = #tpu.pipeline_mode<synchronous>, transform_indices = @transform_7, window_bounds = array<i64: 1, 32>}, {pipeline_mode = #tpu.pipeline_mode<synchronous>, transform_indices = @transform_8, window_bounds = array<i64: 1, 32>}, {pipeline_mode = #tpu.pipeline_mode<synchronous>, transform_indices = @transform_9, window_bounds = array<i64: 32, 32>}, {pipeline_mode = #tpu.pipeline_mode<synchronous>, transform_indices = @transform_10, window_bounds = array<i64: 1, 32>}, {pipeline_mode = #tpu.pipeline_mode<synchronous>, transform_indices = @transform_11, window_bounds = array<i64: 32, 32>}, {pipeline_mode = #tpu.pipeline_mode<synchronous>, transform_indices = @transform_12, window_bounds = array<i64: 1, 32>}, {transform_indices = @transform_13, window_bounds = array<i64: 1, 8, 32>}]} {
    %c0 = arith.constant 0 : index
    %c0_0 = arith.constant 0 : index
    %c0_1 = arith.constant 0 : index
    %0 = vector.load %arg1[%c0, %c0_0, %c0_1] : memref<1x8x32xf32, #tpu.memory_space<vmem>>, vector<1x8x32xf32>
    %1 = vector.shape_cast %0 : vector<1x8x32xf32> to vector<8x32xf32>
    %c0_2 = arith.constant 0 : index
    %c0_3 = arith.constant 0 : index
    %c0_4 = arith.constant 0 : index
    %2 = vector.load %arg2[%c0_2, %c0_3, %c0_4] : memref<12x32x8xf32, #tpu.memory_space<vmem>>, vector<1x32x8xf32>
    %3 = vector.shape_cast %2 : vector<1x32x8xf32> to vector<32x8xf32>
    %cst = arith.constant dense<0.000000e+00> : vector<8x8xf32>
    %4 = tpu.matmul %1, %3, %cst {dimension_numbers = #tpu.dot_dimension_numbers<[1], [0], [0], [1], [0, 0, 1, 1], [], []>} : vector<8x32xf32>, vector<32x8xf32>, vector<8x8xf32> -> vector<8x8xf32>
    %c0_5 = arith.constant 0 : index
    %c0_6 = arith.constant 0 : index
    %c0_7 = arith.constant 0 : index
    %5 = vector.load %arg3[%c0_5, %c0_6, %c0_7] : memref<12x1x8xf32, #tpu.memory_space<vmem>>, vector<1x1x8xf32>
    %6 = vector.shape_cast %5 : vector<1x1x8xf32> to vector<1x8xf32>
    %7 = vector.broadcast %6 : vector<1x8xf32> to vector<8x8xf32>
    %8 = arith.addf %4, %7 : vector<8x8xf32>
    %c0_8 = arith.constant 0 : index
    %c0_9 = arith.constant 0 : index
    %c0_10 = arith.constant 0 : index
    %9 = vector.load %arg15[%c0_8, %c0_9, %c0_10] : memref<4x8x8xf32, #tpu.memory_space<vmem>>, vector<1x8x8xf32>
    %10 = vector.shape_cast %9 : vector<1x8x8xf32> to vector<8x8xf32>
    %11 = vector.shape_cast %8 : vector<8x8xf32> to vector<1x8x8xf32>
    tpu.vector_store %arg15[%c0_8, %c0_9, %c0_10], %11 {strides = array<i32>} : memref<4x8x8xf32, #tpu.memory_space<vmem>>, vector<1x8x8xf32>,
    %c1 = arith.constant 1 : index
    %c0_11 = arith.constant 0 : index
    %c0_12 = arith.constant 0 : index
    %12 = vector.load %arg2[%c1, %c0_11, %c0_12] : memref<12x32x8xf32, #tpu.memory_space<vmem>>, vector<1x32x8xf32>
    %13 = vector.shape_cast %12 : vector<1x32x8xf32> to vector<32x8xf32>
    %cst_13 = arith.constant dense<0.000000e+00> : vector<8x8xf32>
    %14 = tpu.matmul %1, %13, %cst_13 {dimension_numbers = #tpu.dot_dimension_numbers<[1], [0], [0], [1], [0, 0, 1, 1], [], []>} : vector<8x32xf32>, vector<32x8xf32>, vector<8x8xf32> -> vector<8x8xf32>
    %c1_14 = arith.constant 1 : index
    %c0_15 = arith.constant 0 : index
    %c0_16 = arith.constant 0 : index
    %15 = vector.load %arg3[%c1_14, %c0_15, %c0_16] : memref<12x1x8xf32, #tpu.memory_space<vmem>>, vector<1x1x8xf32>
    %16 = vector.shape_cast %15 : vector<1x1x8xf32> to vector<1x8xf32>
    %17 = vector.broadcast %16 : vector<1x8xf32> to vector<8x8xf32>
    %18 = arith.addf %14, %17 : vector<8x8xf32>
    %c1_17 = arith.constant 1 : index
    %c0_18 = arith.constant 0 : index
    %c0_19 = arith.constant 0 : index
    %19 = vector.load %arg15[%c1_17, %c0_18, %c0_19] : memref<4x8x8xf32, #tpu.memory_space<vmem>>, vector<1x8x8xf32>
    %20 = vector.shape_cast %19 : vector<1x8x8xf32> to vector<8x8xf32>
    %21 = vector.shape_cast %18 : vector<8x8xf32> to vector<1x8x8xf32>
    tpu.vector_store %arg15[%c1_17, %c0_18, %c0_19], %21 {strides = array<i32>} : memref<4x8x8xf32, #tpu.memory_space<vmem>>, vector<1x8x8xf32>,
    %c2 = arith.constant 2 : index
    %c0_20 = arith.constant 0 : index
    %c0_21 = arith.constant 0 : index
    %22 = vector.load %arg2[%c2, %c0_20, %c0_21] : memref<12x32x8xf32, #tpu.memory_space<vmem>>, vector<1x32x8xf32>
    %23 = vector.shape_cast %22 : vector<1x32x8xf32> to vector<32x8xf32>
    %cst_22 = arith.constant dense<0.000000e+00> : vector<8x8xf32>
    %24 = tpu.matmul %1, %23, %cst_22 {dimension_numbers = #tpu.dot_dimension_numbers<[1], [0], [0], [1], [0, 0, 1, 1], [], []>} : vector<8x32xf32>, vector<32x8xf32>, vector<8x8xf32> -> vector<8x8xf32>
    %c2_23 = arith.constant 2 : index
    %c0_24 = arith.constant 0 : index
    %c0_25 = arith.constant 0 : index
    %25 = vector.load %arg3[%c2_23, %c0_24, %c0_25] : memref<12x1x8xf32, #tpu.memory_space<vmem>>, vector<1x1x8xf32>
    %26 = vector.shape_cast %25 : vector<1x1x8xf32> to vector<1x8xf32>
    %27 = vector.broadcast %26 : vector<1x8xf32> to vector<8x8xf32>
    %28 = arith.addf %24, %27 : vector<8x8xf32>
    %c2_26 = arith.constant 2 : index
    %c0_27 = arith.constant 0 : index
    %c0_28 = arith.constant 0 : index
    %29 = vector.load %arg15[%c2_26, %c0_27, %c0_28] : memref<4x8x8xf32, #tpu.memory_space<vmem>>, vector<1x8x8xf32>
    %30 = vector.shape_cast %29 : vector<1x8x8xf32> to vector<8x8xf32>
    %31 = vector.shape_cast %28 : vector<8x8xf32> to vector<1x8x8xf32>
    tpu.vector_store %arg15[%c2_26, %c0_27, %c0_28], %31 {strides = array<i32>} : memref<4x8x8xf32, #tpu.memory_space<vmem>>, vector<1x8x8xf32>,
    %c3 = arith.constant 3 : index
    %c0_29 = arith.constant 0 : index
    %c0_30 = arith.constant 0 : index
    %32 = vector.load %arg2[%c3, %c0_29, %c0_30] : memref<12x32x8xf32, #tpu.memory_space<vmem>>, vector<1x32x8xf32>
    %33 = vector.shape_cast %32 : vector<1x32x8xf32> to vector<32x8xf32>
    %cst_31 = arith.constant dense<0.000000e+00> : vector<8x8xf32>
    %34 = tpu.matmul %1, %33, %cst_31 {dimension_numbers = #tpu.dot_dimension_numbers<[1], [0], [0], [1], [0, 0, 1, 1], [], []>} : vector<8x32xf32>, vector<32x8xf32>, vector<8x8xf32> -> vector<8x8xf32>
    %c3_32 = arith.constant 3 : index
    %c0_33 = arith.constant 0 : index
    %c0_34 = arith.constant 0 : index
    %35 = vector.load %arg3[%c3_32, %c0_33, %c0_34] : memref<12x1x8xf32, #tpu.memory_space<vmem>>, vector<1x1x8xf32>
    %36 = vector.shape_cast %35 : vector<1x1x8xf32> to vector<1x8xf32>
    %37 = vector.broadcast %36 : vector<1x8xf32> to vector<8x8xf32>
    %38 = arith.addf %34, %37 : vector<8x8xf32>
    %c3_35 = arith.constant 3 : index
    %c0_36 = arith.constant 0 : index
    %c0_37 = arith.constant 0 : index
    %39 = vector.load %arg15[%c3_35, %c0_36, %c0_37] : memref<4x8x8xf32, #tpu.memory_space<vmem>>, vector<1x8x8xf32>
    %40 = vector.shape_cast %39 : vector<1x8x8xf32> to vector<8x8xf32>
    %41 = vector.shape_cast %38 : vector<8x8xf32> to vector<1x8x8xf32>
    tpu.vector_store %arg15[%c3_35, %c0_36, %c0_37], %41 {strides = array<i32>} : memref<4x8x8xf32, #tpu.memory_space<vmem>>, vector<1x8x8xf32>,
    %c4 = arith.constant 4 : index
    %c0_38 = arith.constant 0 : index
    %c0_39 = arith.constant 0 : index
    %42 = vector.load %arg2[%c4, %c0_38, %c0_39] : memref<12x32x8xf32, #tpu.memory_space<vmem>>, vector<1x32x8xf32>
    %43 = vector.shape_cast %42 : vector<1x32x8xf32> to vector<32x8xf32>
    %cst_40 = arith.constant dense<0.000000e+00> : vector<8x8xf32>
    %44 = tpu.matmul %1, %43, %cst_40 {dimension_numbers = #tpu.dot_dimension_numbers<[1], [0], [0], [1], [0, 0, 1, 1], [], []>} : vector<8x32xf32>, vector<32x8xf32>, vector<8x8xf32> -> vector<8x8xf32>
    %c4_41 = arith.constant 4 : index
    %c0_42 = arith.constant 0 : index
    %c0_43 = arith.constant 0 : index
    %45 = vector.load %arg3[%c4_41, %c0_42, %c0_43] : memref<12x1x8xf32, #tpu.memory_space<vmem>>, vector<1x1x8xf32>
    %46 = vector.shape_cast %45 : vector<1x1x8xf32> to vector<1x8xf32>
    %47 = vector.broadcast %46 : vector<1x8xf32> to vector<8x8xf32>
    %48 = arith.addf %44, %47 : vector<8x8xf32>
    %c8 = arith.constant 8 : index
    %c0_44 = arith.constant 0 : index
    %c0_45 = arith.constant 0 : index
    %49 = vector.load %arg2[%c8, %c0_44, %c0_45] : memref<12x32x8xf32, #tpu.memory_space<vmem>>, vector<1x32x8xf32>
    %50 = vector.shape_cast %49 : vector<1x32x8xf32> to vector<32x8xf32>
    %cst_46 = arith.constant dense<0.000000e+00> : vector<8x8xf32>
    %51 = tpu.matmul %1, %50, %cst_46 {dimension_numbers = #tpu.dot_dimension_numbers<[1], [0], [0], [1], [0, 0, 1, 1], [], []>} : vector<8x32xf32>, vector<32x8xf32>, vector<8x8xf32> -> vector<8x8xf32>
    %c8_47 = arith.constant 8 : index
    %c0_48 = arith.constant 0 : index
    %c0_49 = arith.constant 0 : index
    %52 = vector.load %arg3[%c8_47, %c0_48, %c0_49] : memref<12x1x8xf32, #tpu.memory_space<vmem>>, vector<1x1x8xf32>
    %53 = vector.shape_cast %52 : vector<1x1x8xf32> to vector<1x8xf32>
    %54 = vector.broadcast %53 : vector<1x8xf32> to vector<8x8xf32>
    %55 = arith.addf %51, %54 : vector<8x8xf32>
    %c0_50 = arith.constant 0 : index
    %c0_51 = arith.constant 0 : index
    %c0_52 = arith.constant 0 : index
    %c0_53 = arith.constant 0 : index
    %56 = vector.load %arg16[%c0_50, %c0_51, %c0_52, %c0_53] : memref<1x4x8x8xf32, #tpu.memory_space<vmem>>, vector<1x1x8x8xf32>
    %57 = vector.shape_cast %56 : vector<1x1x8x8xf32> to vector<8x8xf32>
    %58 = vector.shape_cast %48 : vector<8x8xf32> to vector<1x1x8x8xf32>
    tpu.vector_store %arg16[%c0_50, %c0_51, %c0_52, %c0_53], %58 {strides = array<i32>} : memref<1x4x8x8xf32, #tpu.memory_space<vmem>>, vector<1x1x8x8xf32>,
    %c0_54 = arith.constant 0 : index
    %c0_55 = arith.constant 0 : index
    %c0_56 = arith.constant 0 : index
    %c0_57 = arith.constant 0 : index
    %59 = vector.load %arg17[%c0_54, %c0_55, %c0_56, %c0_57] : memref<1x4x8x8xf32, #tpu.memory_space<vmem>>, vector<1x1x8x8xf32>
    %60 = vector.shape_cast %59 : vector<1x1x8x8xf32> to vector<8x8xf32>
    %61 = vector.shape_cast %55 : vector<8x8xf32> to vector<1x1x8x8xf32>
    tpu.vector_store %arg17[%c0_54, %c0_55, %c0_56, %c0_57], %61 {strides = array<i32>} : memref<1x4x8x8xf32, #tpu.memory_space<vmem>>, vector<1x1x8x8xf32>,
    %c5 = arith.constant 5 : index
    %c0_58 = arith.constant 0 : index
    %c0_59 = arith.constant 0 : index
    %62 = vector.load %arg2[%c5, %c0_58, %c0_59] : memref<12x32x8xf32, #tpu.memory_space<vmem>>, vector<1x32x8xf32>
    %63 = vector.shape_cast %62 : vector<1x32x8xf32> to vector<32x8xf32>
    %cst_60 = arith.constant dense<0.000000e+00> : vector<8x8xf32>
    %64 = tpu.matmul %1, %63, %cst_60 {dimension_numbers = #tpu.dot_dimension_numbers<[1], [0], [0], [1], [0, 0, 1, 1], [], []>} : vector<8x32xf32>, vector<32x8xf32>, vector<8x8xf32> -> vector<8x8xf32>
    %c5_61 = arith.constant 5 : index
    %c0_62 = arith.constant 0 : index
    %c0_63 = arith.constant 0 : index
    %65 = vector.load %arg3[%c5_61, %c0_62, %c0_63] : memref<12x1x8xf32, #tpu.memory_space<vmem>>, vector<1x1x8xf32>
    %66 = vector.shape_cast %65 : vector<1x1x8xf32> to vector<1x8xf32>
    %67 = vector.broadcast %66 : vector<1x8xf32> to vector<8x8xf32>
    %68 = arith.addf %64, %67 : vector<8x8xf32>
    %c9 = arith.constant 9 : index
    %c0_64 = arith.constant 0 : index
    %c0_65 = arith.constant 0 : index
    %69 = vector.load %arg2[%c9, %c0_64, %c0_65] : memref<12x32x8xf32, #tpu.memory_space<vmem>>, vector<1x32x8xf32>
    %70 = vector.shape_cast %69 : vector<1x32x8xf32> to vector<32x8xf32>
    %cst_66 = arith.constant dense<0.000000e+00> : vector<8x8xf32>
    %71 = tpu.matmul %1, %70, %cst_66 {dimension_numbers = #tpu.dot_dimension_numbers<[1], [0], [0], [1], [0, 0, 1, 1], [], []>} : vector<8x32xf32>, vector<32x8xf32>, vector<8x8xf32> -> vector<8x8xf32>
    %c9_67 = arith.constant 9 : index
    %c0_68 = arith.constant 0 : index
    %c0_69 = arith.constant 0 : index
    %72 = vector.load %arg3[%c9_67, %c0_68, %c0_69] : memref<12x1x8xf32, #tpu.memory_space<vmem>>, vector<1x1x8xf32>
    %73 = vector.shape_cast %72 : vector<1x1x8xf32> to vector<1x8xf32>
    %74 = vector.broadcast %73 : vector<1x8xf32> to vector<8x8xf32>
    %75 = arith.addf %71, %74 : vector<8x8xf32>
    %c0_70 = arith.constant 0 : index
    %c1_71 = arith.constant 1 : index
    %c0_72 = arith.constant 0 : index
    %c0_73 = arith.constant 0 : index
    %76 = vector.load %arg16[%c0_70, %c1_71, %c0_72, %c0_73] : memref<1x4x8x8xf32, #tpu.memory_space<vmem>>, vector<1x1x8x8xf32>
    %77 = vector.shape_cast %76 : vector<1x1x8x8xf32> to vector<8x8xf32>
    %78 = vector.shape_cast %68 : vector<8x8xf32> to vector<1x1x8x8xf32>
    tpu.vector_store %arg16[%c0_70, %c1_71, %c0_72, %c0_73], %78 {strides = array<i32>} : memref<1x4x8x8xf32, #tpu.memory_space<vmem>>, vector<1x1x8x8xf32>,
    %c0_74 = arith.constant 0 : index
    %c1_75 = arith.constant 1 : index
    %c0_76 = arith.constant 0 : index
    %c0_77 = arith.constant 0 : index
    %79 = vector.load %arg17[%c0_74, %c1_75, %c0_76, %c0_77] : memref<1x4x8x8xf32, #tpu.memory_space<vmem>>, vector<1x1x8x8xf32>
    %80 = vector.shape_cast %79 : vector<1x1x8x8xf32> to vector<8x8xf32>
    %81 = vector.shape_cast %75 : vector<8x8xf32> to vector<1x1x8x8xf32>
    tpu.vector_store %arg17[%c0_74, %c1_75, %c0_76, %c0_77], %81 {strides = array<i32>} : memref<1x4x8x8xf32, #tpu.memory_space<vmem>>, vector<1x1x8x8xf32>,
    %c6 = arith.constant 6 : index
    %c0_78 = arith.constant 0 : index
    %c0_79 = arith.constant 0 : index
    %82 = vector.load %arg2[%c6, %c0_78, %c0_79] : memref<12x32x8xf32, #tpu.memory_space<vmem>>, vector<1x32x8xf32>
    %83 = vector.shape_cast %82 : vector<1x32x8xf32> to vector<32x8xf32>
    %cst_80 = arith.constant dense<0.000000e+00> : vector<8x8xf32>
    %84 = tpu.matmul %1, %83, %cst_80 {dimension_numbers = #tpu.dot_dimension_numbers<[1], [0], [0], [1], [0, 0, 1, 1], [], []>} : vector<8x32xf32>, vector<32x8xf32>, vector<8x8xf32> -> vector<8x8xf32>
    %c6_81 = arith.constant 6 : index
    %c0_82 = arith.constant 0 : index
    %c0_83 = arith.constant 0 : index
    %85 = vector.load %arg3[%c6_81, %c0_82, %c0_83] : memref<12x1x8xf32, #tpu.memory_space<vmem>>, vector<1x1x8xf32>
    %86 = vector.shape_cast %85 : vector<1x1x8xf32> to vector<1x8xf32>
    %87 = vector.broadcast %86 : vector<1x8xf32> to vector<8x8xf32>
    %88 = arith.addf %84, %87 : vector<8x8xf32>
    %c10 = arith.constant 10 : index
    %c0_84 = arith.constant 0 : index
    %c0_85 = arith.constant 0 : index
    %89 = vector.load %arg2[%c10, %c0_84, %c0_85] : memref<12x32x8xf32, #tpu.memory_space<vmem>>, vector<1x32x8xf32>
    %90 = vector.shape_cast %89 : vector<1x32x8xf32> to vector<32x8xf32>
    %cst_86 = arith.constant dense<0.000000e+00> : vector<8x8xf32>
    %91 = tpu.matmul %1, %90, %cst_86 {dimension_numbers = #tpu.dot_dimension_numbers<[1], [0], [0], [1], [0, 0, 1, 1], [], []>} : vector<8x32xf32>, vector<32x8xf32>, vector<8x8xf32> -> vector<8x8xf32>
    %c10_87 = arith.constant 10 : index
    %c0_88 = arith.constant 0 : index
    %c0_89 = arith.constant 0 : index
    %92 = vector.load %arg3[%c10_87, %c0_88, %c0_89] : memref<12x1x8xf32, #tpu.memory_space<vmem>>, vector<1x1x8xf32>
    %93 = vector.shape_cast %92 : vector<1x1x8xf32> to vector<1x8xf32>
    %94 = vector.broadcast %93 : vector<1x8xf32> to vector<8x8xf32>
    %95 = arith.addf %91, %94 : vector<8x8xf32>
    %c0_90 = arith.constant 0 : index
    %c2_91 = arith.constant 2 : index
    %c0_92 = arith.constant 0 : index
    %c0_93 = arith.constant 0 : index
    %96 = vector.load %arg16[%c0_90, %c2_91, %c0_92, %c0_93] : memref<1x4x8x8xf32, #tpu.memory_space<vmem>>, vector<1x1x8x8xf32>
    %97 = vector.shape_cast %96 : vector<1x1x8x8xf32> to vector<8x8xf32>
    %98 = vector.shape_cast %88 : vector<8x8xf32> to vector<1x1x8x8xf32>
    tpu.vector_store %arg16[%c0_90, %c2_91, %c0_92, %c0_93], %98 {strides = array<i32>} : memref<1x4x8x8xf32, #tpu.memory_space<vmem>>, vector<1x1x8x8xf32>,
    %c0_94 = arith.constant 0 : index
    %c2_95 = arith.constant 2 : index
    %c0_96 = arith.constant 0 : index
    %c0_97 = arith.constant 0 : index
    %99 = vector.load %arg17[%c0_94, %c2_95, %c0_96, %c0_97] : memref<1x4x8x8xf32, #tpu.memory_space<vmem>>, vector<1x1x8x8xf32>
    %100 = vector.shape_cast %99 : vector<1x1x8x8xf32> to vector<8x8xf32>
    %101 = vector.shape_cast %95 : vector<8x8xf32> to vector<1x1x8x8xf32>
    tpu.vector_store %arg17[%c0_94, %c2_95, %c0_96, %c0_97], %101 {strides = array<i32>} : memref<1x4x8x8xf32, #tpu.memory_space<vmem>>, vector<1x1x8x8xf32>,
    %c7 = arith.constant 7 : index
    %c0_98 = arith.constant 0 : index
    %c0_99 = arith.constant 0 : index
    %102 = vector.load %arg2[%c7, %c0_98, %c0_99] : memref<12x32x8xf32, #tpu.memory_space<vmem>>, vector<1x32x8xf32>
    %103 = vector.shape_cast %102 : vector<1x32x8xf32> to vector<32x8xf32>
    %cst_100 = arith.constant dense<0.000000e+00> : vector<8x8xf32>
    %104 = tpu.matmul %1, %103, %cst_100 {dimension_numbers = #tpu.dot_dimension_numbers<[1], [0], [0], [1], [0, 0, 1, 1], [], []>} : vector<8x32xf32>, vector<32x8xf32>, vector<8x8xf32> -> vector<8x8xf32>
    %c7_101 = arith.constant 7 : index
    %c0_102 = arith.constant 0 : index
    %c0_103 = arith.constant 0 : index
    %105 = vector.load %arg3[%c7_101, %c0_102, %c0_103] : memref<12x1x8xf32, #tpu.memory_space<vmem>>, vector<1x1x8xf32>
    %106 = vector.shape_cast %105 : vector<1x1x8xf32> to vector<1x8xf32>
    %107 = vector.broadcast %106 : vector<1x8xf32> to vector<8x8xf32>
    %108 = arith.addf %104, %107 : vector<8x8xf32>
    %c11 = arith.constant 11 : index
    %c0_104 = arith.constant 0 : index
    %c0_105 = arith.constant 0 : index
    %109 = vector.load %arg2[%c11, %c0_104, %c0_105] : memref<12x32x8xf32, #tpu.memory_space<vmem>>, vector<1x32x8xf32>
    %110 = vector.shape_cast %109 : vector<1x32x8xf32> to vector<32x8xf32>
    %cst_106 = arith.constant dense<0.000000e+00> : vector<8x8xf32>
    %111 = tpu.matmul %1, %110, %cst_106 {dimension_numbers = #tpu.dot_dimension_numbers<[1], [0], [0], [1], [0, 0, 1, 1], [], []>} : vector<8x32xf32>, vector<32x8xf32>, vector<8x8xf32> -> vector<8x8xf32>
    %c11_107 = arith.constant 11 : index
    %c0_108 = arith.constant 0 : index
    %c0_109 = arith.constant 0 : index
    %112 = vector.load %arg3[%c11_107, %c0_108, %c0_109] : memref<12x1x8xf32, #tpu.memory_space<vmem>>, vector<1x1x8xf32>
    %113 = vector.shape_cast %112 : vector<1x1x8xf32> to vector<1x8xf32>
    %114 = vector.broadcast %113 : vector<1x8xf32> to vector<8x8xf32>
    %115 = arith.addf %111, %114 : vector<8x8xf32>
    %c0_110 = arith.constant 0 : index
    %c3_111 = arith.constant 3 : index
    %c0_112 = arith.constant 0 : index
    %c0_113 = arith.constant 0 : index
    %116 = vector.load %arg16[%c0_110, %c3_111, %c0_112, %c0_113] : memref<1x4x8x8xf32, #tpu.memory_space<vmem>>, vector<1x1x8x8xf32>
    %117 = vector.shape_cast %116 : vector<1x1x8x8xf32> to vector<8x8xf32>
    %118 = vector.shape_cast %108 : vector<8x8xf32> to vector<1x1x8x8xf32>
    tpu.vector_store %arg16[%c0_110, %c3_111, %c0_112, %c0_113], %118 {strides = array<i32>} : memref<1x4x8x8xf32, #tpu.memory_space<vmem>>, vector<1x1x8x8xf32>,
    %c0_114 = arith.constant 0 : index
    %c3_115 = arith.constant 3 : index
    %c0_116 = arith.constant 0 : index
    %c0_117 = arith.constant 0 : index
    %119 = vector.load %arg17[%c0_114, %c3_115, %c0_116, %c0_117] : memref<1x4x8x8xf32, #tpu.memory_space<vmem>>, vector<1x1x8x8xf32>
    %120 = vector.shape_cast %119 : vector<1x1x8x8xf32> to vector<8x8xf32>
    %121 = vector.shape_cast %115 : vector<8x8xf32> to vector<1x1x8x8xf32>
    tpu.vector_store %arg17[%c0_114, %c3_115, %c0_116, %c0_117], %121 {strides = array<i32>} : memref<1x4x8x8xf32, #tpu.memory_space<vmem>>, vector<1x1x8x8xf32>,
    %c0_118 = arith.constant 0 : index
    %c0_119 = arith.constant 0 : index
    %c0_120 = arith.constant 0 : index
    %122 = vector.load %arg15[%c0_118, %c0_119, %c0_120] : memref<4x8x8xf32, #tpu.memory_space<vmem>>, vector<4x8x8xf32>
    %cst_121 = arith.constant 0.000000e+00 : f32
    %123 = vector.broadcast %cst_121 : f32 to vector<4x8x8xf32>
    %c0_122 = arith.constant 0 : index
    %c0_123 = arith.constant 0 : index
    %c0_124 = arith.constant 0 : index
    %124 = vector.load %arg18[%c0_122, %c0_123, %c0_124] : memref<4x8x8xf32, #tpu.memory_space<vmem>>, vector<4x8x8xf32>
    tpu.vector_store %arg18[%c0_122, %c0_123, %c0_124], %123 {strides = array<i32>} : memref<4x8x8xf32, #tpu.memory_space<vmem>>, vector<4x8x8xf32>,
    %cst_125 = arith.constant -1.000000e+30 : f32
    %125 = vector.broadcast %cst_125 : f32 to vector<4x8x1xf32>
    %cst_126 = arith.constant 0.000000e+00 : f32
    %126 = vector.broadcast %cst_126 : f32 to vector<4x8x1xf32>
    %c0_i32 = arith.constant 0 : i32
    %127 = arith.index_cast %c0_i32 : i32 to index
    %c0_127 = arith.constant 0 : index
    %c0_128 = arith.constant 0 : index
    %c0_129 = arith.constant 0 : index
    %128 = vector.load %arg16[%127, %c0_127, %c0_128, %c0_129] : memref<1x4x8x8xf32, #tpu.memory_space<vmem>>, vector<1x4x8x8xf32>
    %129 = vector.shape_cast %128 : vector<1x4x8x8xf32> to vector<4x8x8xf32>
    %130 = arith.index_cast %c0_i32 : i32 to index
    %c0_130 = arith.constant 0 : index
    %c0_131 = arith.constant 0 : index
    %c0_132 = arith.constant 0 : index
    %131 = vector.load %arg17[%130, %c0_130, %c0_131, %c0_132] : memref<1x4x8x8xf32, #tpu.memory_space<vmem>>, vector<1x4x8x8xf32>
    %132 = vector.shape_cast %131 : vector<1x4x8x8xf32> to vector<4x8x8xf32>
    "tpu.trace_start"() <{level = 10 : i32, message = "hqd,hkd->hqk"}> : () -> ()
    %cst_133 = arith.constant dense<0.000000e+00> : vector<4x8x8xf32>
    %133 = tpu.matmul %122, %129, %cst_133 {dimension_numbers = #tpu.dot_dimension_numbers<[2], [2], [1], [1], [0, 0, 0, 1, 1, 1], [0], [0]>} : vector<4x8x8xf32>, vector<4x8x8xf32>, vector<4x8x8xf32> -> vector<4x8x8xf32>
    "tpu.trace_stop"() : () -> ()
    %cst_134 = arith.constant dense<0xFF800000> : vector<4x8xf32>
    %134 = vector.multi_reduction <maximumf>, %133, %cst_134 [2] : vector<4x8x8xf32> to vector<4x8xf32>
    %135 = vector.shape_cast %134 : vector<4x8xf32> to vector<4x8x1xf32>
    %136 = arith.maximumf %125, %135 : vector<4x8x1xf32>
    %137 = arith.subf %125, %136 : vector<4x8x1xf32>
    %138 = math.exp %137 : vector<4x8x1xf32>
    %139 = vector.broadcast %136 : vector<4x8x1xf32> to vector<4x8x8xf32>
    %140 = arith.subf %133, %139 : vector<4x8x8xf32>
    %141 = math.exp %140 : vector<4x8x8xf32>
    %142 = arith.mulf %138, %126 : vector<4x8x1xf32>
    %cst_135 = arith.constant dense<0.000000e+00> : vector<4x8xf32>
    %143 = vector.multi_reduction <add>, %141, %cst_135 [2] : vector<4x8x8xf32> to vector<4x8xf32>
    %144 = vector.shape_cast %143 : vector<4x8xf32> to vector<4x8x1xf32>
    %145 = arith.addf %142, %144 : vector<4x8x1xf32>
    %c0_136 = arith.constant 0 : index
    %c0_137 = arith.constant 0 : index
    %c0_138 = arith.constant 0 : index
    %146 = vector.load %arg18[%c0_136, %c0_137, %c0_138] : memref<4x8x8xf32, #tpu.memory_space<vmem>>, vector<4x8x8xf32>
    %147 = vector.broadcast %138 : vector<4x8x1xf32> to vector<4x8x8xf32>
    %148 = arith.mulf %147, %146 : vector<4x8x8xf32>
    "tpu.trace_start"() <{level = 10 : i32, message = "hqk,hkd->hqd"}> : () -> ()
    %cst_139 = arith.constant dense<0.000000e+00> : vector<4x8x8xf32>
    %149 = tpu.matmul %141, %132, %cst_139 {dimension_numbers = #tpu.dot_dimension_numbers<[2], [1], [1], [2], [0, 0, 0, 1, 1, 2], [0], [0]>} : vector<4x8x8xf32>, vector<4x8x8xf32>, vector<4x8x8xf32> -> vector<4x8x8xf32>
    "tpu.trace_stop"() : () -> ()
    %150 = arith.addf %148, %149 : vector<4x8x8xf32>
    %c0_140 = arith.constant 0 : index
    %c0_141 = arith.constant 0 : index
    %c0_142 = arith.constant 0 : index
    %151 = vector.load %arg18[%c0_140, %c0_141, %c0_142] : memref<4x8x8xf32, #tpu.memory_space<vmem>>, vector<4x8x8xf32>
    tpu.vector_store %arg18[%c0_140, %c0_141, %c0_142], %150 {strides = array<i32>} : memref<4x8x8xf32, #tpu.memory_space<vmem>>, vector<4x8x8xf32>,
    %c1_i32 = arith.constant 1 : i32
    %c0_143 = arith.constant 0 : index
    %c0_144 = arith.constant 0 : index
    %c0_145 = arith.constant 0 : index
    %152 = vector.load %arg18[%c0_143, %c0_144, %c0_145] : memref<4x8x8xf32, #tpu.memory_space<vmem>>, vector<4x8x8xf32>
    %153 = tpu.reciprocal %145 : vector<4x8x1xf32> -> vector<4x8x1xf32>
    %154 = vector.broadcast %153 : vector<4x8x1xf32> to vector<4x8x8xf32>
    %155 = arith.mulf %152, %154 : vector<4x8x8xf32>
    %c0_146 = arith.constant 0 : index
    %c0_147 = arith.constant 0 : index
    %c0_148 = arith.constant 0 : index
    %156 = vector.load %arg18[%c0_146, %c0_147, %c0_148] : memref<4x8x8xf32, #tpu.memory_space<vmem>>, vector<4x8x8xf32>
    tpu.vector_store %arg18[%c0_146, %c0_147, %c0_148], %155 {strides = array<i32>} : memref<4x8x8xf32, #tpu.memory_space<vmem>>, vector<4x8x8xf32>,
    %cst_149 = arith.constant 0.000000e+00 : f32
    %157 = vector.broadcast %cst_149 : f32 to vector<8x32xf32>
    %c0_i32_150 = arith.constant 0 : i32
    %158 = arith.index_cast %c0_i32_150 : i32 to index
    %c0_151 = arith.constant 0 : index
    %c0_152 = arith.constant 0 : index
    %159 = vector.load %arg18[%158, %c0_151, %c0_152] : memref<4x8x8xf32, #tpu.memory_space<vmem>>, vector<1x8x8xf32>
    %160 = vector.shape_cast %159 : vector<1x8x8xf32> to vector<8x8xf32>
    %161 = arith.index_cast %c0_i32_150 : i32 to index
    %c0_153 = arith.constant 0 : index
    %c0_154 = arith.constant 0 : index
    %162 = vector.load %arg4[%161, %c0_153, %c0_154] : memref<4x8x32xf32, #tpu.memory_space<vmem>>, vector<1x8x32xf32>
    %163 = vector.shape_cast %162 : vector<1x8x32xf32> to vector<8x32xf32>
    %cst_155 = arith.constant dense<0.000000e+00> : vector<8x32xf32>
    %164 = tpu.matmul %160, %163, %cst_155 {dimension_numbers = #tpu.dot_dimension_numbers<[1], [0], [0], [1], [0, 0, 1, 1], [], []>} : vector<8x8xf32>, vector<8x32xf32>, vector<8x32xf32> -> vector<8x32xf32>
    %165 = arith.addf %157, %164 : vector<8x32xf32>
    %c1_i32_156 = arith.constant 1 : i32
    %166 = arith.index_cast %c1_i32_156 : i32 to index
    %c0_157 = arith.constant 0 : index
    %c0_158 = arith.constant 0 : index
    %167 = vector.load %arg18[%166, %c0_157, %c0_158] : memref<4x8x8xf32, #tpu.memory_space<vmem>>, vector<1x8x8xf32>
    %168 = vector.shape_cast %167 : vector<1x8x8xf32> to vector<8x8xf32>
    %169 = arith.index_cast %c1_i32_156 : i32 to index
    %c0_159 = arith.constant 0 : index
    %c0_160 = arith.constant 0 : index
    %170 = vector.load %arg4[%169, %c0_159, %c0_160] : memref<4x8x32xf32, #tpu.memory_space<vmem>>, vector<1x8x32xf32>
    %171 = vector.shape_cast %170 : vector<1x8x32xf32> to vector<8x32xf32>
    %cst_161 = arith.constant dense<0.000000e+00> : vector<8x32xf32>
    %172 = tpu.matmul %168, %171, %cst_161 {dimension_numbers = #tpu.dot_dimension_numbers<[1], [0], [0], [1], [0, 0, 1, 1], [], []>} : vector<8x8xf32>, vector<8x32xf32>, vector<8x32xf32> -> vector<8x32xf32>
    %173 = arith.addf %165, %172 : vector<8x32xf32>
    %c2_i32 = arith.constant 2 : i32
    %174 = arith.index_cast %c2_i32 : i32 to index
    %c0_162 = arith.constant 0 : index
    %c0_163 = arith.constant 0 : index
    %175 = vector.load %arg18[%174, %c0_162, %c0_163] : memref<4x8x8xf32, #tpu.memory_space<vmem>>, vector<1x8x8xf32>
    %176 = vector.shape_cast %175 : vector<1x8x8xf32> to vector<8x8xf32>
    %177 = arith.index_cast %c2_i32 : i32 to index
    %c0_164 = arith.constant 0 : index
    %c0_165 = arith.constant 0 : index
    %178 = vector.load %arg4[%177, %c0_164, %c0_165] : memref<4x8x32xf32, #tpu.memory_space<vmem>>, vector<1x8x32xf32>
    %179 = vector.shape_cast %178 : vector<1x8x32xf32> to vector<8x32xf32>
    %cst_166 = arith.constant dense<0.000000e+00> : vector<8x32xf32>
    %180 = tpu.matmul %176, %179, %cst_166 {dimension_numbers = #tpu.dot_dimension_numbers<[1], [0], [0], [1], [0, 0, 1, 1], [], []>} : vector<8x8xf32>, vector<8x32xf32>, vector<8x32xf32> -> vector<8x32xf32>
    %181 = arith.addf %173, %180 : vector<8x32xf32>
    %c3_i32 = arith.constant 3 : i32
    %182 = arith.index_cast %c3_i32 : i32 to index
    %c0_167 = arith.constant 0 : index
    %c0_168 = arith.constant 0 : index
    %183 = vector.load %arg18[%182, %c0_167, %c0_168] : memref<4x8x8xf32, #tpu.memory_space<vmem>>, vector<1x8x8xf32>
    %184 = vector.shape_cast %183 : vector<1x8x8xf32> to vector<8x8xf32>
    %185 = arith.index_cast %c3_i32 : i32 to index
    %c0_169 = arith.constant 0 : index
    %c0_170 = arith.constant 0 : index
    %186 = vector.load %arg4[%185, %c0_169, %c0_170] : memref<4x8x32xf32, #tpu.memory_space<vmem>>, vector<1x8x32xf32>
    %187 = vector.shape_cast %186 : vector<1x8x32xf32> to vector<8x32xf32>
    %cst_171 = arith.constant dense<0.000000e+00> : vector<8x32xf32>
    %188 = tpu.matmul %184, %187, %cst_171 {dimension_numbers = #tpu.dot_dimension_numbers<[1], [0], [0], [1], [0, 0, 1, 1], [], []>} : vector<8x8xf32>, vector<8x32xf32>, vector<8x32xf32> -> vector<8x32xf32>
    %189 = arith.addf %181, %188 : vector<8x32xf32>
    %c4_i32 = arith.constant 4 : i32
    %c0_172 = arith.constant 0 : index
    %c0_173 = arith.constant 0 : index
    %190 = vector.load %arg5[%c0_172, %c0_173] : memref<1x32xf32, #tpu.memory_space<vmem>>, vector<1x32xf32>
    %191 = vector.broadcast %190 : vector<1x32xf32> to vector<8x32xf32>
    %192 = arith.addf %189, %191 : vector<8x32xf32>
    %193 = arith.addf %1, %192 : vector<8x32xf32>
    %c0_174 = arith.constant 0 : index
    %c0_175 = arith.constant 0 : index
    %194 = vector.load %arg6[%c0_174, %c0_175] : memref<1x32xf32, #tpu.memory_space<vmem>>, vector<1x32xf32>
    %c0_176 = arith.constant 0 : index
    %c0_177 = arith.constant 0 : index
    %195 = vector.load %arg7[%c0_176, %c0_177] : memref<1x32xf32, #tpu.memory_space<vmem>>, vector<1x32xf32>
    %cst_178 = arith.constant dense<0.000000e+00> : vector<8xf32>
    %196 = vector.multi_reduction <add>, %193, %cst_178 [1] : vector<8x32xf32> to vector<8xf32>
    %197 = vector.shape_cast %196 : vector<8xf32> to vector<8x1xf32>
    %cst_179 = arith.constant 3.200000e+01 : f32
    %198 = vector.broadcast %cst_179 : f32 to vector<8x1xf32>
    %199 = arith.divf %197, %198 : vector<8x1xf32>
    %200 = vector.broadcast %199 : vector<8x1xf32> to vector<8x32xf32>
    %201 = arith.subf %193, %200 : vector<8x32xf32>
    %202 = arith.mulf %201, %201 : vector<8x32xf32>
    %cst_180 = arith.constant dense<0.000000e+00> : vector<8xf32>
    %203 = vector.multi_reduction <add>, %202, %cst_180 [1] : vector<8x32xf32> to vector<8xf32>
    %204 = vector.shape_cast %203 : vector<8xf32> to vector<8x1xf32>
    %cst_181 = arith.constant 3.200000e+01 : f32
    %205 = vector.broadcast %cst_181 : f32 to vector<8x1xf32>
    %206 = arith.divf %204, %205 : vector<8x1xf32>
    %207 = vector.broadcast %199 : vector<8x1xf32> to vector<8x32xf32>
    %208 = arith.subf %193, %207 : vector<8x32xf32>
    %cst_182 = arith.constant 9.99999974E-6 : f32
    %209 = vector.broadcast %cst_182 : f32 to vector<8x1xf32>
    %210 = arith.addf %206, %209 : vector<8x1xf32>
    %211 = math.rsqrt %210 : vector<8x1xf32>
    %212 = vector.broadcast %211 : vector<8x1xf32> to vector<8x32xf32>
    %213 = arith.mulf %208, %212 : vector<8x32xf32>
    %214 = vector.broadcast %194 : vector<1x32xf32> to vector<8x32xf32>
    %215 = arith.mulf %213, %214 : vector<8x32xf32>
    %216 = vector.broadcast %195 : vector<1x32xf32> to vector<8x32xf32>
    %217 = arith.addf %215, %216 : vector<8x32xf32>
    %c0_183 = arith.constant 0 : index
    %c0_184 = arith.constant 0 : index
    %218 = vector.load %arg10[%c0_183, %c0_184] : memref<32x32xf32, #tpu.memory_space<vmem>>, vector<32x32xf32>
    %cst_185 = arith.constant dense<0.000000e+00> : vector<8x32xf32>
    %219 = tpu.matmul %217, %218, %cst_185 {dimension_numbers = #tpu.dot_dimension_numbers<[1], [0], [0], [1], [0, 0, 1, 1], [], []>} : vector<8x32xf32>, vector<32x32xf32>, vector<8x32xf32> -> vector<8x32xf32>
    %c0_186 = arith.constant 0 : index
    %c0_187 = arith.constant 0 : index
    %220 = vector.load %arg11[%c0_186, %c0_187] : memref<1x32xf32, #tpu.memory_space<vmem>>, vector<1x32xf32>
    %221 = vector.broadcast %220 : vector<1x32xf32> to vector<8x32xf32>
    %222 = arith.addf %219, %221 : vector<8x32xf32>
    %cst_188 = arith.constant 0.000000e+00 : f32
    %223 = vector.broadcast %cst_188 : f32 to vector<8x32xf32>
    %224 = arith.maximumf %222, %223 : vector<8x32xf32>
    %c0_189 = arith.constant 0 : index
    %c0_190 = arith.constant 0 : index
    %225 = vector.load %arg12[%c0_189, %c0_190] : memref<32x32xf32, #tpu.memory_space<vmem>>, vector<32x32xf32>
    %cst_191 = arith.constant dense<0.000000e+00> : vector<8x32xf32>
    %226 = tpu.matmul %224, %225, %cst_191 {dimension_numbers = #tpu.dot_dimension_numbers<[1], [0], [0], [1], [0, 0, 1, 1], [], []>} : vector<8x32xf32>, vector<32x32xf32>, vector<8x32xf32> -> vector<8x32xf32>
    %c0_192 = arith.constant 0 : index
    %c0_193 = arith.constant 0 : index
    %227 = vector.load %arg13[%c0_192, %c0_193] : memref<1x32xf32, #tpu.memory_space<vmem>>, vector<1x32xf32>
    %228 = vector.broadcast %227 : vector<1x32xf32> to vector<8x32xf32>
    %229 = arith.addf %226, %228 : vector<8x32xf32>
    %230 = arith.addf %217, %229 : vector<8x32xf32>
    %c0_194 = arith.constant 0 : index
    %c0_195 = arith.constant 0 : index
    %231 = vector.load %arg8[%c0_194, %c0_195] : memref<1x32xf32, #tpu.memory_space<vmem>>, vector<1x32xf32>
    %c0_196 = arith.constant 0 : index
    %c0_197 = arith.constant 0 : index
    %232 = vector.load %arg9[%c0_196, %c0_197] : memref<1x32xf32, #tpu.memory_space<vmem>>, vector<1x32xf32>
    %cst_198 = arith.constant dense<0.000000e+00> : vector<8xf32>
    %233 = vector.multi_reduction <add>, %230, %cst_198 [1] : vector<8x32xf32> to vector<8xf32>
    %234 = vector.shape_cast %233 : vector<8xf32> to vector<8x1xf32>
    %cst_199 = arith.constant 3.200000e+01 : f32
    %235 = vector.broadcast %cst_199 : f32 to vector<8x1xf32>
    %236 = arith.divf %234, %235 : vector<8x1xf32>
    %237 = vector.broadcast %236 : vector<8x1xf32> to vector<8x32xf32>
    %238 = arith.subf %230, %237 : vector<8x32xf32>
    %239 = arith.mulf %238, %238 : vector<8x32xf32>
    %cst_200 = arith.constant dense<0.000000e+00> : vector<8xf32>
    %240 = vector.multi_reduction <add>, %239, %cst_200 [1] : vector<8x32xf32> to vector<8xf32>
    %241 = vector.shape_cast %240 : vector<8xf32> to vector<8x1xf32>
    %cst_201 = arith.constant 3.200000e+01 : f32
    %242 = vector.broadcast %cst_201 : f32 to vector<8x1xf32>
    %243 = arith.divf %241, %242 : vector<8x1xf32>
    %244 = vector.broadcast %236 : vector<8x1xf32> to vector<8x32xf32>
    %245 = arith.subf %230, %244 : vector<8x32xf32>
    %cst_202 = arith.constant 9.99999974E-6 : f32
    %246 = vector.broadcast %cst_202 : f32 to vector<8x1xf32>
    %247 = arith.addf %243, %246 : vector<8x1xf32>
    %248 = math.rsqrt %247 : vector<8x1xf32>
    %249 = vector.broadcast %248 : vector<8x1xf32> to vector<8x32xf32>
    %250 = arith.mulf %245, %249 : vector<8x32xf32>
    %251 = vector.broadcast %231 : vector<1x32xf32> to vector<8x32xf32>
    %252 = arith.mulf %250, %251 : vector<8x32xf32>
    %253 = vector.broadcast %232 : vector<1x32xf32> to vector<8x32xf32>
    %254 = arith.addf %252, %253 : vector<8x32xf32>
    %c0_203 = arith.constant 0 : index
    %c0_204 = arith.constant 0 : index
    %c0_205 = arith.constant 0 : index
    %255 = vector.load %arg14[%c0_203, %c0_204, %c0_205] : memref<1x8x32xf32, #tpu.memory_space<vmem>>, vector<1x8x32xf32>
    %256 = vector.shape_cast %255 : vector<1x8x32xf32> to vector<8x32xf32>
    %257 = vector.shape_cast %254 : vector<8x32xf32> to vector<1x8x32xf32>
    tpu.vector_store %arg14[%c0_203, %c0_204, %c0_205], %257 {strides = array<i32>} : memref<1x8x32xf32, #tpu.memory_space<vmem>>, vector<1x8x32xf32>,
    return
  }
  func.func @transform_0(%arg0: i32) -> (i32, i32, i32) {
    %c0_i32 = arith.constant 0 : i32
    %c0_i32_0 = arith.constant 0 : i32
    %c0_i32_1 = arith.constant 0 : i32
    return %arg0, %c0_i32, %c0_i32_0 : i32, i32, i32
  }
  func.func @transform_1(%arg0: i32) -> (i32, i32, i32) {
    %c0_i32 = arith.constant 0 : i32
    %c0_i32_0 = arith.constant 0 : i32
    %c0_i32_1 = arith.constant 0 : i32
    %c0_i32_2 = arith.constant 0 : i32
    return %c0_i32, %c0_i32_0, %c0_i32_1 : i32, i32, i32
  }
  func.func @transform_2(%arg0: i32) -> (i32, i32, i32) {
    %c0_i32 = arith.constant 0 : i32
    %c0_i32_0 = arith.constant 0 : i32
    %c0_i32_1 = arith.constant 0 : i32
    %c0_i32_2 = arith.constant 0 : i32
    return %c0_i32, %c0_i32_0, %c0_i32_1 : i32, i32, i32
  }
  func.func @transform_3(%arg0: i32) -> (i32, i32, i32) {
    %c0_i32 = arith.constant 0 : i32
    %c0_i32_0 = arith.constant 0 : i32
    %c0_i32_1 = arith.constant 0 : i32
    %c0_i32_2 = arith.constant 0 : i32
    return %c0_i32, %c0_i32_0, %c0_i32_1 : i32, i32, i32
  }
  func.func @transform_4(%arg0: i32) -> (i32, i32) {
    %c0_i32 = arith.constant 0 : i32
    %c0_i32_0 = arith.constant 0 : i32
    %c0_i32_1 = arith.constant 0 : i32
    return %c0_i32, %c0_i32_0 : i32, i32
  }
  func.func @transform_5(%arg0: i32) -> (i32, i32) {
    %c0_i32 = arith.constant 0 : i32
    %c0_i32_0 = arith.constant 0 : i32
    %c0_i32_1 = arith.constant 0 : i32
    return %c0_i32, %c0_i32_0 : i32, i32
  }
  func.func @transform_6(%arg0: i32) -> (i32, i32) {
    %c0_i32 = arith.constant 0 : i32
    %c0_i32_0 = arith.constant 0 : i32
    %c0_i32_1 = arith.constant 0 : i32
    return %c0_i32, %c0_i32_0 : i32, i32
  }
  func.func @transform_7(%arg0: i32) -> (i32, i32) {
    %c0_i32 = arith.constant 0 : i32
    %c0_i32_0 = arith.constant 0 : i32
    %c0_i32_1 = arith.constant 0 : i32
    return %c0_i32, %c0_i32_0 : i32, i32
  }
  func.func @transform_8(%arg0: i32) -> (i32, i32) {
    %c0_i32 = arith.constant 0 : i32
    %c0_i32_0 = arith.constant 0 : i32
    %c0_i32_1 = arith.constant 0 : i32
    return %c0_i32, %c0_i32_0 : i32, i32
  }
  func.func @transform_9(%arg0: i32) -> (i32, i32) {
    %c0_i32 = arith.constant 0 : i32
    %c0_i32_0 = arith.constant 0 : i32
    %c0_i32_1 = arith.constant 0 : i32
    return %c0_i32, %c0_i32_0 : i32, i32
  }
  func.func @transform_10(%arg0: i32) -> (i32, i32) {
    %c0_i32 = arith.constant 0 : i32
    %c0_i32_0 = arith.constant 0 : i32
    %c0_i32_1 = arith.constant 0 : i32
    return %c0_i32, %c0_i32_0 : i32, i32
  }
  func.func @transform_11(%arg0: i32) -> (i32, i32) {
    %c0_i32 = arith.constant 0 : i32
    %c0_i32_0 = arith.constant 0 : i32
    %c0_i32_1 = arith.constant 0 : i32
    return %c0_i32, %c0_i32_0 : i32, i32
  }
  func.func @transform_12(%arg0: i32) -> (i32, i32) {
    %c0_i32 = arith.constant 0 : i32
    %c0_i32_0 = arith.constant 0 : i32
    %c0_i32_1 = arith.constant 0 : i32
    return %c0_i32, %c0_i32_0 : i32, i32
  }
  func.func @transform_13(%arg0: i32) -> (i32, i32, i32) {
    %c0_i32 = arith.constant 0 : i32
    %c0_i32_0 = arith.constant 0 : i32
    %c0_i32_1 = arith.constant 0 : i32
    return %arg0, %c0_i32, %c0_i32_0 : i32, i32, i32
  }
}

module attributes {stable_mosaic.version = 11 : i64} {
  func.func @transformer_block_kernel(%arg0: i32, %arg1: memref<1x8x32xf32, #tpu.memory_space<vmem>>, %arg2: memref<12x32x8xf32, #tpu.memory_space<vmem>>, %arg3: memref<12x1x8xf32, #tpu.memory_space<vmem>>, %arg4: memref<4x8x32xf32, #tpu.memory_space<vmem>>, %arg5: memref<1x32xf32, #tpu.memory_space<vmem>>, %arg6: memref<1x32xf32, #tpu.memory_space<vmem>>, %arg7: memref<1x32xf32, #tpu.memory_space<vmem>>, %arg8: memref<1x32xf32, #tpu.memory_space<vmem>>, %arg9: memref<1x32xf32, #tpu.memory_space<vmem>>, %arg10: memref<32x32xf32, #tpu.memory_space<vmem>>, %arg11: memref<1x32xf32, #tpu.memory_space<vmem>>, %arg12: memref<32x32xf32, #tpu.memory_space<vmem>>, %arg13: memref<1x32xf32, #tpu.memory_space<vmem>>, %arg14: memref<1x8x32xf32, #tpu.memory_space<vmem>>, %arg15: memref<4x8x8xf32, #tpu.memory_space<vmem>>, %arg16: memref<1x4x8x8xf32, #tpu.memory_space<vmem>>, %arg17: memref<1x4x8x8xf32, #tpu.memory_space<vmem>>, %arg18: memref<4x8x8xf32, #tpu.memory_space<vmem>>) attributes {dimension_semantics = [#tpu.dimension_semantics<parallel>], iteration_bounds = array<i64: 2>, scalar_prefetch = 0 : i64, scratch_operands = 4 : i64, tpu.core_type = #tpu.core_type<tc>, window_params = [{transform_indices = @transform_0, window_bounds = array<i64: 1, 8, 32>}, {pipeline_mode = #tpu.pipeline_mode<synchronous>, transform_indices = @transform_1, window_bounds = array<i64: 12, 32, 8>}, {pipeline_mode = #tpu.pipeline_mode<synchronous>, transform_indices = @transform_2, window_bounds = array<i64: 12, 1, 8>}, {pipeline_mode = #tpu.pipeline_mode<synchronous>, transform_indices = @transform_3, window_bounds = array<i64: 4, 8, 32>}, {pipeline_mode = #tpu.pipeline_mode<synchronous>, transform_indices = @transform_4, window_bounds = array<i64: 1, 32>}, {pipeline_mode = #tpu.pipeline_mode<synchronous>, transform_indices = @transform_5, window_bounds = array<i64: 1, 32>}, {pipeline_mode = #tpu.pipeline_mode<synchronous>, transform_indices = @transform_6, window_bounds = array<i64: 1, 32>}, {pipeline_mode = #tpu.pipeline_mode<synchronous>, transform_indices = @transform_7, window_bounds = array<i64: 1, 32>}, {pipeline_mode = #tpu.pipeline_mode<synchronous>, transform_indices = @transform_8, window_bounds = array<i64: 1, 32>}, {pipeline_mode = #tpu.pipeline_mode<synchronous>, transform_indices = @transform_9, window_bounds = array<i64: 32, 32>}, {pipeline_mode = #tpu.pipeline_mode<synchronous>, transform_indices = @transform_10, window_bounds = array<i64: 1, 32>}, {pipeline_mode = #tpu.pipeline_mode<synchronous>, transform_indices = @transform_11, window_bounds = array<i64: 32, 32>}, {pipeline_mode = #tpu.pipeline_mode<synchronous>, transform_indices = @transform_12, window_bounds = array<i64: 1, 32>}, {transform_indices = @transform_13, window_bounds = array<i64: 1, 8, 32>}]} {
    %c0 = arith.constant 0 : index
    %c0_0 = arith.constant 0 : index
    %c0_1 = arith.constant 0 : index
    %0 = vector.load %arg1[%c0, %c0_0, %c0_1] : memref<1x8x32xf32, #tpu.memory_space<vmem>>, vector<1x8x32xf32>
    %1 = vector.shape_cast %0 : vector<1x8x32xf32> to vector<8x32xf32>
    %c0_2 = arith.constant 0 : index
    %c0_3 = arith.constant 0 : index
    %c0_4 = arith.constant 0 : index
    %2 = vector.load %arg2[%c0_2, %c0_3, %c0_4] : memref<12x32x8xf32, #tpu.memory_space<vmem>>, vector<1x32x8xf32>
    %3 = vector.shape_cast %2 : vector<1x32x8xf32> to vector<32x8xf32>
    %cst = arith.constant dense<0.000000e+00> : vector<8x8xf32>
    %4 = tpu.matmul %1, %3, %cst {dimension_numbers = #tpu.dot_dimension_numbers<[1], [0], [0], [1], [0, 0, 1, 1], [], []>} : vector<8x32xf32>, vector<32x8xf32>, vector<8x8xf32> -> vector<8x8xf32>
    %c0_5 = arith.constant 0 : index
    %c0_6 = arith.constant 0 : index
    %c0_7 = arith.constant 0 : index
    %5 = vector.load %arg3[%c0_5, %c0_6, %c0_7] : memref<12x1x8xf32, #tpu.memory_space<vmem>>, vector<1x1x8xf32>
    %6 = vector.shape_cast %5 : vector<1x1x8xf32> to vector<1x8xf32>
    %7 = vector.broadcast %6 : vector<1x8xf32> to vector<8x8xf32>
    %8 = arith.addf %4, %7 : vector<8x8xf32>
    %c0_8 = arith.constant 0 : index
    %c0_9 = arith.constant 0 : index
    %c0_10 = arith.constant 0 : index
    %9 = vector.load %arg15[%c0_8, %c0_9, %c0_10] : memref<4x8x8xf32, #tpu.memory_space<vmem>>, vector<1x8x8xf32>
    %10 = vector.shape_cast %9 : vector<1x8x8xf32> to vector<8x8xf32>
    %11 = vector.shape_cast %8 : vector<8x8xf32> to vector<1x8x8xf32>
    tpu.vector_store %arg15[%c0_8, %c0_9, %c0_10], %11 {strides = array<i32>} : memref<4x8x8xf32, #tpu.memory_space<vmem>>, vector<1x8x8xf32>,
    %c1 = arith.constant 1 : index
    %c0_11 = arith.constant 0 : index
    %c0_12 = arith.constant 0 : index
    %12 = vector.load %arg2[%c1, %c0_11, %c0_12] : memref<12x32x8xf32, #tpu.memory_space<vmem>>, vector<1x32x8xf32>
    %13 = vector.shape_cast %12 : vector<1x32x8xf32> to vector<32x8xf32>
    %cst_13 = arith.constant dense<0.000000e+00> : vector<8x8xf32>
    %14 = tpu.matmul %1, %13, %cst_13 {dimension_numbers = #tpu.dot_dimension_numbers<[1], [0], [0], [1], [0, 0, 1, 1], [], []>} : vector<8x32xf32>, vector<32x8xf32>, vector<8x8xf32> -> vector<8x8xf32>
    %c1_14 = arith.constant 1 : index
    %c0_15 = arith.constant 0 : index
    %c0_16 = arith.constant 0 : index
    %15 = vector.load %arg3[%c1_14, %c0_15, %c0_16] : memref<12x1x8xf32, #tpu.memory_space<vmem>>, vector<1x1x8xf32>
    %16 = vector.shape_cast %15 : vector<1x1x8xf32> to vector<1x8xf32>
    %17 = vector.broadcast %16 : vector<1x8xf32> to vector<8x8xf32>
    %18 = arith.addf %14, %17 : vector<8x8xf32>
    %c1_17 = arith.constant 1 : index
    %c0_18 = arith.constant 0 : index
    %c0_19 = arith.constant 0 : index
    %19 = vector.load %arg15[%c1_17, %c0_18, %c0_19] : memref<4x8x8xf32, #tpu.memory_space<vmem>>, vector<1x8x8xf32>
    %20 = vector.shape_cast %19 : vector<1x8x8xf32> to vector<8x8xf32>
    %21 = vector.shape_cast %18 : vector<8x8xf32> to vector<1x8x8xf32>
    tpu.vector_store %arg15[%c1_17, %c0_18, %c0_19], %21 {strides = array<i32>} : memref<4x8x8xf32, #tpu.memory_space<vmem>>, vector<1x8x8xf32>,
    %c2 = arith.constant 2 : index
    %c0_20 = arith.constant 0 : index
    %c0_21 = arith.constant 0 : index
    %22 = vector.load %arg2[%c2, %c0_20, %c0_21] : memref<12x32x8xf32, #tpu.memory_space<vmem>>, vector<1x32x8xf32>
    %23 = vector.shape_cast %22 : vector<1x32x8xf32> to vector<32x8xf32>
    %cst_22 = arith.constant dense<0.000000e+00> : vector<8x8xf32>
    %24 = tpu.matmul %1, %23, %cst_22 {dimension_numbers = #tpu.dot_dimension_numbers<[1], [0], [0], [1], [0, 0, 1, 1], [], []>} : vector<8x32xf32>, vector<32x8xf32>, vector<8x8xf32> -> vector<8x8xf32>
    %c2_23 = arith.constant 2 : index
    %c0_24 = arith.constant 0 : index
    %c0_25 = arith.constant 0 : index
    %25 = vector.load %arg3[%c2_23, %c0_24, %c0_25] : memref<12x1x8xf32, #tpu.memory_space<vmem>>, vector<1x1x8xf32>
    %26 = vector.shape_cast %25 : vector<1x1x8xf32> to vector<1x8xf32>
    %27 = vector.broadcast %26 : vector<1x8xf32> to vector<8x8xf32>
    %28 = arith.addf %24, %27 : vector<8x8xf32>
    %c2_26 = arith.constant 2 : index
    %c0_27 = arith.constant 0 : index
    %c0_28 = arith.constant 0 : index
    %29 = vector.load %arg15[%c2_26, %c0_27, %c0_28] : memref<4x8x8xf32, #tpu.memory_space<vmem>>, vector<1x8x8xf32>
    %30 = vector.shape_cast %29 : vector<1x8x8xf32> to vector<8x8xf32>
    %31 = vector.shape_cast %28 : vector<8x8xf32> to vector<1x8x8xf32>
    tpu.vector_store %arg15[%c2_26, %c0_27, %c0_28], %31 {strides = array<i32>} : memref<4x8x8xf32, #tpu.memory_space<vmem>>, vector<1x8x8xf32>,
    %c3 = arith.constant 3 : index
    %c0_29 = arith.constant 0 : index
    %c0_30 = arith.constant 0 : index
    %32 = vector.load %arg2[%c3, %c0_29, %c0_30] : memref<12x32x8xf32, #tpu.memory_space<vmem>>, vector<1x32x8xf32>
    %33 = vector.shape_cast %32 : vector<1x32x8xf32> to vector<32x8xf32>
    %cst_31 = arith.constant dense<0.000000e+00> : vector<8x8xf32>
    %34 = tpu.matmul %1, %33, %cst_31 {dimension_numbers = #tpu.dot_dimension_numbers<[1], [0], [0], [1], [0, 0, 1, 1], [], []>} : vector<8x32xf32>, vector<32x8xf32>, vector<8x8xf32> -> vector<8x8xf32>
    %c3_32 = arith.constant 3 : index
    %c0_33 = arith.constant 0 : index
    %c0_34 = arith.constant 0 : index
    %35 = vector.load %arg3[%c3_32, %c0_33, %c0_34] : memref<12x1x8xf32, #tpu.memory_space<vmem>>, vector<1x1x8xf32>
    %36 = vector.shape_cast %35 : vector<1x1x8xf32> to vector<1x8xf32>
    %37 = vector.broadcast %36 : vector<1x8xf32> to vector<8x8xf32>
    %38 = arith.addf %34, %37 : vector<8x8xf32>
    %c3_35 = arith.constant 3 : index
    %c0_36 = arith.constant 0 : index
    %c0_37 = arith.constant 0 : index
    %39 = vector.load %arg15[%c3_35, %c0_36, %c0_37] : memref<4x8x8xf32, #tpu.memory_space<vmem>>, vector<1x8x8xf32>
    %40 = vector.shape_cast %39 : vector<1x8x8xf32> to vector<8x8xf32>
    %41 = vector.shape_cast %38 : vector<8x8xf32> to vector<1x8x8xf32>
    tpu.vector_store %arg15[%c3_35, %c0_36, %c0_37], %41 {strides = array<i32>} : memref<4x8x8xf32, #tpu.memory_space<vmem>>, vector<1x8x8xf32>,
    %c4 = arith.constant 4 : index
    %c0_38 = arith.constant 0 : index
    %c0_39 = arith.constant 0 : index
    %42 = vector.load %arg2[%c4, %c0_38, %c0_39] : memref<12x32x8xf32, #tpu.memory_space<vmem>>, vector<1x32x8xf32>
    %43 = vector.shape_cast %42 : vector<1x32x8xf32> to vector<32x8xf32>
    %cst_40 = arith.constant dense<0.000000e+00> : vector<8x8xf32>
    %44 = tpu.matmul %1, %43, %cst_40 {dimension_numbers = #tpu.dot_dimension_numbers<[1], [0], [0], [1], [0, 0, 1, 1], [], []>} : vector<8x32xf32>, vector<32x8xf32>, vector<8x8xf32> -> vector<8x8xf32>
    %c4_41 = arith.constant 4 : index
    %c0_42 = arith.constant 0 : index
    %c0_43 = arith.constant 0 : index
    %45 = vector.load %arg3[%c4_41, %c0_42, %c0_43] : memref<12x1x8xf32, #tpu.memory_space<vmem>>, vector<1x1x8xf32>
    %46 = vector.shape_cast %45 : vector<1x1x8xf32> to vector<1x8xf32>
    %47 = vector.broadcast %46 : vector<1x8xf32> to vector<8x8xf32>
    %48 = arith.addf %44, %47 : vector<8x8xf32>
    %c8 = arith.constant 8 : index
    %c0_44 = arith.constant 0 : index
    %c0_45 = arith.constant 0 : index
    %49 = vector.load %arg2[%c8, %c0_44, %c0_45] : memref<12x32x8xf32, #tpu.memory_space<vmem>>, vector<1x32x8xf32>
    %50 = vector.shape_cast %49 : vector<1x32x8xf32> to vector<32x8xf32>
    %cst_46 = arith.constant dense<0.000000e+00> : vector<8x8xf32>
    %51 = tpu.matmul %1, %50, %cst_46 {dimension_numbers = #tpu.dot_dimension_numbers<[1], [0], [0], [1], [0, 0, 1, 1], [], []>} : vector<8x32xf32>, vector<32x8xf32>, vector<8x8xf32> -> vector<8x8xf32>
    %c8_47 = arith.constant 8 : index
    %c0_48 = arith.constant 0 : index
    %c0_49 = arith.constant 0 : index
    %52 = vector.load %arg3[%c8_47, %c0_48, %c0_49] : memref<12x1x8xf32, #tpu.memory_space<vmem>>, vector<1x1x8xf32>
    %53 = vector.shape_cast %52 : vector<1x1x8xf32> to vector<1x8xf32>
    %54 = vector.broadcast %53 : vector<1x8xf32> to vector<8x8xf32>
    %55 = arith.addf %51, %54 : vector<8x8xf32>
    %c0_50 = arith.constant 0 : index
    %c0_51 = arith.constant 0 : index
    %c0_52 = arith.constant 0 : index
    %c0_53 = arith.constant 0 : index
    %56 = vector.load %arg16[%c0_50, %c0_51, %c0_52, %c0_53] : memref<1x4x8x8xf32, #tpu.memory_space<vmem>>, vector<1x1x8x8xf32>
    %57 = vector.shape_cast %56 : vector<1x1x8x8xf32> to vector<8x8xf32>
    %58 = vector.shape_cast %48 : vector<8x8xf32> to vector<1x1x8x8xf32>
    tpu.vector_store %arg16[%c0_50, %c0_51, %c0_52, %c0_53], %58 {strides = array<i32>} : memref<1x4x8x8xf32, #tpu.memory_space<vmem>>, vector<1x1x8x8xf32>,
    %c0_54 = arith.constant 0 : index
    %c0_55 = arith.constant 0 : index
    %c0_56 = arith.constant 0 : index
    %c0_57 = arith.constant 0 : index
    %59 = vector.load %arg17[%c0_54, %c0_55, %c0_56, %c0_57] : memref<1x4x8x8xf32, #tpu.memory_space<vmem>>, vector<1x1x8x8xf32>
    %60 = vector.shape_cast %59 : vector<1x1x8x8xf32> to vector<8x8xf32>
    %61 = vector.shape_cast %55 : vector<8x8xf32> to vector<1x1x8x8xf32>
    tpu.vector_store %arg17[%c0_54, %c0_55, %c0_56, %c0_57], %61 {strides = array<i32>} : memref<1x4x8x8xf32, #tpu.memory_space<vmem>>, vector<1x1x8x8xf32>,
    %c5 = arith.constant 5 : index
    %c0_58 = arith.constant 0 : index
    %c0_59 = arith.constant 0 : index
    %62 = vector.load %arg2[%c5, %c0_58, %c0_59] : memref<12x32x8xf32, #tpu.memory_space<vmem>>, vector<1x32x8xf32>
    %63 = vector.shape_cast %62 : vector<1x32x8xf32> to vector<32x8xf32>
    %cst_60 = arith.constant dense<0.000000e+00> : vector<8x8xf32>
    %64 = tpu.matmul %1, %63, %cst_60 {dimension_numbers = #tpu.dot_dimension_numbers<[1], [0], [0], [1], [0, 0, 1, 1], [], []>} : vector<8x32xf32>, vector<32x8xf32>, vector<8x8xf32> -> vector<8x8xf32>
    %c5_61 = arith.constant 5 : index
    %c0_62 = arith.constant 0 : index
    %c0_63 = arith.constant 0 : index
    %65 = vector.load %arg3[%c5_61, %c0_62, %c0_63] : memref<12x1x8xf32, #tpu.memory_space<vmem>>, vector<1x1x8xf32>
    %66 = vector.shape_cast %65 : vector<1x1x8xf32> to vector<1x8xf32>
    %67 = vector.broadcast %66 : vector<1x8xf32> to vector<8x8xf32>
    %68 = arith.addf %64, %67 : vector<8x8xf32>
    %c9 = arith.constant 9 : index
    %c0_64 = arith.constant 0 : index
    %c0_65 = arith.constant 0 : index
    %69 = vector.load %arg2[%c9, %c0_64, %c0_65] : memref<12x32x8xf32, #tpu.memory_space<vmem>>, vector<1x32x8xf32>
    %70 = vector.shape_cast %69 : vector<1x32x8xf32> to vector<32x8xf32>
    %cst_66 = arith.constant dense<0.000000e+00> : vector<8x8xf32>
    %71 = tpu.matmul %1, %70, %cst_66 {dimension_numbers = #tpu.dot_dimension_numbers<[1], [0], [0], [1], [0, 0, 1, 1], [], []>} : vector<8x32xf32>, vector<32x8xf32>, vector<8x8xf32> -> vector<8x8xf32>
    %c9_67 = arith.constant 9 : index
    %c0_68 = arith.constant 0 : index
    %c0_69 = arith.constant 0 : index
    %72 = vector.load %arg3[%c9_67, %c0_68, %c0_69] : memref<12x1x8xf32, #tpu.memory_space<vmem>>, vector<1x1x8xf32>
    %73 = vector.shape_cast %72 : vector<1x1x8xf32> to vector<1x8xf32>
    %74 = vector.broadcast %73 : vector<1x8xf32> to vector<8x8xf32>
    %75 = arith.addf %71, %74 : vector<8x8xf32>
    %c0_70 = arith.constant 0 : index
    %c1_71 = arith.constant 1 : index
    %c0_72 = arith.constant 0 : index
    %c0_73 = arith.constant 0 : index
    %76 = vector.load %arg16[%c0_70, %c1_71, %c0_72, %c0_73] : memref<1x4x8x8xf32, #tpu.memory_space<vmem>>, vector<1x1x8x8xf32>
    %77 = vector.shape_cast %76 : vector<1x1x8x8xf32> to vector<8x8xf32>
    %78 = vector.shape_cast %68 : vector<8x8xf32> to vector<1x1x8x8xf32>
    tpu.vector_store %arg16[%c0_70, %c1_71, %c0_72, %c0_73], %78 {strides = array<i32>} : memref<1x4x8x8xf32, #tpu.memory_space<vmem>>, vector<1x1x8x8xf32>,
    %c0_74 = arith.constant 0 : index
    %c1_75 = arith.constant 1 : index
    %c0_76 = arith.constant 0 : index
    %c0_77 = arith.constant 0 : index
    %79 = vector.load %arg17[%c0_74, %c1_75, %c0_76, %c0_77] : memref<1x4x8x8xf32, #tpu.memory_space<vmem>>, vector<1x1x8x8xf32>
    %80 = vector.shape_cast %79 : vector<1x1x8x8xf32> to vector<8x8xf32>
    %81 = vector.shape_cast %75 : vector<8x8xf32> to vector<1x1x8x8xf32>
    tpu.vector_store %arg17[%c0_74, %c1_75, %c0_76, %c0_77], %81 {strides = array<i32>} : memref<1x4x8x8xf32, #tpu.memory_space<vmem>>, vector<1x1x8x8xf32>,
    %c6 = arith.constant 6 : index
    %c0_78 = arith.constant 0 : index
    %c0_79 = arith.constant 0 : index
    %82 = vector.load %arg2[%c6, %c0_78, %c0_79] : memref<12x32x8xf32, #tpu.memory_space<vmem>>, vector<1x32x8xf32>
    %83 = vector.shape_cast %82 : vector<1x32x8xf32> to vector<32x8xf32>
    %cst_80 = arith.constant dense<0.000000e+00> : vector<8x8xf32>
    %84 = tpu.matmul %1, %83, %cst_80 {dimension_numbers = #tpu.dot_dimension_numbers<[1], [0], [0], [1], [0, 0, 1, 1], [], []>} : vector<8x32xf32>, vector<32x8xf32>, vector<8x8xf32> -> vector<8x8xf32>
    %c6_81 = arith.constant 6 : index
    %c0_82 = arith.constant 0 : index
    %c0_83 = arith.constant 0 : index
    %85 = vector.load %arg3[%c6_81, %c0_82, %c0_83] : memref<12x1x8xf32, #tpu.memory_space<vmem>>, vector<1x1x8xf32>
    %86 = vector.shape_cast %85 : vector<1x1x8xf32> to vector<1x8xf32>
    %87 = vector.broadcast %86 : vector<1x8xf32> to vector<8x8xf32>
    %88 = arith.addf %84, %87 : vector<8x8xf32>
    %c10 = arith.constant 10 : index
    %c0_84 = arith.constant 0 : index
    %c0_85 = arith.constant 0 : index
    %89 = vector.load %arg2[%c10, %c0_84, %c0_85] : memref<12x32x8xf32, #tpu.memory_space<vmem>>, vector<1x32x8xf32>
    %90 = vector.shape_cast %89 : vector<1x32x8xf32> to vector<32x8xf32>
    %cst_86 = arith.constant dense<0.000000e+00> : vector<8x8xf32>
    %91 = tpu.matmul %1, %90, %cst_86 {dimension_numbers = #tpu.dot_dimension_numbers<[1], [0], [0], [1], [0, 0, 1, 1], [], []>} : vector<8x32xf32>, vector<32x8xf32>, vector<8x8xf32> -> vector<8x8xf32>
    %c10_87 = arith.constant 10 : index
    %c0_88 = arith.constant 0 : index
    %c0_89 = arith.constant 0 : index
    %92 = vector.load %arg3[%c10_87, %c0_88, %c0_89] : memref<12x1x8xf32, #tpu.memory_space<vmem>>, vector<1x1x8xf32>
    %93 = vector.shape_cast %92 : vector<1x1x8xf32> to vector<1x8xf32>
    %94 = vector.broadcast %93 : vector<1x8xf32> to vector<8x8xf32>
    %95 = arith.addf %91, %94 : vector<8x8xf32>
    %c0_90 = arith.constant 0 : index
    %c2_91 = arith.constant 2 : index
    %c0_92 = arith.constant 0 : index
    %c0_93 = arith.constant 0 : index
    %96 = vector.load %arg16[%c0_90, %c2_91, %c0_92, %c0_93] : memref<1x4x8x8xf32, #tpu.memory_space<vmem>>, vector<1x1x8x8xf32>
    %97 = vector.shape_cast %96 : vector<1x1x8x8xf32> to vector<8x8xf32>
    %98 = vector.shape_cast %88 : vector<8x8xf32> to vector<1x1x8x8xf32>
    tpu.vector_store %arg16[%c0_90, %c2_91, %c0_92, %c0_93], %98 {strides = array<i32>} : memref<1x4x8x8xf32, #tpu.memory_space<vmem>>, vector<1x1x8x8xf32>,
    %c0_94 = arith.constant 0 : index
    %c2_95 = arith.constant 2 : index
    %c0_96 = arith.constant 0 : index
    %c0_97 = arith.constant 0 : index
    %99 = vector.load %arg17[%c0_94, %c2_95, %c0_96, %c0_97] : memref<1x4x8x8xf32, #tpu.memory_space<vmem>>, vector<1x1x8x8xf32>
    %100 = vector.shape_cast %99 : vector<1x1x8x8xf32> to vector<8x8xf32>
    %101 = vector.shape_cast %95 : vector<8x8xf32> to vector<1x1x8x8xf32>
    tpu.vector_store %arg17[%c0_94, %c2_95, %c0_96, %c0_97], %101 {strides = array<i32>} : memref<1x4x8x8xf32, #tpu.memory_space<vmem>>, vector<1x1x8x8xf32>,
    %c7 = arith.constant 7 : index
    %c0_98 = arith.constant 0 : index
    %c0_99 = arith.constant 0 : index
    %102 = vector.load %arg2[%c7, %c0_98, %c0_99] : memref<12x32x8xf32, #tpu.memory_space<vmem>>, vector<1x32x8xf32>
    %103 = vector.shape_cast %102 : vector<1x32x8xf32> to vector<32x8xf32>
    %cst_100 = arith.constant dense<0.000000e+00> : vector<8x8xf32>
    %104 = tpu.matmul %1, %103, %cst_100 {dimension_numbers = #tpu.dot_dimension_numbers<[1], [0], [0], [1], [0, 0, 1, 1], [], []>} : vector<8x32xf32>, vector<32x8xf32>, vector<8x8xf32> -> vector<8x8xf32>
    %c7_101 = arith.constant 7 : index
    %c0_102 = arith.constant 0 : index
    %c0_103 = arith.constant 0 : index
    %105 = vector.load %arg3[%c7_101, %c0_102, %c0_103] : memref<12x1x8xf32, #tpu.memory_space<vmem>>, vector<1x1x8xf32>
    %106 = vector.shape_cast %105 : vector<1x1x8xf32> to vector<1x8xf32>
    %107 = vector.broadcast %106 : vector<1x8xf32> to vector<8x8xf32>
    %108 = arith.addf %104, %107 : vector<8x8xf32>
    %c11 = arith.constant 11 : index
    %c0_104 = arith.constant 0 : index
    %c0_105 = arith.constant 0 : index
    %109 = vector.load %arg2[%c11, %c0_104, %c0_105] : memref<12x32x8xf32, #tpu.memory_space<vmem>>, vector<1x32x8xf32>
    %110 = vector.shape_cast %109 : vector<1x32x8xf32> to vector<32x8xf32>
    %cst_106 = arith.constant dense<0.000000e+00> : vector<8x8xf32>
    %111 = tpu.matmul %1, %110, %cst_106 {dimension_numbers = #tpu.dot_dimension_numbers<[1], [0], [0], [1], [0, 0, 1, 1], [], []>} : vector<8x32xf32>, vector<32x8xf32>, vector<8x8xf32> -> vector<8x8xf32>
    %c11_107 = arith.constant 11 : index
    %c0_108 = arith.constant 0 : index
    %c0_109 = arith.constant 0 : index
    %112 = vector.load %arg3[%c11_107, %c0_108, %c0_109] : memref<12x1x8xf32, #tpu.memory_space<vmem>>, vector<1x1x8xf32>
    %113 = vector.shape_cast %112 : vector<1x1x8xf32> to vector<1x8xf32>
    %114 = vector.broadcast %113 : vector<1x8xf32> to vector<8x8xf32>
    %115 = arith.addf %111, %114 : vector<8x8xf32>
    %c0_110 = arith.constant 0 : index
    %c3_111 = arith.constant 3 : index
    %c0_112 = arith.constant 0 : index
    %c0_113 = arith.constant 0 : index
    %116 = vector.load %arg16[%c0_110, %c3_111, %c0_112, %c0_113] : memref<1x4x8x8xf32, #tpu.memory_space<vmem>>, vector<1x1x8x8xf32>
    %117 = vector.shape_cast %116 : vector<1x1x8x8xf32> to vector<8x8xf32>
    %118 = vector.shape_cast %108 : vector<8x8xf32> to vector<1x1x8x8xf32>
    tpu.vector_store %arg16[%c0_110, %c3_111, %c0_112, %c0_113], %118 {strides = array<i32>} : memref<1x4x8x8xf32, #tpu.memory_space<vmem>>, vector<1x1x8x8xf32>,
    %c0_114 = arith.constant 0 : index
    %c3_115 = arith.constant 3 : index
    %c0_116 = arith.constant 0 : index
    %c0_117 = arith.constant 0 : index
    %119 = vector.load %arg17[%c0_114, %c3_115, %c0_116, %c0_117] : memref<1x4x8x8xf32, #tpu.memory_space<vmem>>, vector<1x1x8x8xf32>
    %120 = vector.shape_cast %119 : vector<1x1x8x8xf32> to vector<8x8xf32>
    %121 = vector.shape_cast %115 : vector<8x8xf32> to vector<1x1x8x8xf32>
    tpu.vector_store %arg17[%c0_114, %c3_115, %c0_116, %c0_117], %121 {strides = array<i32>} : memref<1x4x8x8xf32, #tpu.memory_space<vmem>>, vector<1x1x8x8xf32>,
    %c0_118 = arith.constant 0 : index
    %c0_119 = arith.constant 0 : index
    %c0_120 = arith.constant 0 : index
    %122 = vector.load %arg15[%c0_118, %c0_119, %c0_120] : memref<4x8x8xf32, #tpu.memory_space<vmem>>, vector<4x8x8xf32>
    %cst_121 = arith.constant 0.000000e+00 : f32
    %123 = vector.broadcast %cst_121 : f32 to vector<4x8x8xf32>
    %c0_122 = arith.constant 0 : index
    %c0_123 = arith.constant 0 : index
    %c0_124 = arith.constant 0 : index
    %124 = vector.load %arg18[%c0_122, %c0_123, %c0_124] : memref<4x8x8xf32, #tpu.memory_space<vmem>>, vector<4x8x8xf32>
    tpu.vector_store %arg18[%c0_122, %c0_123, %c0_124], %123 {strides = array<i32>} : memref<4x8x8xf32, #tpu.memory_space<vmem>>, vector<4x8x8xf32>,
    %cst_125 = arith.constant -1.000000e+30 : f32
    %125 = vector.broadcast %cst_125 : f32 to vector<4x8x1xf32>
    %cst_126 = arith.constant 0.000000e+00 : f32
    %126 = vector.broadcast %cst_126 : f32 to vector<4x8x1xf32>
    %c0_i32 = arith.constant 0 : i32
    %127 = arith.index_cast %c0_i32 : i32 to index
    %c0_127 = arith.constant 0 : index
    %c0_128 = arith.constant 0 : index
    %c0_129 = arith.constant 0 : index
    %128 = vector.load %arg16[%127, %c0_127, %c0_128, %c0_129] : memref<1x4x8x8xf32, #tpu.memory_space<vmem>>, vector<1x4x8x8xf32>
    %129 = vector.shape_cast %128 : vector<1x4x8x8xf32> to vector<4x8x8xf32>
    %130 = arith.index_cast %c0_i32 : i32 to index
    %c0_130 = arith.constant 0 : index
    %c0_131 = arith.constant 0 : index
    %c0_132 = arith.constant 0 : index
    %131 = vector.load %arg17[%130, %c0_130, %c0_131, %c0_132] : memref<1x4x8x8xf32, #tpu.memory_space<vmem>>, vector<1x4x8x8xf32>
    %132 = vector.shape_cast %131 : vector<1x4x8x8xf32> to vector<4x8x8xf32>
    "tpu.trace_start"() <{level = 10 : i32, message = "hqd,hkd->hqk"}> : () -> ()
    %cst_133 = arith.constant dense<0.000000e+00> : vector<4x8x8xf32>
    %133 = tpu.matmul %122, %129, %cst_133 {dimension_numbers = #tpu.dot_dimension_numbers<[2], [2], [1], [1], [0, 0, 0, 1, 1, 1], [0], [0]>} : vector<4x8x8xf32>, vector<4x8x8xf32>, vector<4x8x8xf32> -> vector<4x8x8xf32>
    "tpu.trace_stop"() : () -> ()
    %cst_134 = arith.constant dense<0xFF800000> : vector<4x8xf32>
    %134 = vector.multi_reduction <maximumf>, %133, %cst_134 [2] : vector<4x8x8xf32> to vector<4x8xf32>
    %135 = vector.shape_cast %134 : vector<4x8xf32> to vector<4x8x1xf32>
    %136 = arith.maximumf %125, %135 : vector<4x8x1xf32>
    %137 = arith.subf %125, %136 : vector<4x8x1xf32>
    %138 = math.exp %137 : vector<4x8x1xf32>
    %139 = vector.broadcast %136 : vector<4x8x1xf32> to vector<4x8x8xf32>
    %140 = arith.subf %133, %139 : vector<4x8x8xf32>
    %141 = math.exp %140 : vector<4x8x8xf32>
    %142 = arith.mulf %138, %126 : vector<4x8x1xf32>
    %cst_135 = arith.constant dense<0.000000e+00> : vector<4x8xf32>
    %143 = vector.multi_reduction <add>, %141, %cst_135 [2] : vector<4x8x8xf32> to vector<4x8xf32>
    %144 = vector.shape_cast %143 : vector<4x8xf32> to vector<4x8x1xf32>
    %145 = arith.addf %142, %144 : vector<4x8x1xf32>
    %c0_136 = arith.constant 0 : index
    %c0_137 = arith.constant 0 : index
    %c0_138 = arith.constant 0 : index
    %146 = vector.load %arg18[%c0_136, %c0_137, %c0_138] : memref<4x8x8xf32, #tpu.memory_space<vmem>>, vector<4x8x8xf32>
    %147 = vector.broadcast %138 : vector<4x8x1xf32> to vector<4x8x8xf32>
    %148 = arith.mulf %147, %146 : vector<4x8x8xf32>
    "tpu.trace_start"() <{level = 10 : i32, message = "hqk,hkd->hqd"}> : () -> ()
    %cst_139 = arith.constant dense<0.000000e+00> : vector<4x8x8xf32>
    %149 = tpu.matmul %141, %132, %cst_139 {dimension_numbers = #tpu.dot_dimension_numbers<[2], [1], [1], [2], [0, 0, 0, 1, 1, 2], [0], [0]>} : vector<4x8x8xf32>, vector<4x8x8xf32>, vector<4x8x8xf32> -> vector<4x8x8xf32>
    "tpu.trace_stop"() : () -> ()
    %150 = arith.addf %148, %149 : vector<4x8x8xf32>
    %c0_140 = arith.constant 0 : index
    %c0_141 = arith.constant 0 : index
    %c0_142 = arith.constant 0 : index
    %151 = vector.load %arg18[%c0_140, %c0_141, %c0_142] : memref<4x8x8xf32, #tpu.memory_space<vmem>>, vector<4x8x8xf32>
    tpu.vector_store %arg18[%c0_140, %c0_141, %c0_142], %150 {strides = array<i32>} : memref<4x8x8xf32, #tpu.memory_space<vmem>>, vector<4x8x8xf32>,
    %c1_i32 = arith.constant 1 : i32
    %c0_143 = arith.constant 0 : index
    %c0_144 = arith.constant 0 : index
    %c0_145 = arith.constant 0 : index
    %152 = vector.load %arg18[%c0_143, %c0_144, %c0_145] : memref<4x8x8xf32, #tpu.memory_space<vmem>>, vector<4x8x8xf32>
    %153 = tpu.reciprocal %145 : vector<4x8x1xf32> -> vector<4x8x1xf32>
    %154 = vector.broadcast %153 : vector<4x8x1xf32> to vector<4x8x8xf32>
    %155 = arith.mulf %152, %154 : vector<4x8x8xf32>
    %c0_146 = arith.constant 0 : index
    %c0_147 = arith.constant 0 : index
    %c0_148 = arith.constant 0 : index
    %156 = vector.load %arg18[%c0_146, %c0_147, %c0_148] : memref<4x8x8xf32, #tpu.memory_space<vmem>>, vector<4x8x8xf32>
    tpu.vector_store %arg18[%c0_146, %c0_147, %c0_148], %155 {strides = array<i32>} : memref<4x8x8xf32, #tpu.memory_space<vmem>>, vector<4x8x8xf32>,
    %cst_149 = arith.constant 0.000000e+00 : f32
    %157 = vector.broadcast %cst_149 : f32 to vector<8x32xf32>
    %c0_i32_150 = arith.constant 0 : i32
    %158 = arith.index_cast %c0_i32_150 : i32 to index
    %c0_151 = arith.constant 0 : index
    %c0_152 = arith.constant 0 : index
    %159 = vector.load %arg18[%158, %c0_151, %c0_152] : memref<4x8x8xf32, #tpu.memory_space<vmem>>, vector<1x8x8xf32>
    %160 = vector.shape_cast %159 : vector<1x8x8xf32> to vector<8x8xf32>
    %161 = arith.index_cast %c0_i32_150 : i32 to index
    %c0_153 = arith.constant 0 : index
    %c0_154 = arith.constant 0 : index
    %162 = vector.load %arg4[%161, %c0_153, %c0_154] : memref<4x8x32xf32, #tpu.memory_space<vmem>>, vector<1x8x32xf32>
    %163 = vector.shape_cast %162 : vector<1x8x32xf32> to vector<8x32xf32>
    %cst_155 = arith.constant dense<0.000000e+00> : vector<8x32xf32>
    %164 = tpu.matmul %160, %163, %cst_155 {dimension_numbers = #tpu.dot_dimension_numbers<[1], [0], [0], [1], [0, 0, 1, 1], [], []>} : vector<8x8xf32>, vector<8x32xf32>, vector<8x32xf32> -> vector<8x32xf32>
    %165 = arith.addf %157, %164 : vector<8x32xf32>
    %c1_i32_156 = arith.constant 1 : i32
    %166 = arith.index_cast %c1_i32_156 : i32 to index
    %c0_157 = arith.constant 0 : index
    %c0_158 = arith.constant 0 : index
    %167 = vector.load %arg18[%166, %c0_157, %c0_158] : memref<4x8x8xf32, #tpu.memory_space<vmem>>, vector<1x8x8xf32>
    %168 = vector.shape_cast %167 : vector<1x8x8xf32> to vector<8x8xf32>
    %169 = arith.index_cast %c1_i32_156 : i32 to index
    %c0_159 = arith.constant 0 : index
    %c0_160 = arith.constant 0 : index
    %170 = vector.load %arg4[%169, %c0_159, %c0_160] : memref<4x8x32xf32, #tpu.memory_space<vmem>>, vector<1x8x32xf32>
    %171 = vector.shape_cast %170 : vector<1x8x32xf32> to vector<8x32xf32>
    %cst_161 = arith.constant dense<0.000000e+00> : vector<8x32xf32>
    %172 = tpu.matmul %168, %171, %cst_161 {dimension_numbers = #tpu.dot_dimension_numbers<[1], [0], [0], [1], [0, 0, 1, 1], [], []>} : vector<8x8xf32>, vector<8x32xf32>, vector<8x32xf32> -> vector<8x32xf32>
    %173 = arith.addf %165, %172 : vector<8x32xf32>
    %c2_i32 = arith.constant 2 : i32
    %174 = arith.index_cast %c2_i32 : i32 to index
    %c0_162 = arith.constant 0 : index
    %c0_163 = arith.constant 0 : index
    %175 = vector.load %arg18[%174, %c0_162, %c0_163] : memref<4x8x8xf32, #tpu.memory_space<vmem>>, vector<1x8x8xf32>
    %176 = vector.shape_cast %175 : vector<1x8x8xf32> to vector<8x8xf32>
    %177 = arith.index_cast %c2_i32 : i32 to index
    %c0_164 = arith.constant 0 : index
    %c0_165 = arith.constant 0 : index
    %178 = vector.load %arg4[%177, %c0_164, %c0_165] : memref<4x8x32xf32, #tpu.memory_space<vmem>>, vector<1x8x32xf32>
    %179 = vector.shape_cast %178 : vector<1x8x32xf32> to vector<8x32xf32>
    %cst_166 = arith.constant dense<0.000000e+00> : vector<8x32xf32>
    %180 = tpu.matmul %176, %179, %cst_166 {dimension_numbers = #tpu.dot_dimension_numbers<[1], [0], [0], [1], [0, 0, 1, 1], [], []>} : vector<8x8xf32>, vector<8x32xf32>, vector<8x32xf32> -> vector<8x32xf32>
    %181 = arith.addf %173, %180 : vector<8x32xf32>
    %c3_i32 = arith.constant 3 : i32
    %182 = arith.index_cast %c3_i32 : i32 to index
    %c0_167 = arith.constant 0 : index
    %c0_168 = arith.constant 0 : index
    %183 = vector.load %arg18[%182, %c0_167, %c0_168] : memref<4x8x8xf32, #tpu.memory_space<vmem>>, vector<1x8x8xf32>
    %184 = vector.shape_cast %183 : vector<1x8x8xf32> to vector<8x8xf32>
    %185 = arith.index_cast %c3_i32 : i32 to index
    %c0_169 = arith.constant 0 : index
    %c0_170 = arith.constant 0 : index
    %186 = vector.load %arg4[%185, %c0_169, %c0_170] : memref<4x8x32xf32, #tpu.memory_space<vmem>>, vector<1x8x32xf32>
    %187 = vector.shape_cast %186 : vector<1x8x32xf32> to vector<8x32xf32>
    %cst_171 = arith.constant dense<0.000000e+00> : vector<8x32xf32>
    %188 = tpu.matmul %184, %187, %cst_171 {dimension_numbers = #tpu.dot_dimension_numbers<[1], [0], [0], [1], [0, 0, 1, 1], [], []>} : vector<8x8xf32>, vector<8x32xf32>, vector<8x32xf32> -> vector<8x32xf32>
    %189 = arith.addf %181, %188 : vector<8x32xf32>
    %c4_i32 = arith.constant 4 : i32
    %c0_172 = arith.constant 0 : index
    %c0_173 = arith.constant 0 : index
    %190 = vector.load %arg5[%c0_172, %c0_173] : memref<1x32xf32, #tpu.memory_space<vmem>>, vector<1x32xf32>
    %191 = vector.broadcast %190 : vector<1x32xf32> to vector<8x32xf32>
    %192 = arith.addf %189, %191 : vector<8x32xf32>
    %193 = arith.addf %1, %192 : vector<8x32xf32>
    %c0_174 = arith.constant 0 : index
    %c0_175 = arith.constant 0 : index
    %194 = vector.load %arg6[%c0_174, %c0_175] : memref<1x32xf32, #tpu.memory_space<vmem>>, vector<1x32xf32>
    %c0_176 = arith.constant 0 : index
    %c0_177 = arith.constant 0 : index
    %195 = vector.load %arg7[%c0_176, %c0_177] : memref<1x32xf32, #tpu.memory_space<vmem>>, vector<1x32xf32>
    %cst_178 = arith.constant dense<0.000000e+00> : vector<8xf32>
    %196 = vector.multi_reduction <add>, %193, %cst_178 [1] : vector<8x32xf32> to vector<8xf32>
    %197 = vector.shape_cast %196 : vector<8xf32> to vector<8x1xf32>
    %cst_179 = arith.constant 3.200000e+01 : f32
    %198 = vector.broadcast %cst_179 : f32 to vector<8x1xf32>
    %199 = arith.divf %197, %198 : vector<8x1xf32>
    %200 = vector.broadcast %199 : vector<8x1xf32> to vector<8x32xf32>
    %201 = arith.subf %193, %200 : vector<8x32xf32>
    %202 = arith.mulf %201, %201 : vector<8x32xf32>
    %cst_180 = arith.constant dense<0.000000e+00> : vector<8xf32>
    %203 = vector.multi_reduction <add>, %202, %cst_180 [1] : vector<8x32xf32> to vector<8xf32>
    %204 = vector.shape_cast %203 : vector<8xf32> to vector<8x1xf32>
    %cst_181 = arith.constant 3.200000e+01 : f32
    %205 = vector.broadcast %cst_181 : f32 to vector<8x1xf32>
    %206 = arith.divf %204, %205 : vector<8x1xf32>
    %207 = vector.broadcast %199 : vector<8x1xf32> to vector<8x32xf32>
    %208 = arith.subf %193, %207 : vector<8x32xf32>
    %cst_182 = arith.constant 9.99999974E-6 : f32
    %209 = vector.broadcast %cst_182 : f32 to vector<8x1xf32>
    %210 = arith.addf %206, %209 : vector<8x1xf32>
    %211 = math.rsqrt %210 : vector<8x1xf32>
    %212 = vector.broadcast %211 : vector<8x1xf32> to vector<8x32xf32>
    %213 = arith.mulf %208, %212 : vector<8x32xf32>
    %214 = vector.broadcast %194 : vector<1x32xf32> to vector<8x32xf32>
    %215 = arith.mulf %213, %214 : vector<8x32xf32>
    %216 = vector.broadcast %195 : vector<1x32xf32> to vector<8x32xf32>
    %217 = arith.addf %215, %216 : vector<8x32xf32>
    %c0_183 = arith.constant 0 : index
    %c0_184 = arith.constant 0 : index
    %218 = vector.load %arg10[%c0_183, %c0_184] : memref<32x32xf32, #tpu.memory_space<vmem>>, vector<32x32xf32>
    %cst_185 = arith.constant dense<0.000000e+00> : vector<8x32xf32>
    %219 = tpu.matmul %217, %218, %cst_185 {dimension_numbers = #tpu.dot_dimension_numbers<[1], [0], [0], [1], [0, 0, 1, 1], [], []>} : vector<8x32xf32>, vector<32x32xf32>, vector<8x32xf32> -> vector<8x32xf32>
    %c0_186 = arith.constant 0 : index
    %c0_187 = arith.constant 0 : index
    %220 = vector.load %arg11[%c0_186, %c0_187] : memref<1x32xf32, #tpu.memory_space<vmem>>, vector<1x32xf32>
    %221 = vector.broadcast %220 : vector<1x32xf32> to vector<8x32xf32>
    %222 = arith.addf %219, %221 : vector<8x32xf32>
    %cst_188 = arith.constant 0.000000e+00 : f32
    %223 = vector.broadcast %cst_188 : f32 to vector<8x32xf32>
    %224 = arith.maximumf %222, %223 : vector<8x32xf32>
    %c0_189 = arith.constant 0 : index
    %c0_190 = arith.constant 0 : index
    %225 = vector.load %arg12[%c0_189, %c0_190] : memref<32x32xf32, #tpu.memory_space<vmem>>, vector<32x32xf32>
    %cst_191 = arith.constant dense<0.000000e+00> : vector<8x32xf32>
    %226 = tpu.matmul %224, %225, %cst_191 {dimension_numbers = #tpu.dot_dimension_numbers<[1], [0], [0], [1], [0, 0, 1, 1], [], []>} : vector<8x32xf32>, vector<32x32xf32>, vector<8x32xf32> -> vector<8x32xf32>
    %c0_192 = arith.constant 0 : index
    %c0_193 = arith.constant 0 : index
    %227 = vector.load %arg13[%c0_192, %c0_193] : memref<1x32xf32, #tpu.memory_space<vmem>>, vector<1x32xf32>
    %228 = vector.broadcast %227 : vector<1x32xf32> to vector<8x32xf32>
    %229 = arith.addf %226, %228 : vector<8x32xf32>
    %230 = arith.addf %217, %229 : vector<8x32xf32>
    %c0_194 = arith.constant 0 : index
    %c0_195 = arith.constant 0 : index
    %231 = vector.load %arg8[%c0_194, %c0_195] : memref<1x32xf32, #tpu.memory_space<vmem>>, vector<1x32xf32>
    %c0_196 = arith.constant 0 : index
    %c0_197 = arith.constant 0 : index
    %232 = vector.load %arg9[%c0_196, %c0_197] : memref<1x32xf32, #tpu.memory_space<vmem>>, vector<1x32xf32>
    %cst_198 = arith.constant dense<0.000000e+00> : vector<8xf32>
    %233 = vector.multi_reduction <add>, %230, %cst_198 [1] : vector<8x32xf32> to vector<8xf32>
    %234 = vector.shape_cast %233 : vector<8xf32> to vector<8x1xf32>
    %cst_199 = arith.constant 3.200000e+01 : f32
    %235 = vector.broadcast %cst_199 : f32 to vector<8x1xf32>
    %236 = arith.divf %234, %235 : vector<8x1xf32>
    %237 = vector.broadcast %236 : vector<8x1xf32> to vector<8x32xf32>
    %238 = arith.subf %230, %237 : vector<8x32xf32>
    %239 = arith.mulf %238, %238 : vector<8x32xf32>
    %cst_200 = arith.constant dense<0.000000e+00> : vector<8xf32>
    %240 = vector.multi_reduction <add>, %239, %cst_200 [1] : vector<8x32xf32> to vector<8xf32>
    %241 = vector.shape_cast %240 : vector<8xf32> to vector<8x1xf32>
    %cst_201 = arith.constant 3.200000e+01 : f32
    %242 = vector.broadcast %cst_201 : f32 to vector<8x1xf32>
    %243 = arith.divf %241, %242 : vector<8x1xf32>
    %244 = vector.broadcast %236 : vector<8x1xf32> to vector<8x32xf32>
    %245 = arith.subf %230, %244 : vector<8x32xf32>
    %cst_202 = arith.constant 9.99999974E-6 : f32
    %246 = vector.broadcast %cst_202 : f32 to vector<8x1xf32>
    %247 = arith.addf %243, %246 : vector<8x1xf32>
    %248 = math.rsqrt %247 : vector<8x1xf32>
    %249 = vector.broadcast %248 : vector<8x1xf32> to vector<8x32xf32>
    %250 = arith.mulf %245, %249 : vector<8x32xf32>
    %251 = vector.broadcast %231 : vector<1x32xf32> to vector<8x32xf32>
    %252 = arith.mulf %250, %251 : vector<8x32xf32>
    %253 = vector.broadcast %232 : vector<1x32xf32> to vector<8x32xf32>
    %254 = arith.addf %252, %253 : vector<8x32xf32>
    %c0_203 = arith.constant 0 : index
    %c0_204 = arith.constant 0 : index
    %c0_205 = arith.constant 0 : index
    %255 = vector.load %arg14[%c0_203, %c0_204, %c0_205] : memref<1x8x32xf32, #tpu.memory_space<vmem>>, vector<1x8x32xf32>
    %256 = vector.shape_cast %255 : vector<1x8x32xf32> to vector<8x32xf32>
    %257 = vector.shape_cast %254 : vector<8x32xf32> to vector<1x8x32xf32>
    tpu.vector_store %arg14[%c0_203, %c0_204, %c0_205], %257 {strides = array<i32>} : memref<1x8x32xf32, #tpu.memory_space<vmem>>, vector<1x8x32xf32>,
    return
  }
  func.func @transform_0(%arg0: i32) -> (i32, i32, i32) {
    %c0_i32 = arith.constant 0 : i32
    %c0_i32_0 = arith.constant 0 : i32
    %c0_i32_1 = arith.constant 0 : i32
    return %arg0, %c0_i32, %c0_i32_0 : i32, i32, i32
  }
  func.func @transform_1(%arg0: i32) -> (i32, i32, i32) {
    %c0_i32 = arith.constant 0 : i32
    %c0_i32_0 = arith.constant 0 : i32
    %c0_i32_1 = arith.constant 0 : i32
    %c0_i32_2 = arith.constant 0 : i32
    return %c0_i32, %c0_i32_0, %c0_i32_1 : i32, i32, i32
  }
  func.func @transform_2(%arg0: i32) -> (i32, i32, i32) {
    %c0_i32 = arith.constant 0 : i32
    %c0_i32_0 = arith.constant 0 : i32
    %c0_i32_1 = arith.constant 0 : i32
    %c0_i32_2 = arith.constant 0 : i32
    return %c0_i32, %c0_i32_0, %c0_i32_1 : i32, i32, i32
  }
  func.func @transform_3(%arg0: i32) -> (i32, i32, i32) {
    %c0_i32 = arith.constant 0 : i32
    %c0_i32_0 = arith.constant 0 : i32
    %c0_i32_1 = arith.constant 0 : i32
    %c0_i32_2 = arith.constant 0 : i32
    return %c0_i32, %c0_i32_0, %c0_i32_1 : i32, i32, i32
  }
  func.func @transform_4(%arg0: i32) -> (i32, i32) {
    %c0_i32 = arith.constant 0 : i32
    %c0_i32_0 = arith.constant 0 : i32
    %c0_i32_1 = arith.constant 0 : i32
    return %c0_i32, %c0_i32_0 : i32, i32
  }
  func.func @transform_5(%arg0: i32) -> (i32, i32) {
    %c0_i32 = arith.constant 0 : i32
    %c0_i32_0 = arith.constant 0 : i32
    %c0_i32_1 = arith.constant 0 : i32
    return %c0_i32, %c0_i32_0 : i32, i32
  }
  func.func @transform_6(%arg0: i32) -> (i32, i32) {
    %c0_i32 = arith.constant 0 : i32
    %c0_i32_0 = arith.constant 0 : i32
    %c0_i32_1 = arith.constant 0 : i32
    return %c0_i32, %c0_i32_0 : i32, i32
  }
  func.func @transform_7(%arg0: i32) -> (i32, i32) {
    %c0_i32 = arith.constant 0 : i32
    %c0_i32_0 = arith.constant 0 : i32
    %c0_i32_1 = arith.constant 0 : i32
    return %c0_i32, %c0_i32_0 : i32, i32
  }
  func.func @transform_8(%arg0: i32) -> (i32, i32) {
    %c0_i32 = arith.constant 0 : i32
    %c0_i32_0 = arith.constant 0 : i32
    %c0_i32_1 = arith.constant 0 : i32
    return %c0_i32, %c0_i32_0 : i32, i32
  }
  func.func @transform_9(%arg0: i32) -> (i32, i32) {
    %c0_i32 = arith.constant 0 : i32
    %c0_i32_0 = arith.constant 0 : i32
    %c0_i32_1 = arith.constant 0 : i32
    return %c0_i32, %c0_i32_0 : i32, i32
  }
  func.func @transform_10(%arg0: i32) -> (i32, i32) {
    %c0_i32 = arith.constant 0 : i32
    %c0_i32_0 = arith.constant 0 : i32
    %c0_i32_1 = arith.constant 0 : i32
    return %c0_i32, %c0_i32_0 : i32, i32
  }
  func.func @transform_11(%arg0: i32) -> (i32, i32) {
    %c0_i32 = arith.constant 0 : i32
    %c0_i32_0 = arith.constant 0 : i32
    %c0_i32_1 = arith.constant 0 : i32
    return %c0_i32, %c0_i32_0 : i32, i32
  }
  func.func @transform_12(%arg0: i32) -> (i32, i32) {
    %c0_i32 = arith.constant 0 : i32
    %c0_i32_0 = arith.constant 0 : i32
    %c0_i32_1 = arith.constant 0 : i32
    return %c0_i32, %c0_i32_0 : i32, i32
  }
  func.func @transform_13(%arg0: i32) -> (i32, i32, i32) {
    %c0_i32 = arith.constant 0 : i32
    %c0_i32_0 = arith.constant 0 : i32
    %c0_i32_1 = arith.constant 0 : i32
    return %arg0, %c0_i32, %c0_i32_0 : i32, i32, i32
  }
}

</mosaic_0001>

<bundles_post_ra>
// kernel: tpu_custom_call.1
= control target key start
LH: loop header
LB: loop body
LE: loop exit
PB: predicated region body
PF: predicated region fallthrough
CT: control target
= control target key end

     0   :  { %18 = vsyncpa [#allocation7], 0  ;;  %s2237_s0 = inlined_call_operand.vmem [shape: f32[2,8,32], index: 0, kind: input, shape index: {}]   ;;  %s2238_s1 = inlined_call_operand.vmem [shape: f32[12,32,8], index: 1, kind: input, shape index: {}]   ;;  %s2239_s2 = inlined_call_operand.vmem [shape: f32[12,1,8], index: 2, kind: input, shape index: {}]   ;;  %s2240_s3 = inlined_call_operand.vmem [shape: f32[4,8,32], index: 3, kind: input, shape index: {}]   ;;  %s2241_s4 = inlined_call_operand.vmem [shape: f32[1,32], index: 4, kind: input, shape index: {}]   ;;  %s2242_s5 = inlined_call_operand.vmem [shape: f32[1,32], index: 5, kind: input, shape index: {}]   ;;  %s2243_s6 = inlined_call_operand.vmem [shape: f32[1,32], index: 6, kind: input, shape index: {}]   ;;  %s2244_s7 = inlined_call_operand.vmem [shape: f32[1,32], index: 7, kind: input, shape index: {}]   ;;  %s2245_s8 = inlined_call_operand.vmem [shape: f32[1,32], index: 8, kind: input, shape index: {}]   ;;  %s2246_s9 = inlined_call_operand.vmem [shape: f32[32,32], index: 9, kind: input, shape index: {}]   ;;  %s2247_s10 = inlined_call_operand.vmem [shape: f32[1,32], index: 10, kind: input, shape index: {}]   ;;  %s2248_s11 = inlined_call_operand.vmem [shape: f32[32,32], index: 11, kind: input, shape index: {}]   ;;  %s2249_s12 = inlined_call_operand.vmem [shape: f32[1,32], index: 12, kind: input, shape index: {}]   ;;  %s2250_s13 = inlined_call_operand.hbm [shape: f32[2,8,32], index: 13, kind: output, shape index: {}]  }
   0x1   :  { %20 = vsyncpa [#allocation7 + $0x1], 0  ;;  %s1826_s25 = smov 0   ;;  %s1828_s26 = smov 0  }
   0x2   :  { %s1830_s27 = smov 0   ;;  %s1832_s28 = smov 0  }
   0x3 LB: > { %2255 = sst [smem:[#allocation9_spill]] %s1748_s27  ;;  %s1847_s29 = sadd.s32 4294967295, %s1752_s28   ;;  %s1752_s28 = sphi %s1832_s28, %s2262_s28   ;;  %s1748_s27 = sphi %s1830_s27, %s2264_s27   ;;  %s1744_s26 = sphi %s1828_s26, %s2266_s26   ;;  %s1740_s25 = sphi %s1826_s25, %s2265_s25  }
   0x4   : > { %s1502_s30 = sadd.s32 4294967294, %s1752_s28   ;;  %s1851_s14 = sadd.s32 1, %s1752_s28  }
   0x5   : > { %2256 = sst [smem:[#allocation10_spill]] %s1851_s14  ;;  %s311_s15 = sadd.s32 1, %s1748_s27 }
   0x6   : > { %s308_s16 = ssub.s32 %s1752_s28, %s1851_s14  ;;  %p321_p0 = scmp.ne.s32.totalorder %s1748_s27, %s1744_s26 }
   0x7   : > { %p309_p1 = scmp.eq.s32.totalorder %s308_s16, 0  ;;  %p322_p2 = scmp.eq.s32.totalorder %s1847_s29, 1 }
   0x8   : > { %p327_p3 = scmp.ne.s32.totalorder %s1744_s26, %s1740_s25  ;;  %p328_p4 = scmp.eq.s32.totalorder %s1502_s30, 1 }
   0x9   : > { %s1862_s17 = scalar_select %p309_p1, %s1748_s27, %s311_s15  }
   0xa   : > { %p1864_p5 = por %p322_p2, %p321_p0  ;;  %p1868_p6 = por %p328_p4, %p327_p3 }
   0xb   : > { %2257 = sst [smem:[#allocation11_spill]] %s1862_s17  ;;  %p1505_p7 = scmp.ge.s32.totalorder %s1752_s28, 1 }
   0xc   : > { %s2259_s19 = scalar_select %p1868_p6, 1, 0 }
   0xd   : > { %p389_p8 = scmp.lt.s32.totalorder %s1752_s28, 3 }
   0xe   : > { %2260 = sst [smem:[#allocation12_spill]] %s2259_s19 }
   0xf   : > { %p390_p9 = pnand %p1505_p7, %p389_p8 }
  0x10   : > { %p432_p10 = scmp.lt.s32.totalorder (!%p390_p9), %s1847_s29, 1 }
  0x11   : > { %393 = sbr.rel (%p390_p9) target bundleno = 1544 (0x608), region = 72 }
  0x16   : > { %v440_v0 = vld [vmem:[%s2238_s1 + $0x18] sm:$0xff]  ;;  %v439_v1 = vld [vmem:[%s2238_s1 + $0x10] sm:$0xff]  ;;  %v438_v4 = vld [vmem:[%s2238_s1 + $0x8] sm:$0xff]  ;;  %s433_s22 = scalar_select %p432_p10, %s1847_s29, 1  ;;  %vm445_vm0 = vcmask 261120   ;;  %vm469_vm1 = vcmask 64512  }
  0x17   : > { %v1518_v2 = vld [vmem:[%s2238_s1 + $0x58] sm:$0xff]  ;;  %461 = vmatpush.msra.mxu0 %v440_v0  ;;  %v1517_v3 = vld [vmem:[%s2238_s1 + $0x50] sm:$0xff]  ;;  %v1516_v5 = vld [vmem:[%s2238_s1 + $0x48] sm:$0xff] }
  0x18   : > { %525 = vmatpush.msra.mxu2 %v1518_v2  ;;  %v437_v6 = vld [vmem:[%s2238_s1] sm:$0xff]  ;;  %s1507_s30 = sshll.u32 %s433_s22, 3  ;;  %v1530_v9 = vld [vmem:[%s2238_s1 + $0x98] sm:$0xff]  ;;  %v1529_v12 = vld [vmem:[%s2238_s1 + $0x90] sm:$0xff]  ;;  %s429_s22 = sand.u32 1, %s1744_s26  }
  0x19   : > { %462 = vmatpush.msra.mxu0 %v439_v1  ;;  %v1515_v7 = vld [vmem:[%s2238_s1 + $0x40] sm:$0xff]  ;;  %s435_s16 = scalar_lea.vmem %s2237_s0, %s1507_s30  ;;  %v1542_v10 = vld [vmem:[%s2238_s1 + $0xb8] sm:$0xff]  ;;  %v1541_v13 = vld [vmem:[%s2238_s1 + $0xb0] sm:$0xff]  ;;  %s1506_s24 = sshll.u32 %s429_s22, 3 }
  0x1a   : > { %526 = vmatpush.msra.mxu2 %v1517_v3  ;;  %v1903_v8 = vld [vmem:[%s435_s16] sm:$0xff]  ;;  %v1512_v11 = vld [vmem:[%s2238_s1 + $0x38] sm:$0xff]  ;;  %v1528_v15 = vld [vmem:[%s2238_s1 + $0x88] sm:$0xff]  ;;  %s1597_s30 = sshll.u32 %s1847_s29, 3  ;;  %s431_s14 = scalar_lea.vmem [#allocation6], %s1506_s24 }
  0x1b   : > { %463 = vmatpush.msra.mxu0 %v438_v4  ;;  %v1524_v14 = vld [vmem:[%s2238_s1 + $0x78] sm:$0xff]  ;;  %v1511_v16 = vld [vmem:[%s2238_s1 + $0x30] sm:$0xff]  ;;  %v1527_v18 = vld [vmem:[%s2238_s1 + $0x80] sm:$0xff]  ;;  %493 = vmatpush.msra.mxu1 %v1512_v11  ;;  %s1438_s20 = scalar_lea.hbm %s2250_s13, %s1597_s30  ;;  %s1440_s29 = sshll.u32 %s431_s14, 4  ;;  %s1441_s29 = int_to_ptr.vmem [resolvable:$true] %s1440_s29 }
  0x1c   : > { %527 = vmatpush.msra.mxu2 %v1516_v5  ;;  %v1523_v17 = vld [vmem:[%s2238_s1 + $0x70] sm:$0xff]  ;;  %v1540_v19 = vld [vmem:[%s2238_s1 + $0xa8] sm:$0xff]  ;;  %v1539_v20 = vld [vmem:[%s2238_s1 + $0xa0] sm:$0xff]  ;;  %557 = vmatpush.msra.mxu3 %v1524_v14  ;;  %s1442_s19 = sshll.u32 %s1438_s20, 4  ;;  %s1428_s17 = scalar_lea.sflag [#allocation7], %s429_s22  ;;  %s1443_s19 = int_to_ptr.hbm [resolvable:$true] %s1442_s19 }
  0x1d   : > { %464 = vmatpush.msra.mxu0 %v437_v6  ;;  %v1510_v21 = vld [vmem:[%s2238_s1 + $0x28] sm:$0xff]  ;;  %v1554_v23 = vld [vmem:[%s2238_s1 + $0xd8] sm:$0xff]  ;;  %494 = vmatpush.msra.mxu1 %v1511_v16  ;;  %v1509_v25 = vld [vmem:[%s2238_s1 + $0x20] sm:$0xff]  ;;  %s1704_s15 = sshra.s32 %s1443_s19, 4  ;;  %s1710_s24 = scalar_lea.hbm %s2250_s13, 16  ;;  %s1705_s15 = int_to_ptr.hbm [resolvable:$true] %s1704_s15 }
  0x1e   : > { %528 = vmatpush.msra.mxu2 %v1515_v7  ;;  %1508 = vmatmul.msk.f32.vlgmr.msra.gmra.mxu0 %vm445_vm0, %v1903_v8  ;;  %v1522_v22 = vld [vmem:[%s2238_s1 + $0x68] sm:$0xff]  ;;  %v1566_v24 = vld [vmem:[%s2238_s1 + $0xf8] sm:$0xff]  ;;  %v1521_v26 = vld [vmem:[%s2238_s1 + $0x60] sm:$0xff]  ;;  %s1706_s30 = scalar_lea.hbm %s1705_s15, 8  ;;  %p1711_p0 = scmp.lt.s32.totalorder %s1705_s15, %s2250_s13 }
  0x1f   : > { %1520 = vmatmul.msk.f32.vlgmr.msra.gmra.mxu2 %vm445_vm0, %v1903_v8  ;;  %589 = vmatpush.msrb.mxu0 %v1530_v9  ;;  %v1553_v27 = vld [vmem:[%s2238_s1 + $0xd0] sm:$0xff]  ;;  %v1552_v29 = vld [vmem:[%s2238_s1 + $0xc8] sm:$0xff]  ;;  %v1551_v31 = vld [vmem:[%s2238_s1 + $0xc0] sm:$0xff]  ;;  %p1707_p11 = scmp.ne.s32.totalorder %s1705_s15, %s1706_s30  ;;  %p1712_p1 = scmp.lt.s32.totalorder %s1710_s24, %s1706_s30 }
  0x20   : > { %651 = vmatpush.msrb.mxu2 %v1542_v10  ;;  %558 = vmatpush.msra.mxu3 %v1523_v17  ;;  %v1565_v28 = vld [vmem:[%s2238_s1 + $0xf0] sm:$0xff]  ;;  %v1564_v30 = vld [vmem:[%s2238_s1 + $0xe8] sm:$0xff]  ;;  %v1563_v32 = vld [vmem:[%s2238_s1 + $0xe0] sm:$0xff] }
  0x21   : > { %590 = vmatpush.msrb.mxu0 %v1529_v12  ;;  %495 = vmatpush.msra.mxu1 %v1510_v21  ;;  %v1536_v33 = vld [vmem:[%s2238_s1 + $0x118] sm:$0xff]  ;;  %v1535_v34 = vld [vmem:[%s2238_s1 + $0x110] sm:$0xff]  ;;  %v1534_v35 = vld [vmem:[%s2238_s1 + $0x108] sm:$0xff]  ;;  %p1708_p12 = pnand %p1707_p11, %p1864_p5  ;;  %p1713_p2 = por %p1712_p1, %p1711_p0 }
  0x22   : > { %652 = vmatpush.msrb.mxu2 %v1541_v13  ;;  %559 = vmatpush.msra.mxu3 %v1522_v22  ;;  %v1533_v36 = vld [vmem:[%s2238_s1 + $0x100] sm:$0xff]  ;;  %v1548_v37 = vld [vmem:[%s2238_s1 + $0x138] sm:$0xff]  ;;  %v1547_v39 = vld [vmem:[%s2238_s1 + $0x130] sm:$0xff] }
  0x23   : > { %591 = vmatpush.msrb.mxu0 %v1528_v15  ;;  %496 = vmatpush.msra.mxu1 %v1509_v25  ;;  %v1560_v38 = vld [vmem:[%s2238_s1 + $0x158] sm:$0xff]  ;;  %v1559_v40 = vld [vmem:[%s2238_s1 + $0x150] sm:$0xff]  ;;  %v1546_v41 = vld [vmem:[%s2238_s1 + $0x128] sm:$0xff]  ;;  %p1709_p13 = pneg %p1708_p12 }
  0x24   : > { %653 = vmatpush.msrb.mxu2 %v1540_v19  ;;  %560 = vmatpush.msra.mxu3 %v1521_v26  ;;  %v1558_v42 = vld [vmem:[%s2238_s1 + $0x148] sm:$0xff]  ;;  %v1545_v43 = vld [vmem:[%s2238_s1 + $0x120] sm:$0xff]  ;;  %v1572_v45 = vld [vmem:[%s2238_s1 + $0x178] sm:$0xff] }
  0x25   : > { %592 = vmatpush.msrb.mxu0 %v1527_v18  ;;  %1514 = vmatmul.msk.f32.vlgmr.msra.gmra.mxu1 %vm445_vm0, %v1903_v8  ;;  %v1557_v44 = vld [vmem:[%s2238_s1 + $0x140] sm:$0xff]  ;;  %v1571_v46 = vld [vmem:[%s2238_s1 + $0x170] sm:$0xff]  ;;  %v1570_v47 = vld [vmem:[%s2238_s1 + $0x168] sm:$0xff]  ;;  %p1714_p3 = pnand %p1713_p2, %p1709_p13 }
  0x26   : > { %654 = vmatpush.msrb.mxu2 %v1539_v20  ;;  %1532 = vmatmul.msk.f32.vlgmr.msrb.gmra.mxu0 %vm445_vm0, %v1903_v8  ;;  %v1569_v48 = vld [vmem:[%s2238_s1 + $0x160] sm:$0xff]  ;;  %v1649_v18 = vld [vmem:[%s2239_s2 + $0x8] ss:$0 sm:$0xff]  ;;  %v1650_v21 = vld [vmem:[%s2239_s2 + $0xa] ss:$0 sm:$0xff] }
  0x27   : > { %1544 = vmatmul.msk.f32.vlgmr.msrb.gmra.mxu2 %vm445_vm0, %v1903_v8  ;;  %715 = vmatpush.msra.mxu0 %v1554_v23  ;;  %v1641_v49 = vld [vmem:[%s2239_s2] ss:$0 sm:$0xff]  ;;  %v1642_v52 = vld [vmem:[%s2239_s2 + $0x2] ss:$0 sm:$0xff]  ;;  %v1643_v53 = vld [vmem:[%s2239_s2 + $0x4] ss:$0 sm:$0xff] }
  0x28   : > { %779 = vmatpush.msra.mxu2 %v1566_v24  ;;  %1526 = vmatmul.msk.f32.vlgmr.msra.gmra.mxu3 %vm445_vm0, %v1903_v8  ;;  %v1646_v58 = vld [vmem:[%s2239_s2 + $0x1] ss:$0 sm:$0xff]  ;;  %v1644_v59 = vld [vmem:[%s2239_s2 + $0x5] ss:$0 sm:$0xff]  ;;  %v1645_v61 = vld [vmem:[%s2239_s2 + $0x6] ss:$0 sm:$0xff] }
  0x29   : > { %716 = vmatpush.msra.mxu0 %v1553_v27  ;;  %619 = vmatpush.msrb.mxu1 %v1536_v33  ;;  %v1648_v1 = vld [vmem:[%s2239_s2 + $0x3] ss:$0 sm:$0xff]  ;;  %v1647_v6 = vld [vmem:[%s2239_s2 + $0x7] ss:$0 sm:$0xff]  ;;  %v1651_v24 = vld [vmem:[%s2239_s2 + $0x9] ss:$0 sm:$0xff] }
  0x2a   : > { %780 = vmatpush.msra.mxu2 %v1565_v28  ;;  %681 = vmatpush.msrb.mxu3 %v1548_v37  ;;  %v1652_v27 = vld [vmem:[%s2239_s2 + $0xb] ss:$0 sm:$0xff] }
  0x2b   : > { %717 = vmatpush.msra.mxu0 %v1552_v29  ;;  %620 = vmatpush.msrb.mxu1 %v1535_v34 }
  0x2c   : > { %781 = vmatpush.msra.mxu2 %v1564_v30  ;;  %682 = vmatpush.msrb.mxu3 %v1547_v39 }
  0x2d   : > { %718 = vmatpush.msra.mxu0 %v1551_v31  ;;  %621 = vmatpush.msrb.mxu1 %v1534_v35 }
  0x2e   : > { %782 = vmatpush.msra.mxu2 %v1563_v32  ;;  %1556 = vmatmul.msk.f32.vlgmr.msra.gmra.mxu0 %vm445_vm0, %v1903_v8 }
  0x2f   : > { %1568 = vmatmul.msk.f32.vlgmr.msra.gmra.mxu2 %vm445_vm0, %v1903_v8  ;;  %622 = vmatpush.msrb.mxu1 %v1533_v36 }
  0x30   : > { %1538 = vmatmul.msk.f32.vlgmr.msrb.gmra.mxu1 %vm445_vm0, %v1903_v8  ;;  %683 = vmatpush.msrb.mxu3 %v1546_v41 }
  0x31   : > { %745 = vmatpush.msra.mxu1 %v1560_v38 }
  0x32   : > { %684 = vmatpush.msrb.mxu3 %v1545_v43 }
  0x33   : > { %746 = vmatpush.msra.mxu1 %v1559_v40  ;;  %1550 = vmatmul.msk.f32.vlgmr.msrb.gmra.mxu3 %vm445_vm0, %v1903_v8 }
  0x34   : > { %809 = vmatpush.msra.mxu3 %v1572_v45 }
  0x35   : > { %747 = vmatpush.msra.mxu1 %v1558_v42  ;;  %v1754_v42 = vmov 0.0  }
  0x36   : > { %810 = vmatpush.msra.mxu3 %v1571_v46  ;;  %825 = vst.msk [vmem:[#allocation5] sm:$0xff] %vm469_vm1, %v1754_v42 }
  0x37   : > { %748 = vmatpush.msra.mxu1 %v1557_v44  ;;  %826 = vst.msk [vmem:[#allocation5 + $0x8] sm:$0xff] %vm469_vm1, %v1754_v42 }
  0x38   : > { %1562 = vmatmul.msk.f32.vlgmr.msra.gmra.mxu1 %vm445_vm0, %v1903_v8  ;;  %811 = vmatpush.msra.mxu3 %v1570_v47  ;;  %827 = vst.msk [vmem:[#allocation5 + $0x10] sm:$0xff] %vm469_vm1, %v1754_v42 }
  0x39   : > { %828 = vst.msk [vmem:[#allocation5 + $0x18] sm:$0xff] %vm469_vm1, %v1754_v42 }
  0x3a   : > { %812 = vmatpush.msra.mxu3 %v1569_v48 }
  0x3b   : > { %1574 = vmatmul.msk.f32.vlgmr.msra.gmra.mxu3 %vm445_vm0, %v1903_v8 }
  0x9b   : > { %v466_v50 = vpop.f32.mrf.mxu0 }
  0x9c   : > { %v467_v51 = vadd.f32 %v1641_v49, %v466_v50 }
  0x9e   : > { %470 = vst.msk [vmem:[#allocation2] sm:$0xff] %vm469_vm1, %v467_v51 }
  0xa2   : > { %v530_v54 = vpop.f32.mrf.mxu2  ;;  %v498_v60 = vpop.f32.mrf.mxu1 }
  0xa3   : > { %v531_v55 = vadd.f32 %v1642_v52, %v530_v54  ;;  %v594_v56 = vpop.f32.mrf.mxu0  ;;  %v499_v62 = vadd.f32 %v1646_v58, %v498_v60 }
  0xa4   : > { %v595_v57 = vadd.f32 %v1643_v53, %v594_v56 }
  0xa5   : > { %534 = vst.msk [vmem:[#allocation2 + $0x10] sm:$0xff] %vm469_vm1, %v531_v55  ;;  %v821_v9 = vld [vmem:[#allocation2] sm:$0xff] }
  0xa6   : > { %627 = vst.msk [vmem:[#allocation3] sm:$0xff] %vm469_vm1, %v595_v57 }
  0xa7   : > { %502 = vst.msk [vmem:[#allocation2 + $0x8] sm:$0xff] %vm469_vm1, %v499_v62 }
  0xaa   : > { %v656_v63 = vpop.f32.mrf.mxu2 }
  0xab   : > { %v657_v0 = vadd.f32 %v1644_v59, %v656_v63  ;;  %v720_v2 = vpop.f32.mrf.mxu0  ;;  %v562_v5 = vpop.f32.mrf.mxu3 }
  0xac   : > { %v721_v3 = vadd.f32 %v1645_v61, %v720_v2  ;;  %v563_v7 = vadd.f32 %v1648_v1, %v562_v5  ;;  %v823_v15 = vld [vmem:[#allocation2 + $0x10] sm:$0xff] }
  0xad   : > { %690 = vst.msk [vmem:[#allocation3 + $0x8] sm:$0xff] %vm469_vm1, %v657_v0  ;;  %v829_v4 = vld [vmem:[#allocation3] sm:$0xff]  ;;  %v624_v19 = vpop.f32.mrf.mxu1 }
  0xae   : > { %754 = vst.msk [vmem:[#allocation3 + $0x10] sm:$0xff] %vm469_vm1, %v721_v3  ;;  %1575 = vmatpush.xpose.msk.msrb.mxu0 %vm469_vm1, %v829_v4  ;;  %v822_v13 = vld [vmem:[#allocation2 + $0x8] sm:$0xff]  ;;  %v625_v20 = vadd.f32 %v1649_v18, %v624_v19  ;;  %v1001_v18 = vld [vmem:[#allocation5] sm:$0xff] }
  0xaf   : > { %566 = vst.msk [vmem:[#allocation2 + $0x18] sm:$0xff] %vm469_vm1, %v563_v7 }
  0xb0   : > { %628 = vst.msk [vmem:[#allocation4] sm:$0xff] %vm469_vm1, %v625_v20 }
  0xb1   : > { %1576 = vmatmul.msk.f32.vlgmr.msrb.gmra.mxu0 %vm469_vm1, %v821_v9 }
  0xb2   : > { %v784_v10 = vpop.f32.mrf.mxu2 }
  0xb3   : > { %v785_v11 = vadd.f32 %v1647_v6, %v784_v10  ;;  %v1178_v10 = vld [vmem:[%s2240_s3] sm:$0xff] }
  0xb4   : > { %v830_v12 = vld [vmem:[#allocation3 + $0x8] sm:$0xff] }
  0xb5   : > { %818 = vst.msk [vmem:[#allocation3 + $0x18] sm:$0xff] %vm469_vm1, %v785_v11  ;;  %1577 = vmatpush.xpose.msk.msrb.mxu1 %vm469_vm1, %v830_v12  ;;  %v831_v14 = vld [vmem:[#allocation3 + $0x10] sm:$0xff]  ;;  %v750_v22 = vpop.f32.mrf.mxu1 }
  0xb6   : > { %1579 = vmatpush.xpose.msk.msrb.mxu2 %vm469_vm1, %v831_v14  ;;  %v824_v17 = vld [vmem:[#allocation2 + $0x18] sm:$0xff]  ;;  %v751_v23 = vadd.f32 %v1650_v21, %v750_v22  ;;  %v686_v25 = vpop.f32.mrf.mxu3 }
  0xb7   : > { %v687_v26 = vadd.f32 %v1651_v24, %v686_v25  ;;  %v833_v31 = vld [vmem:[#allocation4] sm:$0xff] }
  0xb8   : > { %1578 = vmatmul.msk.f32.vlgmr.msrb.gmra.mxu1 %vm469_vm1, %v822_v13  ;;  %756 = vst.msk [vmem:[#allocation4 + $0x10] sm:$0xff] %vm469_vm1, %v751_v23  ;;  %1027 = vmatpush.msra.mxu0 %v833_v31 }
  0xb9   : > { %1580 = vmatmul.msk.f32.vlgmr.msrb.gmra.mxu2 %vm469_vm1, %v823_v15  ;;  %692 = vst.msk [vmem:[#allocation4 + $0x8] sm:$0xff] %vm469_vm1, %v687_v26 }
  0xbc   : > { %v832_v16 = vld [vmem:[#allocation3 + $0x18] sm:$0xff] }
  0xbd   : > { %1581 = vmatpush.xpose.msk.msrb.mxu3 %vm469_vm1, %v832_v16 }
  0xbe   : > { %v814_v28 = vpop.f32.mrf.mxu3 }
  0xbf   : > { %v815_v29 = vadd.f32 %v1652_v27, %v814_v28  ;;  %v835_v33 = vld [vmem:[#allocation4 + $0x10] sm:$0xff] }
  0xc0   : > { %1582 = vmatmul.msk.f32.vlgmr.msrb.gmra.mxu3 %vm469_vm1, %v824_v17  ;;  %v834_v30 = vld [vmem:[#allocation4 + $0x8] sm:$0xff]  ;;  %1073 = vmatpush.msra.mxu2 %v835_v33 }
  0xc1   : > { %820 = vst.msk [vmem:[#allocation4 + $0x18] sm:$0xff] %vm469_vm1, %v815_v29  ;;  %1050 = vmatpush.msra.mxu1 %v834_v30  ;;  %v1587_v17 = vld [vmem:[%s2240_s3 + $0x8] sm:$0xff] }
  0xc2   : > { %1201 = vmatpush.msrb.mxu0 %v1587_v17 }
  0xc3   : > { %1224 = vmatpush.msrb.mxu1 %v1178_v10 }
  0xc8   : > { %v836_v32 = vld [vmem:[#allocation4 + $0x18] sm:$0xff] }
  0xc9   : > { %1096 = vmatpush.msra.mxu3 %v836_v32  ;;  %v1002_v32 = vld [vmem:[#allocation5 + $0x8] sm:$0xff] }
 0x12e   : > { %v860_v34 = vpop.f32.mrf.mxu0 }
 0x12f   : > { %v941_v35 = vsel %vm469_vm1, %v860_v34, -inf }
 0x130   : > { %942 = vmax.xlane.f32.xlu1 %v941_v35 }
 0x135   : > { %v886_v36 = vpop.f32.mrf.mxu1 }
 0x136   : > { %v944_v37 = vsel %vm469_vm1, %v886_v36, -inf }
 0x138   : > { %945 = vmax.xlane.f32.xlu1 %v944_v37 }
 0x13c   : > { %v912_v38 = vpop.f32.mrf.mxu2 }
 0x13d   : > { %v947_v39 = vsel %vm469_vm1, %v912_v38, -inf }
 0x13e   : > { %948 = vmax.xlane.f32.xlu0 %v947_v39  ;;  %v1590_v39 = vld [vmem:[%s2240_s3 + $0x10] sm:$0xff] }
 0x13f   : > { %1251 = vmatpush.msrb.mxu2 %v1590_v39 }
 0x143   : > { %v938_v40 = vpop.f32.mrf.mxu3 }
 0x144   : > { %v950_v41 = vsel %vm469_vm1, %v938_v40, -inf }
 0x146   : > { %951 = vmax.xlane.f32.xlu0 %v950_v41 }
 0x1a3   : > { %v943_v43 = vpop.xlane.xlu1 %942 }
 0x1a4   : > { %v953_v44 = vmax.f32 %v943_v43, -1e+30 }
 0x1a6   : > { %v969_v45 = vsub.f32 %v860_v34, %v953_v44  ;;  %v957_v3 = vsub.f32 -1e+30, %v953_v44 }
 0x1a8   : > { %v973_v46 = vmul.f32 1.442695, %v969_v45  ;;  %v961_v4 = vmul.f32 1.442695, %v957_v3 }
 0x1aa   : > { %1660 = vpow2.f32 %v973_v46 }
 0x1ab   : > { %v946_v47 = vpop.xlane.xlu1 %945 }
 0x1ac   : > { %v954_v48 = vmax.f32 %v946_v47, -1e+30  ;;  %v1592_v47 = vld [vmem:[%s2240_s3 + $0x18] sm:$0xff] }
 0x1ad   : > { %1279 = vmatpush.msrb.mxu3 %v1592_v47 }
 0x1ae   : > { %v970_v49 = vsub.f32 %v886_v36, %v954_v48  ;;  %v958_v5 = vsub.f32 -1e+30, %v954_v48 }
 0x1b0   : > { %v975_v50 = vmul.f32 1.442695, %v970_v49  ;;  %v1661_v51 = vpop.eup %1660  ;;  %v963_v6 = vmul.f32 1.442695, %v958_v5 }
 0x1b1   : > { %v949_v52 = vpop.xlane.xlu0 %948  ;;  %1583 = vmatmul.msk.f32.vlgmr.msra.gmra.mxu0 %vm469_vm1, %v1661_v51  ;;  %v985_v54 = vsel %vm469_vm1, %v1661_v51, 0.0 }
 0x1b2   : > { %v955_v53 = vmax.f32 %v949_v52, -1e+30  ;;  %1662 = vpow2.f32 %v975_v50  ;;  %986 = vadd.xlane.f32.xlu0 %v985_v54 }
 0x1b4   : > { %v971_v55 = vsub.f32 %v912_v38, %v955_v53  ;;  %v959_v9 = vsub.f32 -1e+30, %v955_v53 }
 0x1b6   : > { %v977_v56 = vmul.f32 1.442695, %v971_v55  ;;  %v965_v12 = vmul.f32 1.442695, %v959_v9 }
 0x1b8   : > { %v1663_v57 = vpop.eup %1662  ;;  %1664 = vpow2.f32 %v977_v56 }
 0x1b9   : > { %v952_v58 = vpop.xlane.xlu0 %951  ;;  %1584 = vmatmul.msk.f32.vlgmr.msra.gmra.mxu1 %vm469_vm1, %v1663_v57  ;;  %v988_v60 = vsel %vm469_vm1, %v1663_v57, 0.0 }
 0x1ba   : > { %v956_v59 = vmax.f32 %v952_v58, -1e+30  ;;  %989 = vadd.xlane.f32.xlu1 %v988_v60 }
 0x1bc   : > { %v972_v61 = vsub.f32 %v938_v40, %v956_v59  ;;  %v960_v16 = vsub.f32 -1e+30, %v956_v59 }
 0x1be   : > { %v979_v62 = vmul.f32 1.442695, %v972_v61  ;;  %v1665_v63 = vpop.eup %1664  ;;  %v967_v20 = vmul.f32 1.442695, %v960_v16 }
 0x1bf   : > { %1585 = vmatmul.msk.f32.vlgmr.msra.gmra.mxu2 %vm469_vm1, %v1665_v63  ;;  %v991_v0 = vsel %vm469_vm1, %v1665_v63, 0.0 }
 0x1c0   : > { %1666 = vpow2.f32 %v979_v62  ;;  %992 = vadd.xlane.f32.xlu2 %v991_v0  ;;  %v1003_v62 = vld [vmem:[#allocation5 + $0x10] sm:$0xff] }
 0x1c1   : > { %1668 = vpow2.f32 %v961_v4 }
 0x1c2   : > { %1670 = vpow2.f32 %v963_v6 }
 0x1c6   : > { %v1667_v1 = vpop.eup %1666 }
 0x1c7   : > { %1586 = vmatmul.msk.f32.vlgmr.msra.gmra.mxu3 %vm469_vm1, %v1667_v1  ;;  %v994_v2 = vsel %vm469_vm1, %v1667_v1, 0.0  ;;  %v1669_v7 = vpop.eup %1668 }
 0x1c8   : > { %995 = vadd.xlane.f32.xlu2 %v994_v2  ;;  %v981_v11 = vmul.f32 0.0, %v1669_v7  ;;  %v1671_v15 = vpop.eup %1670  ;;  %v1005_v22 = vmul.f32 %v1669_v7, %v1001_v18 }
 0x1c9   : > { %v982_v19 = vmul.f32 0.0, %v1671_v15  ;;  %v1006_v38 = vmul.f32 %v1671_v15, %v1002_v32 }
 0x225   : > { %v987_v13 = vpop.xlane.xlu0 %986 }
 0x226   : > { %v997_v14 = vadd.f32 %v987_v13, %v981_v11 }
 0x228   : > { %1672 = vrcp.f32 %v997_v14  ;;  %v1124_v30 = vand.u32 2147483648, %v997_v14  ;;  %v1122_v34 = vand.u32 2147483647, %v997_v14  ;;  %vm1118_vm3 = vweird.f32 %v997_v14 }
 0x229   : > { %1674 = vpow2.f32 %v965_v12 }
 0x22a   : > { %v1125_v41 = vor.u32 1.1754944e-38, %v1124_v30  ;;  %vm1123_vm5 = vcmp.eq.f32.partialorder %v1122_v34, 8.507059e+37 }
 0x22d   : > { %v990_v21 = vpop.xlane.xlu1 %989 }
 0x22e   : > { %v1673_v23 = vpop.eup %1672  ;;  %v998_v24 = vadd.f32 %v990_v21, %v982_v19  ;;  %v1029_v25 = vpop.f32.mrf.mxu0 }
 0x22f   : > { %v1675_v26 = vpop.eup %1674  ;;  %v1114_v27 = vmul.f32 %v1673_v23, %v997_v14  ;;  %v1101_v28 = vadd.f32 %v1029_v25, %v1005_v22  ;;  %vm1119_vm2 = vweird.f32 %v1673_v23  ;;  %v1004_v14 = vld [vmem:[#allocation5 + $0x18] sm:$0xff] }
 0x230   : > { %1676 = vrcp.f32 %v998_v24  ;;  %v983_v31 = vmul.f32 0.0, %v1675_v26  ;;  %vm1120_vm4 = vmor %vm1118_vm3, %vm1119_vm2  ;;  %v1138_v52 = vand.u32 2147483648, %v998_v24  ;;  %v1136_v55 = vand.u32 2147483647, %v998_v24 }
 0x231   : > { %1678 = vpow2.f32 %v967_v20  ;;  %v1115_v29 = vsub.f32 1.0, %v1114_v27  ;;  %1105 = vst.msk [vmem:[#allocation5] sm:$0xff] %vm469_vm1, %v1101_v28  ;;  %vm1132_vm7 = vweird.f32 %v998_v24  ;;  %v1007_v5 = vmul.f32 %v1675_v26, %v1003_v62  ;;  %v1330_v62 = vld [vmem:[%s2246_s9] sm:$0xff] }
 0x232   : > { %v1139_v61 = vor.u32 1.1754944e-38, %v1138_v52  ;;  %vm1137_vm9 = vcmp.eq.f32.partialorder %v1136_v55, 8.507059e+37 }
 0x233   : > { %v1116_v33 = vmul.f32 %v1673_v23, %v1115_v29  ;;  %v993_v35 = vpop.xlane.xlu2 %992 }
 0x234   : > { %v2128_v36 = vadd.f32 %v993_v35, %v983_v31 }
 0x235   : > { %v1117_v37 = vadd.f32 %v1673_v23, %v1116_v33 }
 0x236   : > { %v1677_v40 = vpop.eup %1676  ;;  %1680 = vrcp.f32 %v2128_v36  ;;  %v1052_v42 = vpop.f32.mrf.mxu1  ;;  %v1152_v13 = vand.u32 2147483648, %v2128_v36  ;;  %vm1146_vm11 = vweird.f32 %v2128_v36  ;;  %v1150_v15 = vand.u32 2147483647, %v2128_v36 }
 0x237   : > { %v1679_v43 = vpop.eup %1678  ;;  %v1121_v44 = vsel %vm1120_vm4, %v1673_v23, %v1117_v37  ;;  %v1128_v45 = vmul.f32 %v1677_v40, %v998_v24  ;;  %v1102_v46 = vadd.f32 %v1052_v42, %v1006_v38  ;;  %vm1133_vm6 = vweird.f32 %v1677_v40  ;;  %v1653_v42 = vld [vmem:[%s2241_s4] ss:$0 sm:$0xff] }
 0x238   : > { %v1126_v48 = vsel %vm1123_vm5, %v1125_v41, %v1121_v44  ;;  %v1109_v49 = vld [vmem:[#allocation5] sm:$0xff]  ;;  %v984_v53 = vmul.f32 0.0, %v1679_v43  ;;  %vm1134_vm8 = vmor %vm1132_vm7, %vm1133_vm6  ;;  %v1008_v19 = vmul.f32 %v1679_v43, %v1004_v14  ;;  %v1153_v20 = vor.u32 1.1754944e-38, %v1152_v13 }
 0x239   : > { %v1129_v50 = vsub.f32 1.0, %v1128_v45  ;;  %v1169_v51 = vmul.f32 %v1126_v48, %v1109_v49  ;;  %1106 = vst.msk [vmem:[#allocation5 + $0x8] sm:$0xff] %vm469_vm1, %v1102_v46  ;;  %vm1151_vm13 = vcmp.eq.f32.partialorder %v1150_v15, 8.507059e+37  ;;  %v1755_v48 = vmov 32.0   ;;  %v1655_v13 = vld [vmem:[%s2243_s6] ss:$0 sm:$0xff] }
 0x23b   : > { %v1130_v54 = vmul.f32 %v1677_v40, %v1129_v50  ;;  %1173 = vst.msk [vmem:[#allocation5] sm:$0xff] %vm469_vm1, %v1169_v51  ;;  %v996_v56 = vpop.xlane.xlu2 %995 }
 0x23c   : > { %v1681_v57 = vpop.eup %1680  ;;  %v1000_v58 = vadd.f32 %v996_v56, %v984_v53 }
 0x23d   : > { %v1131_v59 = vadd.f32 %v1677_v40, %v1130_v54  ;;  %v1142_v60 = vmul.f32 %v1681_v57, %v2128_v36  ;;  %vm1147_vm10 = vweird.f32 %v1681_v57 }
 0x23e   : > { %1682 = vrcp.f32 %v1000_v58  ;;  %vm1148_vm12 = vmor %vm1146_vm11, %vm1147_vm10  ;;  %v1166_v28 = vand.u32 2147483648, %v1000_v58  ;;  %vm1160_vm15 = vweird.f32 %v1000_v58  ;;  %v1164_v29 = vand.u32 2147483647, %v1000_v58 }
 0x23f   : > { %v1135_v63 = vsel %vm1134_vm8, %v1677_v40, %v1131_v59  ;;  %v1143_v0 = vsub.f32 1.0, %v1142_v60  ;;  %1684 = vrcp.f32 %v1755_v48  ;;  %v1332_v60 = vld [vmem:[%s2246_s9 + $0x10] sm:$0xff] }
 0x240   : > { %v1140_v1 = vsel %vm1137_vm9, %v1139_v61, %v1135_v63  ;;  %v1110_v2 = vld [vmem:[#allocation5 + $0x8] sm:$0xff]  ;;  %v1167_v31 = vor.u32 1.1754944e-38, %v1166_v28  ;;  %vm1165_vm3 = vcmp.eq.f32.partialorder %v1164_v29, 8.507059e+37  ;;  %v1365_v63 = vld [vmem:[%s2248_s11 + $0x18] sm:$0xff] }
 0x241   : > { %v1144_v3 = vmul.f32 %v1681_v57, %v1143_v0  ;;  %v1170_v4 = vmul.f32 %v1140_v1, %v1110_v2  ;;  %v1331_v61 = vld [vmem:[%s2246_s9 + $0x8] sm:$0xff]  ;;  %1385 = vmatpush.msra.mxu1 %v1365_v63 }
 0x242   : > { %v1075_v6 = vpop.f32.mrf.mxu2  ;;  %v1177_v7 = vld [vmem:[#allocation5] sm:$0xff] }
 0x243   : > { %1174 = vst.msk [vmem:[#allocation5 + $0x8] sm:$0xff] %vm469_vm1, %v1170_v4  ;;  %v1103_v9 = vadd.f32 %v1075_v6, %v1007_v5  ;;  %1589 = vmatmul.msk.f32.vlgmr.msrb.gmra.mxu1 %vm469_vm1, %v1177_v7  ;;  %v1145_v11 = vadd.f32 %v1681_v57, %v1144_v3 }
 0x244   : > { %v1683_v10 = vpop.eup %1682 }
 0x245   : > { %v1156_v12 = vmul.f32 %v1683_v10, %v1000_v58  ;;  %1107 = vst.msk [vmem:[#allocation5 + $0x10] sm:$0xff] %vm469_vm1, %v1103_v9  ;;  %v1149_v17 = vsel %vm1148_vm12, %v1681_v57, %v1145_v11  ;;  %vm1161_vm14 = vweird.f32 %v1683_v10  ;;  %v1685_v49 = vpop.eup %1684 }
 0x246   : > { %v1154_v24 = vsel %vm1151_vm13, %v1153_v20, %v1149_v17  ;;  %vm1162_vm2 = vmor %vm1160_vm15, %vm1161_vm14  ;;  %v1297_v50 = vmul.f32 32.0, %v1685_v49  ;;  %v1363_v17 = vld [vmem:[%s2248_s11 + $0x8] sm:$0xff] }
 0x247   : > { %v1157_v16 = vsub.f32 1.0, %v1156_v12 }
 0x248   : > { %v1298_v51 = vsub.f32 1.0, %v1297_v50 }
 0x249   : > { %v1158_v18 = vmul.f32 %v1683_v10, %v1157_v16  ;;  %v1364_v16 = vld [vmem:[%s2248_s11 + $0x10] sm:$0xff] }
 0x24a   : > { %v1098_v21 = vpop.f32.mrf.mxu3  ;;  %v1180_v22 = vld [vmem:[#allocation5 + $0x8] sm:$0xff]  ;;  %v1299_v52 = vmul.f32 %v1685_v49, %v1298_v51  ;;  %1386 = vmatpush.msra.mxu1 %v1364_v16 }
 0x24b   : > { %v1104_v23 = vadd.f32 %v1098_v21, %v1008_v19  ;;  %1588 = vmatmul.msk.f32.vlgmr.msrb.gmra.mxu0 %vm469_vm1, %v1180_v22  ;;  %v1159_v26 = vadd.f32 %v1683_v10, %v1158_v18  ;;  %v1362_v18 = vld [vmem:[%s2248_s11] sm:$0xff] }
 0x24c   : > { %v1111_v25 = vld [vmem:[#allocation5 + $0x10] sm:$0xff]  ;;  %v1300_v53 = vadd.f32 %v1685_v49, %v1299_v52  ;;  %1387 = vmatpush.msra.mxu1 %v1363_v17  ;;  %v1656_v19 = vld [vmem:[%s2247_s10] ss:$0 sm:$0xff] }
 0x24d   : > { %v1171_v27 = vmul.f32 %v1154_v24, %v1111_v25  ;;  %1108 = vst.msk [vmem:[#allocation5 + $0x18] sm:$0xff] %vm469_vm1, %v1104_v23  ;;  %v1163_v30 = vsel %vm1162_vm2, %v1683_v10, %v1159_v26  ;;  %v1654_v10 = vld [vmem:[%s2242_s5] ss:$0 sm:$0xff] }
 0x24e   : > { %v1168_v32 = vsel %vm1165_vm3, %v1167_v31, %v1163_v30  ;;  %1388 = vmatpush.msra.mxu1 %v1362_v18  ;;  %v1657_v23 = vld [vmem:[%s2249_s12] ss:$0 sm:$0xff] }
 0x24f   : > { %1175 = vst.msk [vmem:[#allocation5 + $0x10] sm:$0xff] %vm469_vm1, %v1171_v27 }
 0x254   : > { %v1112_v33 = vld [vmem:[#allocation5 + $0x18] sm:$0xff] }
 0x255   : > { %v1172_v34 = vmul.f32 %v1168_v32, %v1112_v33 }
 0x256   : > { %v1230_v35 = vld [vmem:[#allocation5 + $0x10] sm:$0xff] }
 0x257   : > { %1176 = vst.msk [vmem:[#allocation5 + $0x18] sm:$0xff] %vm469_vm1, %v1172_v34  ;;  %1591 = vmatmul.msk.f32.vlgmr.msrb.gmra.mxu2 %vm469_vm1, %v1230_v35 }
 0x25e   : > { %v1258_v36 = vld [vmem:[#allocation5 + $0x18] sm:$0xff] }
 0x25f   : > { %1593 = vmatmul.msk.f32.vlgmr.msrb.gmra.mxu3 %vm469_vm1, %v1258_v36  ;;  %vm1301_vm1 = vweird.f32 %v1685_v49 }
 0x260   : > { %v1302_v54 = vsel %vm1301_vm1, %v1685_v49, %v1300_v53 }
 0x2c0   : > { %v1226_v38 = vpop.f32.mrf.mxu1 }
 0x2c8   : > { %v1203_v37 = vpop.f32.mrf.mxu0 }
 0x2c9   : > { %v1227_v40 = vadd.f32 %v1226_v38, %v1203_v37 }
 0x2da   : > { %v1253_v39 = vpop.f32.mrf.mxu2 }
 0x2db   : > { %v1256_v41 = vadd.f32 %v1253_v39, %v1227_v40 }
 0x2e2   : > { %v1281_v43 = vpop.f32.mrf.mxu3 }
 0x2e3   : > { %v1284_v44 = vadd.f32 %v1281_v43, %v1256_v41 }
 0x2e5   : > { %v1289_v45 = vadd.f32 %v1653_v42, %v1284_v44  ;;  %v1658_v42 = vld [vmem:[%s2244_s7] ss:$0 sm:$0xff] }
 0x2e7   : > { %v1290_v46 = vadd.f32 %v1289_v45, %v1903_v8  ;;  %v1333_v8 = vld [vmem:[%s2246_s9 + $0x18] sm:$0xff]  ;;  %v1659_v45 = vld [vmem:[%s2245_s8] ss:$0 sm:$0xff] }
 0x2e8   : > { %1353 = vmatpush.msra.mxu0 %v1333_v8 }
 0x2e9   : > { %v1293_v47 = vsel %vm445_vm0, %v1290_v46, 0.0 }
 0x2ea   : > { %1294 = vadd.xlane.f32.xlu2 %v1293_v47  ;;  %1354 = vmatpush.msra.mxu0 %v1332_v60 }
 0x2ec   : > { %1355 = vmatpush.msra.mxu0 %v1331_v61 }
 0x2ee   : > { %1356 = vmatpush.msra.mxu0 %v1330_v62 }
 0x35d   : > { %v1295_v55 = vpop.xlane.xlu2 %1294 }
 0x35e   : > { %v1303_v56 = vmul.f32 %v1302_v54, %v1295_v55 }
 0x360   : > { %v1304_v57 = vsub.f32 %v1290_v46, %v1303_v56 }
 0x362   : > { %v1305_v58 = vmul.f32 %v1304_v57, %v1304_v57 }
 0x364   : > { %v1306_v59 = vsel %vm445_vm0, %v1305_v58, 0.0 }
 0x365   : > { %1307 = vadd.xlane.f32.xlu0 %v1306_v59 }
 0x3d8   : > { %v1308_v0 = vpop.xlane.xlu0 %1307 }
 0x3d9   : > { %v1309_v1 = vmul.f32 %v1308_v0, %v1302_v54 }
 0x3db   : > { %v1310_v2 = vadd.f32 1e-05, %v1309_v1 }
 0x3dd   : > { %1686 = vrsqrt.f32 %v1310_v2  ;;  %vm1317_vm5 = vweird.f32 %v1310_v2 }
 0x3e3   : > { %v1687_v3 = vpop.eup %1686 }
 0x3e4   : > { %v1312_v4 = vmul.f32 %v1687_v3, %v1310_v2  ;;  %vm1318_vm4 = vweird.f32 %v1687_v3 }
 0x3e5   : > { %vm1319_vm6 = vmor %vm1317_vm5, %vm1318_vm4 }
 0x3e6   : > { %v1313_v5 = vmul.f32 %v1687_v3, %v1312_v4 }
 0x3e8   : > { %v1314_v6 = vmul.f32 0.5, %v1313_v5 }
 0x3ea   : > { %v1315_v7 = vsub.f32 1.5, %v1314_v6 }
 0x3ec   : > { %v1316_v9 = vmul.f32 %v1687_v3, %v1315_v7 }
 0x3ee   : > { %v1320_v11 = vsel %vm1319_vm6, %v1687_v3, %v1316_v9 }
 0x3ef   : > { %v1321_v12 = vmul.f32 %v1320_v11, %v1304_v57 }
 0x3f1   : > { %v1325_v14 = vmul.f32 %v1654_v10, %v1321_v12 }
 0x3f3   : > { %v1329_v15 = vadd.f32 %v1655_v13, %v1325_v14 }
 0x3f5   : > { %1594 = vmatmul.msk.f32.vlgmr.msra.gmra.mxu0 %vm445_vm0, %v1329_v15 }
 0x472   : > { %v1358_v20 = vpop.f32.mrf.mxu0 }
 0x473   : > { %v1359_v21 = vadd.f32 %v1656_v19, %v1358_v20 }
 0x475   : > { %v1361_v22 = vmax.f32 %v1359_v21, 0.0 }
 0x477   : > { %1595 = vmatmul.msk.f32.vlgmr.msra.gmra.mxu1 %vm445_vm0, %v1361_v22 }
 0x4f4   : > { %v1390_v24 = vpop.f32.mrf.mxu1 }
 0x4f5   : > { %v1391_v25 = vadd.f32 %v1657_v23, %v1390_v24 }
 0x4f7   : > { %v1393_v26 = vadd.f32 %v1391_v25, %v1329_v15 }
 0x4f9   : > { %v1396_v27 = vsel %vm445_vm0, %v1393_v26, 0.0 }
 0x4fa   : > { %1397 = vadd.xlane.f32.xlu1 %v1396_v27 }
 0x56d   : > { %v1398_v28 = vpop.xlane.xlu1 %1397 }
 0x56e   : > { %v1399_v29 = vmul.f32 %v1398_v28, %v1302_v54 }
 0x570   : > { %v1400_v30 = vsub.f32 %v1393_v26, %v1399_v29 }
 0x572   : > { %v1401_v31 = vmul.f32 %v1400_v30, %v1400_v30 }
 0x574   : > { %v1402_v32 = vsel %vm445_vm0, %v1401_v31, 0.0 }
 0x575   : > { %1403 = vadd.xlane.f32.xlu2 %v1402_v32 }
 0x5e8   : > { %v1404_v33 = vpop.xlane.xlu2 %1403 }
 0x5e9   : > { %v1405_v34 = vmul.f32 %v1404_v33, %v1302_v54 }
 0x5eb   : > { %v1406_v35 = vadd.f32 1e-05, %v1405_v34 }
 0x5ed   : > { %1688 = vrsqrt.f32 %v1406_v35  ;;  %vm1413_vm8 = vweird.f32 %v1406_v35 }
 0x5f3   : > { %v1689_v36 = vpop.eup %1688 }
 0x5f4   : > { %v1408_v37 = vmul.f32 %v1689_v36, %v1406_v35  ;;  %vm1414_vm7 = vweird.f32 %v1689_v36 }
 0x5f5   : > { %vm1415_vm9 = vmor %vm1413_vm8, %vm1414_vm7 }
 0x5f6   : > { %v1409_v38 = vmul.f32 %v1689_v36, %v1408_v37 }
 0x5f8   : > { %v1410_v39 = vmul.f32 0.5, %v1409_v38 }
 0x5fa   : > { %v1411_v40 = vsub.f32 1.5, %v1410_v39 }
 0x5fc   : > { %v1412_v41 = vmul.f32 %v1689_v36, %v1411_v40 }
 0x5fe   : > { %v1416_v43 = vsel %vm1415_vm9, %v1689_v36, %v1412_v41 }
 0x5ff   : > { %v1417_v44 = vmul.f32 %v1416_v43, %v1400_v30 }
 0x601   : > { %v1421_v46 = vmul.f32 %v1658_v42, %v1417_v44 }
 0x603   : > { %v1425_v47 = vadd.f32 %v1659_v45, %v1421_v46 }
 0x605   : > { %1426 = vst.msk [vmem:[%s431_s14] sm:$0xff] %vm445_vm0, %v1425_v47 }
 0x606   : > { %1717 = shalt.err (!%p1714_p3)
}
 0x607   : > { %1600 = dma.vmem_to_hbm [thread:$0]  (%p1864_p5), %s1441_s29, 128, %s1443_s19, %s1428_s17  }
 0x608 PF: > { %p1606_p4 = scmp.ge.s32.totalorder %s1752_s28, 2  ;;  %s1454_s23 = sand.u32 1, %s1740_s25  }
 0x609   : > { %s1455_s14 = scalar_lea.sflag [#allocation7], %s1454_s23 }
 0x60a   : > { %p1603_p7 = pnand %p1606_p4, %p1868_p6 }
 0x60c   : > { %p1604_p8 = pneg %p1603_p7 }
 0x60e   : > { %1735 = dma.done.wait (%p1604_p8), %s1455_s14, 128  }
 0x60f   : > { %1737 = vsyncadd (%p1604_p8), %s1455_s14, 4294967168  ;;  %s2262_s28 = sld [smem:[#allocation10_spill]]  ;;  %s2265_s25 = smov %s1744_s26 }
 0x610   : > { %s2263_s15 = sld [smem:[#allocation9_spill]] }
 0x611   : > { %s2264_s27 = sld [smem:[#allocation11_spill]] }
 0x615   : > { %p23_p9 = scmp.ge.s32.totalorder %s2262_s28, 4  }
 0x616   : > { %s2266_s26 = smov %s2263_s15 }
 0x617   :  { %25 = sbr.rel (!%p23_p9) target bundleno = 3 (0x3), region = 144 }
 0x61c   :  { %1461 = vsyncpa [#allocation7], 1 }
 0x61d   :  { %1463 = vsyncpa [#allocation7 + $0x1], 1 }

// kernel: tpu_custom_call.1
= control target key start
LH: loop header
LB: loop body
LE: loop exit
PB: predicated region body
PF: predicated region fallthrough
CT: control target
= control target key end

     0   :  { %18 = vsyncpa [#allocation7], 0  ;;  %s2237_s0 = inlined_call_operand.vmem [shape: f32[2,8,32], index: 0, kind: input, shape index: {}]   ;;  %s2238_s1 = inlined_call_operand.vmem [shape: f32[12,32,8], index: 1, kind: input, shape index: {}]   ;;  %s2239_s2 = inlined_call_operand.vmem [shape: f32[12,1,8], index: 2, kind: input, shape index: {}]   ;;  %s2240_s3 = inlined_call_operand.vmem [shape: f32[4,8,32], index: 3, kind: input, shape index: {}]   ;;  %s2241_s4 = inlined_call_operand.vmem [shape: f32[1,32], index: 4, kind: input, shape index: {}]   ;;  %s2242_s5 = inlined_call_operand.vmem [shape: f32[1,32], index: 5, kind: input, shape index: {}]   ;;  %s2243_s6 = inlined_call_operand.vmem [shape: f32[1,32], index: 6, kind: input, shape index: {}]   ;;  %s2244_s7 = inlined_call_operand.vmem [shape: f32[1,32], index: 7, kind: input, shape index: {}]   ;;  %s2245_s8 = inlined_call_operand.vmem [shape: f32[1,32], index: 8, kind: input, shape index: {}]   ;;  %s2246_s9 = inlined_call_operand.vmem [shape: f32[32,32], index: 9, kind: input, shape index: {}]   ;;  %s2247_s10 = inlined_call_operand.vmem [shape: f32[1,32], index: 10, kind: input, shape index: {}]   ;;  %s2248_s11 = inlined_call_operand.vmem [shape: f32[32,32], index: 11, kind: input, shape index: {}]   ;;  %s2249_s12 = inlined_call_operand.vmem [shape: f32[1,32], index: 12, kind: input, shape index: {}]   ;;  %s2250_s13 = inlined_call_operand.hbm [shape: f32[2,8,32], index: 13, kind: output, shape index: {}]  }
   0x1   :  { %20 = vsyncpa [#allocation7 + $0x1], 0  ;;  %s1826_s25 = smov 0   ;;  %s1828_s26 = smov 0  }
   0x2   :  { %s1830_s27 = smov 0   ;;  %s1832_s28 = smov 0  }
   0x3 LB: > { %2255 = sst [smem:[#allocation9_spill]] %s1748_s27  ;;  %s1847_s29 = sadd.s32 4294967295, %s1752_s28   ;;  %s1752_s28 = sphi %s1832_s28, %s2262_s28   ;;  %s1748_s27 = sphi %s1830_s27, %s2264_s27   ;;  %s1744_s26 = sphi %s1828_s26, %s2266_s26   ;;  %s1740_s25 = sphi %s1826_s25, %s2265_s25  }
   0x4   : > { %s1502_s30 = sadd.s32 4294967294, %s1752_s28   ;;  %s1851_s14 = sadd.s32 1, %s1752_s28  }
   0x5   : > { %2256 = sst [smem:[#allocation10_spill]] %s1851_s14  ;;  %s311_s15 = sadd.s32 1, %s1748_s27 }
   0x6   : > { %s308_s16 = ssub.s32 %s1752_s28, %s1851_s14  ;;  %p321_p0 = scmp.ne.s32.totalorder %s1748_s27, %s1744_s26 }
   0x7   : > { %p309_p1 = scmp.eq.s32.totalorder %s308_s16, 0  ;;  %p322_p2 = scmp.eq.s32.totalorder %s1847_s29, 1 }
   0x8   : > { %p327_p3 = scmp.ne.s32.totalorder %s1744_s26, %s1740_s25  ;;  %p328_p4 = scmp.eq.s32.totalorder %s1502_s30, 1 }
   0x9   : > { %s1862_s17 = scalar_select %p309_p1, %s1748_s27, %s311_s15  }
   0xa   : > { %p1864_p5 = por %p322_p2, %p321_p0  ;;  %p1868_p6 = por %p328_p4, %p327_p3 }
   0xb   : > { %2257 = sst [smem:[#allocation11_spill]] %s1862_s17  ;;  %p1505_p7 = scmp.ge.s32.totalorder %s1752_s28, 1 }
   0xc   : > { %s2259_s19 = scalar_select %p1868_p6, 1, 0 }
   0xd   : > { %p389_p8 = scmp.lt.s32.totalorder %s1752_s28, 3 }
   0xe   : > { %2260 = sst [smem:[#allocation12_spill]] %s2259_s19 }
   0xf   : > { %p390_p9 = pnand %p1505_p7, %p389_p8 }
  0x10   : > { %p432_p10 = scmp.lt.s32.totalorder (!%p390_p9), %s1847_s29, 1 }
  0x11   : > { %393 = sbr.rel (%p390_p9) target bundleno = 1544 (0x608), region = 72 }
  0x16   : > { %v440_v0 = vld [vmem:[%s2238_s1 + $0x18] sm:$0xff]  ;;  %v439_v1 = vld [vmem:[%s2238_s1 + $0x10] sm:$0xff]  ;;  %v438_v4 = vld [vmem:[%s2238_s1 + $0x8] sm:$0xff]  ;;  %s433_s22 = scalar_select %p432_p10, %s1847_s29, 1  ;;  %vm445_vm0 = vcmask 261120   ;;  %vm469_vm1 = vcmask 64512  }
  0x17   : > { %v1518_v2 = vld [vmem:[%s2238_s1 + $0x58] sm:$0xff]  ;;  %461 = vmatpush.msra.mxu0 %v440_v0  ;;  %v1517_v3 = vld [vmem:[%s2238_s1 + $0x50] sm:$0xff]  ;;  %v1516_v5 = vld [vmem:[%s2238_s1 + $0x48] sm:$0xff] }
  0x18   : > { %525 = vmatpush.msra.mxu2 %v1518_v2  ;;  %v437_v6 = vld [vmem:[%s2238_s1] sm:$0xff]  ;;  %s1507_s30 = sshll.u32 %s433_s22, 3  ;;  %v1530_v9 = vld [vmem:[%s2238_s1 + $0x98] sm:$0xff]  ;;  %v1529_v12 = vld [vmem:[%s2238_s1 + $0x90] sm:$0xff]  ;;  %s429_s22 = sand.u32 1, %s1744_s26  }
  0x19   : > { %462 = vmatpush.msra.mxu0 %v439_v1  ;;  %v1515_v7 = vld [vmem:[%s2238_s1 + $0x40] sm:$0xff]  ;;  %s435_s16 = scalar_lea.vmem %s2237_s0, %s1507_s30  ;;  %v1542_v10 = vld [vmem:[%s2238_s1 + $0xb8] sm:$0xff]  ;;  %v1541_v13 = vld [vmem:[%s2238_s1 + $0xb0] sm:$0xff]  ;;  %s1506_s24 = sshll.u32 %s429_s22, 3 }
  0x1a   : > { %526 = vmatpush.msra.mxu2 %v1517_v3  ;;  %v1903_v8 = vld [vmem:[%s435_s16] sm:$0xff]  ;;  %v1512_v11 = vld [vmem:[%s2238_s1 + $0x38] sm:$0xff]  ;;  %v1528_v15 = vld [vmem:[%s2238_s1 + $0x88] sm:$0xff]  ;;  %s1597_s30 = sshll.u32 %s1847_s29, 3  ;;  %s431_s14 = scalar_lea.vmem [#allocation6], %s1506_s24 }
  0x1b   : > { %463 = vmatpush.msra.mxu0 %v438_v4  ;;  %v1524_v14 = vld [vmem:[%s2238_s1 + $0x78] sm:$0xff]  ;;  %v1511_v16 = vld [vmem:[%s2238_s1 + $0x30] sm:$0xff]  ;;  %v1527_v18 = vld [vmem:[%s2238_s1 + $0x80] sm:$0xff]  ;;  %493 = vmatpush.msra.mxu1 %v1512_v11  ;;  %s1438_s20 = scalar_lea.hbm %s2250_s13, %s1597_s30  ;;  %s1440_s29 = sshll.u32 %s431_s14, 4  ;;  %s1441_s29 = int_to_ptr.vmem [resolvable:$true] %s1440_s29 }
  0x1c   : > { %527 = vmatpush.msra.mxu2 %v1516_v5  ;;  %v1523_v17 = vld [vmem:[%s2238_s1 + $0x70] sm:$0xff]  ;;  %v1540_v19 = vld [vmem:[%s2238_s1 + $0xa8] sm:$0xff]  ;;  %v1539_v20 = vld [vmem:[%s2238_s1 + $0xa0] sm:$0xff]  ;;  %557 = vmatpush.msra.mxu3 %v1524_v14  ;;  %s1442_s19 = sshll.u32 %s1438_s20, 4  ;;  %s1428_s17 = scalar_lea.sflag [#allocation7], %s429_s22  ;;  %s1443_s19 = int_to_ptr.hbm [resolvable:$true] %s1442_s19 }
  0x1d   : > { %464 = vmatpush.msra.mxu0 %v437_v6  ;;  %v1510_v21 = vld [vmem:[%s2238_s1 + $0x28] sm:$0xff]  ;;  %v1554_v23 = vld [vmem:[%s2238_s1 + $0xd8] sm:$0xff]  ;;  %494 = vmatpush.msra.mxu1 %v1511_v16  ;;  %v1509_v25 = vld [vmem:[%s2238_s1 + $0x20] sm:$0xff]  ;;  %s1704_s15 = sshra.s32 %s1443_s19, 4  ;;  %s1710_s24 = scalar_lea.hbm %s2250_s13, 16  ;;  %s1705_s15 = int_to_ptr.hbm [resolvable:$true] %s1704_s15 }
  0x1e   : > { %528 = vmatpush.msra.mxu2 %v1515_v7  ;;  %1508 = vmatmul.msk.f32.vlgmr.msra.gmra.mxu0 %vm445_vm0, %v1903_v8  ;;  %v1522_v22 = vld [vmem:[%s2238_s1 + $0x68] sm:$0xff]  ;;  %v1566_v24 = vld [vmem:[%s2238_s1 + $0xf8] sm:$0xff]  ;;  %v1521_v26 = vld [vmem:[%s2238_s1 + $0x60] sm:$0xff]  ;;  %s1706_s30 = scalar_lea.hbm %s1705_s15, 8  ;;  %p1711_p0 = scmp.lt.s32.totalorder %s1705_s15, %s2250_s13 }
  0x1f   : > { %1520 = vmatmul.msk.f32.vlgmr.msra.gmra.mxu2 %vm445_vm0, %v1903_v8  ;;  %589 = vmatpush.msrb.mxu0 %v1530_v9  ;;  %v1553_v27 = vld [vmem:[%s2238_s1 + $0xd0] sm:$0xff]  ;;  %v1552_v29 = vld [vmem:[%s2238_s1 + $0xc8] sm:$0xff]  ;;  %v1551_v31 = vld [vmem:[%s2238_s1 + $0xc0] sm:$0xff]  ;;  %p1707_p11 = scmp.ne.s32.totalorder %s1705_s15, %s1706_s30  ;;  %p1712_p1 = scmp.lt.s32.totalorder %s1710_s24, %s1706_s30 }
  0x20   : > { %651 = vmatpush.msrb.mxu2 %v1542_v10  ;;  %558 = vmatpush.msra.mxu3 %v1523_v17  ;;  %v1565_v28 = vld [vmem:[%s2238_s1 + $0xf0] sm:$0xff]  ;;  %v1564_v30 = vld [vmem:[%s2238_s1 + $0xe8] sm:$0xff]  ;;  %v1563_v32 = vld [vmem:[%s2238_s1 + $0xe0] sm:$0xff] }
  0x21   : > { %590 = vmatpush.msrb.mxu0 %v1529_v12  ;;  %495 = vmatpush.msra.mxu1 %v1510_v21  ;;  %v1536_v33 = vld [vmem:[%s2238_s1 + $0x118] sm:$0xff]  ;;  %v1535_v34 = vld [vmem:[%s2238_s1 + $0x110] sm:$0xff]  ;;  %v1534_v35 = vld [vmem:[%s2238_s1 + $0x108] sm:$0xff]  ;;  %p1708_p12 = pnand %p1707_p11, %p1864_p5  ;;  %p1713_p2 = por %p1712_p1, %p1711_p0 }
  0x22   : > { %652 = vmatpush.msrb.mxu2 %v1541_v13  ;;  %559 = vmatpush.msra.mxu3 %v1522_v22  ;;  %v1533_v36 = vld [vmem:[%s2238_s1 + $0x100] sm:$0xff]  ;;  %v1548_v37 = vld [vmem:[%s2238_s1 + $0x138] sm:$0xff]  ;;  %v1547_v39 = vld [vmem:[%s2238_s1 + $0x130] sm:$0xff] }
  0x23   : > { %591 = vmatpush.msrb.mxu0 %v1528_v15  ;;  %496 = vmatpush.msra.mxu1 %v1509_v25  ;;  %v1560_v38 = vld [vmem:[%s2238_s1 + $0x158] sm:$0xff]  ;;  %v1559_v40 = vld [vmem:[%s2238_s1 + $0x150] sm:$0xff]  ;;  %v1546_v41 = vld [vmem:[%s2238_s1 + $0x128] sm:$0xff]  ;;  %p1709_p13 = pneg %p1708_p12 }
  0x24   : > { %653 = vmatpush.msrb.mxu2 %v1540_v19  ;;  %560 = vmatpush.msra.mxu3 %v1521_v26  ;;  %v1558_v42 = vld [vmem:[%s2238_s1 + $0x148] sm:$0xff]  ;;  %v1545_v43 = vld [vmem:[%s2238_s1 + $0x120] sm:$0xff]  ;;  %v1572_v45 = vld [vmem:[%s2238_s1 + $0x178] sm:$0xff] }
  0x25   : > { %592 = vmatpush.msrb.mxu0 %v1527_v18  ;;  %1514 = vmatmul.msk.f32.vlgmr.msra.gmra.mxu1 %vm445_vm0, %v1903_v8  ;;  %v1557_v44 = vld [vmem:[%s2238_s1 + $0x140] sm:$0xff]  ;;  %v1571_v46 = vld [vmem:[%s2238_s1 + $0x170] sm:$0xff]  ;;  %v1570_v47 = vld [vmem:[%s2238_s1 + $0x168] sm:$0xff]  ;;  %p1714_p3 = pnand %p1713_p2, %p1709_p13 }
  0x26   : > { %654 = vmatpush.msrb.mxu2 %v1539_v20  ;;  %1532 = vmatmul.msk.f32.vlgmr.msrb.gmra.mxu0 %vm445_vm0, %v1903_v8  ;;  %v1569_v48 = vld [vmem:[%s2238_s1 + $0x160] sm:$0xff]  ;;  %v1649_v18 = vld [vmem:[%s2239_s2 + $0x8] ss:$0 sm:$0xff]  ;;  %v1650_v21 = vld [vmem:[%s2239_s2 + $0xa] ss:$0 sm:$0xff] }
  0x27   : > { %1544 = vmatmul.msk.f32.vlgmr.msrb.gmra.mxu2 %vm445_vm0, %v1903_v8  ;;  %715 = vmatpush.msra.mxu0 %v1554_v23  ;;  %v1641_v49 = vld [vmem:[%s2239_s2] ss:$0 sm:$0xff]  ;;  %v1642_v52 = vld [vmem:[%s2239_s2 + $0x2] ss:$0 sm:$0xff]  ;;  %v1643_v53 = vld [vmem:[%s2239_s2 + $0x4] ss:$0 sm:$0xff] }
  0x28   : > { %779 = vmatpush.msra.mxu2 %v1566_v24  ;;  %1526 = vmatmul.msk.f32.vlgmr.msra.gmra.mxu3 %vm445_vm0, %v1903_v8  ;;  %v1646_v58 = vld [vmem:[%s2239_s2 + $0x1] ss:$0 sm:$0xff]  ;;  %v1644_v59 = vld [vmem:[%s2239_s2 + $0x5] ss:$0 sm:$0xff]  ;;  %v1645_v61 = vld [vmem:[%s2239_s2 + $0x6] ss:$0 sm:$0xff] }
  0x29   : > { %716 = vmatpush.msra.mxu0 %v1553_v27  ;;  %619 = vmatpush.msrb.mxu1 %v1536_v33  ;;  %v1648_v1 = vld [vmem:[%s2239_s2 + $0x3] ss:$0 sm:$0xff]  ;;  %v1647_v6 = vld [vmem:[%s2239_s2 + $0x7] ss:$0 sm:$0xff]  ;;  %v1651_v24 = vld [vmem:[%s2239_s2 + $0x9] ss:$0 sm:$0xff] }
  0x2a   : > { %780 = vmatpush.msra.mxu2 %v1565_v28  ;;  %681 = vmatpush.msrb.mxu3 %v1548_v37  ;;  %v1652_v27 = vld [vmem:[%s2239_s2 + $0xb] ss:$0 sm:$0xff] }
  0x2b   : > { %717 = vmatpush.msra.mxu0 %v1552_v29  ;;  %620 = vmatpush.msrb.mxu1 %v1535_v34 }
  0x2c   : > { %781 = vmatpush.msra.mxu2 %v1564_v30  ;;  %682 = vmatpush.msrb.mxu3 %v1547_v39 }
  0x2d   : > { %718 = vmatpush.msra.mxu0 %v1551_v31  ;;  %621 = vmatpush.msrb.mxu1 %v1534_v35 }
  0x2e   : > { %782 = vmatpush.msra.mxu2 %v1563_v32  ;;  %1556 = vmatmul.msk.f32.vlgmr.msra.gmra.mxu0 %vm445_vm0, %v1903_v8 }
  0x2f   : > { %1568 = vmatmul.msk.f32.vlgmr.msra.gmra.mxu2 %vm445_vm0, %v1903_v8  ;;  %622 = vmatpush.msrb.mxu1 %v1533_v36 }
  0x30   : > { %1538 = vmatmul.msk.f32.vlgmr.msrb.gmra.mxu1 %vm445_vm0, %v1903_v8  ;;  %683 = vmatpush.msrb.mxu3 %v1546_v41 }
  0x31   : > { %745 = vmatpush.msra.mxu1 %v1560_v38 }
  0x32   : > { %684 = vmatpush.msrb.mxu3 %v1545_v43 }
  0x33   : > { %746 = vmatpush.msra.mxu1 %v1559_v40  ;;  %1550 = vmatmul.msk.f32.vlgmr.msrb.gmra.mxu3 %vm445_vm0, %v1903_v8 }
  0x34   : > { %809 = vmatpush.msra.mxu3 %v1572_v45 }
  0x35   : > { %747 = vmatpush.msra.mxu1 %v1558_v42  ;;  %v1754_v42 = vmov 0.0  }
  0x36   : > { %810 = vmatpush.msra.mxu3 %v1571_v46  ;;  %825 = vst.msk [vmem:[#allocation5] sm:$0xff] %vm469_vm1, %v1754_v42 }
  0x37   : > { %748 = vmatpush.msra.mxu1 %v1557_v44  ;;  %826 = vst.msk [vmem:[#allocation5 + $0x8] sm:$0xff] %vm469_vm1, %v1754_v42 }
  0x38   : > { %1562 = vmatmul.msk.f32.vlgmr.msra.gmra.mxu1 %vm445_vm0, %v1903_v8  ;;  %811 = vmatpush.msra.mxu3 %v1570_v47  ;;  %827 = vst.msk [vmem:[#allocation5 + $0x10] sm:$0xff] %vm469_vm1, %v1754_v42 }
  0x39   : > { %828 = vst.msk [vmem:[#allocation5 + $0x18] sm:$0xff] %vm469_vm1, %v1754_v42 }
  0x3a   : > { %812 = vmatpush.msra.mxu3 %v1569_v48 }
  0x3b   : > { %1574 = vmatmul.msk.f32.vlgmr.msra.gmra.mxu3 %vm445_vm0, %v1903_v8 }
  0x9b   : > { %v466_v50 = vpop.f32.mrf.mxu0 }
  0x9c   : > { %v467_v51 = vadd.f32 %v1641_v49, %v466_v50 }
  0x9e   : > { %470 = vst.msk [vmem:[#allocation2] sm:$0xff] %vm469_vm1, %v467_v51 }
  0xa2   : > { %v530_v54 = vpop.f32.mrf.mxu2  ;;  %v498_v60 = vpop.f32.mrf.mxu1 }
  0xa3   : > { %v531_v55 = vadd.f32 %v1642_v52, %v530_v54  ;;  %v594_v56 = vpop.f32.mrf.mxu0  ;;  %v499_v62 = vadd.f32 %v1646_v58, %v498_v60 }
  0xa4   : > { %v595_v57 = vadd.f32 %v1643_v53, %v594_v56 }
  0xa5   : > { %534 = vst.msk [vmem:[#allocation2 + $0x10] sm:$0xff] %vm469_vm1, %v531_v55  ;;  %v821_v9 = vld [vmem:[#allocation2] sm:$0xff] }
  0xa6   : > { %627 = vst.msk [vmem:[#allocation3] sm:$0xff] %vm469_vm1, %v595_v57 }
  0xa7   : > { %502 = vst.msk [vmem:[#allocation2 + $0x8] sm:$0xff] %vm469_vm1, %v499_v62 }
  0xaa   : > { %v656_v63 = vpop.f32.mrf.mxu2 }
  0xab   : > { %v657_v0 = vadd.f32 %v1644_v59, %v656_v63  ;;  %v720_v2 = vpop.f32.mrf.mxu0  ;;  %v562_v5 = vpop.f32.mrf.mxu3 }
  0xac   : > { %v721_v3 = vadd.f32 %v1645_v61, %v720_v2  ;;  %v563_v7 = vadd.f32 %v1648_v1, %v562_v5  ;;  %v823_v15 = vld [vmem:[#allocation2 + $0x10] sm:$0xff] }
  0xad   : > { %690 = vst.msk [vmem:[#allocation3 + $0x8] sm:$0xff] %vm469_vm1, %v657_v0  ;;  %v829_v4 = vld [vmem:[#allocation3] sm:$0xff]  ;;  %v624_v19 = vpop.f32.mrf.mxu1 }
  0xae   : > { %754 = vst.msk [vmem:[#allocation3 + $0x10] sm:$0xff] %vm469_vm1, %v721_v3  ;;  %1575 = vmatpush.xpose.msk.msrb.mxu0 %vm469_vm1, %v829_v4  ;;  %v822_v13 = vld [vmem:[#allocation2 + $0x8] sm:$0xff]  ;;  %v625_v20 = vadd.f32 %v1649_v18, %v624_v19  ;;  %v1001_v18 = vld [vmem:[#allocation5] sm:$0xff] }
  0xaf   : > { %566 = vst.msk [vmem:[#allocation2 + $0x18] sm:$0xff] %vm469_vm1, %v563_v7 }
  0xb0   : > { %628 = vst.msk [vmem:[#allocation4] sm:$0xff] %vm469_vm1, %v625_v20 }
  0xb1   : > { %1576 = vmatmul.msk.f32.vlgmr.msrb.gmra.mxu0 %vm469_vm1, %v821_v9 }
  0xb2   : > { %v784_v10 = vpop.f32.mrf.mxu2 }
  0xb3   : > { %v785_v11 = vadd.f32 %v1647_v6, %v784_v10  ;;  %v1178_v10 = vld [vmem:[%s2240_s3] sm:$0xff] }
  0xb4   : > { %v830_v12 = vld [vmem:[#allocation3 + $0x8] sm:$0xff] }
  0xb5   : > { %818 = vst.msk [vmem:[#allocation3 + $0x18] sm:$0xff] %vm469_vm1, %v785_v11  ;;  %1577 = vmatpush.xpose.msk.msrb.mxu1 %vm469_vm1, %v830_v12  ;;  %v831_v14 = vld [vmem:[#allocation3 + $0x10] sm:$0xff]  ;;  %v750_v22 = vpop.f32.mrf.mxu1 }
  0xb6   : > { %1579 = vmatpush.xpose.msk.msrb.mxu2 %vm469_vm1, %v831_v14  ;;  %v824_v17 = vld [vmem:[#allocation2 + $0x18] sm:$0xff]  ;;  %v751_v23 = vadd.f32 %v1650_v21, %v750_v22  ;;  %v686_v25 = vpop.f32.mrf.mxu3 }
  0xb7   : > { %v687_v26 = vadd.f32 %v1651_v24, %v686_v25  ;;  %v833_v31 = vld [vmem:[#allocation4] sm:$0xff] }
  0xb8   : > { %1578 = vmatmul.msk.f32.vlgmr.msrb.gmra.mxu1 %vm469_vm1, %v822_v13  ;;  %756 = vst.msk [vmem:[#allocation4 + $0x10] sm:$0xff] %vm469_vm1, %v751_v23  ;;  %1027 = vmatpush.msra.mxu0 %v833_v31 }
  0xb9   : > { %1580 = vmatmul.msk.f32.vlgmr.msrb.gmra.mxu2 %vm469_vm1, %v823_v15  ;;  %692 = vst.msk [vmem:[#allocation4 + $0x8] sm:$0xff] %vm469_vm1, %v687_v26 }
  0xbc   : > { %v832_v16 = vld [vmem:[#allocation3 + $0x18] sm:$0xff] }
  0xbd   : > { %1581 = vmatpush.xpose.msk.msrb.mxu3 %vm469_vm1, %v832_v16 }
  0xbe   : > { %v814_v28 = vpop.f32.mrf.mxu3 }
  0xbf   : > { %v815_v29 = vadd.f32 %v1652_v27, %v814_v28  ;;  %v835_v33 = vld [vmem:[#allocation4 + $0x10] sm:$0xff] }
  0xc0   : > { %1582 = vmatmul.msk.f32.vlgmr.msrb.gmra.mxu3 %vm469_vm1, %v824_v17  ;;  %v834_v30 = vld [vmem:[#allocation4 + $0x8] sm:$0xff]  ;;  %1073 = vmatpush.msra.mxu2 %v835_v33 }
  0xc1   : > { %820 = vst.msk [vmem:[#allocation4 + $0x18] sm:$0xff] %vm469_vm1, %v815_v29  ;;  %1050 = vmatpush.msra.mxu1 %v834_v30  ;;  %v1587_v17 = vld [vmem:[%s2240_s3 + $0x8] sm:$0xff] }
  0xc2   : > { %1201 = vmatpush.msrb.mxu0 %v1587_v17 }
  0xc3   : > { %1224 = vmatpush.msrb.mxu1 %v1178_v10 }
  0xc8   : > { %v836_v32 = vld [vmem:[#allocation4 + $0x18] sm:$0xff] }
  0xc9   : > { %1096 = vmatpush.msra.mxu3 %v836_v32  ;;  %v1002_v32 = vld [vmem:[#allocation5 + $0x8] sm:$0xff] }
 0x12e   : > { %v860_v34 = vpop.f32.mrf.mxu0 }
 0x12f   : > { %v941_v35 = vsel %vm469_vm1, %v860_v34, -inf }
 0x130   : > { %942 = vmax.xlane.f32.xlu1 %v941_v35 }
 0x135   : > { %v886_v36 = vpop.f32.mrf.mxu1 }
 0x136   : > { %v944_v37 = vsel %vm469_vm1, %v886_v36, -inf }
 0x138   : > { %945 = vmax.xlane.f32.xlu1 %v944_v37 }
 0x13c   : > { %v912_v38 = vpop.f32.mrf.mxu2 }
 0x13d   : > { %v947_v39 = vsel %vm469_vm1, %v912_v38, -inf }
 0x13e   : > { %948 = vmax.xlane.f32.xlu0 %v947_v39  ;;  %v1590_v39 = vld [vmem:[%s2240_s3 + $0x10] sm:$0xff] }
 0x13f   : > { %1251 = vmatpush.msrb.mxu2 %v1590_v39 }
 0x143   : > { %v938_v40 = vpop.f32.mrf.mxu3 }
 0x144   : > { %v950_v41 = vsel %vm469_vm1, %v938_v40, -inf }
 0x146   : > { %951 = vmax.xlane.f32.xlu0 %v950_v41 }
 0x1a3   : > { %v943_v43 = vpop.xlane.xlu1 %942 }
 0x1a4   : > { %v953_v44 = vmax.f32 %v943_v43, -1e+30 }
 0x1a6   : > { %v969_v45 = vsub.f32 %v860_v34, %v953_v44  ;;  %v957_v3 = vsub.f32 -1e+30, %v953_v44 }
 0x1a8   : > { %v973_v46 = vmul.f32 1.442695, %v969_v45  ;;  %v961_v4 = vmul.f32 1.442695, %v957_v3 }
 0x1aa   : > { %1660 = vpow2.f32 %v973_v46 }
 0x1ab   : > { %v946_v47 = vpop.xlane.xlu1 %945 }
 0x1ac   : > { %v954_v48 = vmax.f32 %v946_v47, -1e+30  ;;  %v1592_v47 = vld [vmem:[%s2240_s3 + $0x18] sm:$0xff] }
 0x1ad   : > { %1279 = vmatpush.msrb.mxu3 %v1592_v47 }
 0x1ae   : > { %v970_v49 = vsub.f32 %v886_v36, %v954_v48  ;;  %v958_v5 = vsub.f32 -1e+30, %v954_v48 }
 0x1b0   : > { %v975_v50 = vmul.f32 1.442695, %v970_v49  ;;  %v1661_v51 = vpop.eup %1660  ;;  %v963_v6 = vmul.f32 1.442695, %v958_v5 }
 0x1b1   : > { %v949_v52 = vpop.xlane.xlu0 %948  ;;  %1583 = vmatmul.msk.f32.vlgmr.msra.gmra.mxu0 %vm469_vm1, %v1661_v51  ;;  %v985_v54 = vsel %vm469_vm1, %v1661_v51, 0.0 }
 0x1b2   : > { %v955_v53 = vmax.f32 %v949_v52, -1e+30  ;;  %1662 = vpow2.f32 %v975_v50  ;;  %986 = vadd.xlane.f32.xlu0 %v985_v54 }
 0x1b4   : > { %v971_v55 = vsub.f32 %v912_v38, %v955_v53  ;;  %v959_v9 = vsub.f32 -1e+30, %v955_v53 }
 0x1b6   : > { %v977_v56 = vmul.f32 1.442695, %v971_v55  ;;  %v965_v12 = vmul.f32 1.442695, %v959_v9 }
 0x1b8   : > { %v1663_v57 = vpop.eup %1662  ;;  %1664 = vpow2.f32 %v977_v56 }
 0x1b9   : > { %v952_v58 = vpop.xlane.xlu0 %951  ;;  %1584 = vmatmul.msk.f32.vlgmr.msra.gmra.mxu1 %vm469_vm1, %v1663_v57  ;;  %v988_v60 = vsel %vm469_vm1, %v1663_v57, 0.0 }
 0x1ba   : > { %v956_v59 = vmax.f32 %v952_v58, -1e+30  ;;  %989 = vadd.xlane.f32.xlu1 %v988_v60 }
 0x1bc   : > { %v972_v61 = vsub.f32 %v938_v40, %v956_v59  ;;  %v960_v16 = vsub.f32 -1e+30, %v956_v59 }
 0x1be   : > { %v979_v62 = vmul.f32 1.442695, %v972_v61  ;;  %v1665_v63 = vpop.eup %1664  ;;  %v967_v20 = vmul.f32 1.442695, %v960_v16 }
 0x1bf   : > { %1585 = vmatmul.msk.f32.vlgmr.msra.gmra.mxu2 %vm469_vm1, %v1665_v63  ;;  %v991_v0 = vsel %vm469_vm1, %v1665_v63, 0.0 }
 0x1c0   : > { %1666 = vpow2.f32 %v979_v62  ;;  %992 = vadd.xlane.f32.xlu2 %v991_v0  ;;  %v1003_v62 = vld [vmem:[#allocation5 + $0x10] sm:$0xff] }
 0x1c1   : > { %1668 = vpow2.f32 %v961_v4 }
 0x1c2   : > { %1670 = vpow2.f32 %v963_v6 }
 0x1c6   : > { %v1667_v1 = vpop.eup %1666 }
 0x1c7   : > { %1586 = vmatmul.msk.f32.vlgmr.msra.gmra.mxu3 %vm469_vm1, %v1667_v1  ;;  %v994_v2 = vsel %vm469_vm1, %v1667_v1, 0.0  ;;  %v1669_v7 = vpop.eup %1668 }
 0x1c8   : > { %995 = vadd.xlane.f32.xlu2 %v994_v2  ;;  %v981_v11 = vmul.f32 0.0, %v1669_v7  ;;  %v1671_v15 = vpop.eup %1670  ;;  %v1005_v22 = vmul.f32 %v1669_v7, %v1001_v18 }
 0x1c9   : > { %v982_v19 = vmul.f32 0.0, %v1671_v15  ;;  %v1006_v38 = vmul.f32 %v1671_v15, %v1002_v32 }
 0x225   : > { %v987_v13 = vpop.xlane.xlu0 %986 }
 0x226   : > { %v997_v14 = vadd.f32 %v987_v13, %v981_v11 }
 0x228   : > { %1672 = vrcp.f32 %v997_v14  ;;  %v1124_v30 = vand.u32 2147483648, %v997_v14  ;;  %v1122_v34 = vand.u32 2147483647, %v997_v14  ;;  %vm1118_vm3 = vweird.f32 %v997_v14 }
 0x229   : > { %1674 = vpow2.f32 %v965_v12 }
 0x22a   : > { %v1125_v41 = vor.u32 1.1754944e-38, %v1124_v30  ;;  %vm1123_vm5 = vcmp.eq.f32.partialorder %v1122_v34, 8.507059e+37 }
 0x22d   : > { %v990_v21 = vpop.xlane.xlu1 %989 }
 0x22e   : > { %v1673_v23 = vpop.eup %1672  ;;  %v998_v24 = vadd.f32 %v990_v21, %v982_v19  ;;  %v1029_v25 = vpop.f32.mrf.mxu0 }
 0x22f   : > { %v1675_v26 = vpop.eup %1674  ;;  %v1114_v27 = vmul.f32 %v1673_v23, %v997_v14  ;;  %v1101_v28 = vadd.f32 %v1029_v25, %v1005_v22  ;;  %vm1119_vm2 = vweird.f32 %v1673_v23  ;;  %v1004_v14 = vld [vmem:[#allocation5 + $0x18] sm:$0xff] }
 0x230   : > { %1676 = vrcp.f32 %v998_v24  ;;  %v983_v31 = vmul.f32 0.0, %v1675_v26  ;;  %vm1120_vm4 = vmor %vm1118_vm3, %vm1119_vm2  ;;  %v1138_v52 = vand.u32 2147483648, %v998_v24  ;;  %v1136_v55 = vand.u32 2147483647, %v998_v24 }
 0x231   : > { %1678 = vpow2.f32 %v967_v20  ;;  %v1115_v29 = vsub.f32 1.0, %v1114_v27  ;;  %1105 = vst.msk [vmem:[#allocation5] sm:$0xff] %vm469_vm1, %v1101_v28  ;;  %vm1132_vm7 = vweird.f32 %v998_v24  ;;  %v1007_v5 = vmul.f32 %v1675_v26, %v1003_v62  ;;  %v1330_v62 = vld [vmem:[%s2246_s9] sm:$0xff] }
 0x232   : > { %v1139_v61 = vor.u32 1.1754944e-38, %v1138_v52  ;;  %vm1137_vm9 = vcmp.eq.f32.partialorder %v1136_v55, 8.507059e+37 }
 0x233   : > { %v1116_v33 = vmul.f32 %v1673_v23, %v1115_v29  ;;  %v993_v35 = vpop.xlane.xlu2 %992 }
 0x234   : > { %v2128_v36 = vadd.f32 %v993_v35, %v983_v31 }
 0x235   : > { %v1117_v37 = vadd.f32 %v1673_v23, %v1116_v33 }
 0x236   : > { %v1677_v40 = vpop.eup %1676  ;;  %1680 = vrcp.f32 %v2128_v36  ;;  %v1052_v42 = vpop.f32.mrf.mxu1  ;;  %v1152_v13 = vand.u32 2147483648, %v2128_v36  ;;  %vm1146_vm11 = vweird.f32 %v2128_v36  ;;  %v1150_v15 = vand.u32 2147483647, %v2128_v36 }
 0x237   : > { %v1679_v43 = vpop.eup %1678  ;;  %v1121_v44 = vsel %vm1120_vm4, %v1673_v23, %v1117_v37  ;;  %v1128_v45 = vmul.f32 %v1677_v40, %v998_v24  ;;  %v1102_v46 = vadd.f32 %v1052_v42, %v1006_v38  ;;  %vm1133_vm6 = vweird.f32 %v1677_v40  ;;  %v1653_v42 = vld [vmem:[%s2241_s4] ss:$0 sm:$0xff] }
 0x238   : > { %v1126_v48 = vsel %vm1123_vm5, %v1125_v41, %v1121_v44  ;;  %v1109_v49 = vld [vmem:[#allocation5] sm:$0xff]  ;;  %v984_v53 = vmul.f32 0.0, %v1679_v43  ;;  %vm1134_vm8 = vmor %vm1132_vm7, %vm1133_vm6  ;;  %v1008_v19 = vmul.f32 %v1679_v43, %v1004_v14  ;;  %v1153_v20 = vor.u32 1.1754944e-38, %v1152_v13 }
 0x239   : > { %v1129_v50 = vsub.f32 1.0, %v1128_v45  ;;  %v1169_v51 = vmul.f32 %v1126_v48, %v1109_v49  ;;  %1106 = vst.msk [vmem:[#allocation5 + $0x8] sm:$0xff] %vm469_vm1, %v1102_v46  ;;  %vm1151_vm13 = vcmp.eq.f32.partialorder %v1150_v15, 8.507059e+37  ;;  %v1755_v48 = vmov 32.0   ;;  %v1655_v13 = vld [vmem:[%s2243_s6] ss:$0 sm:$0xff] }
 0x23b   : > { %v1130_v54 = vmul.f32 %v1677_v40, %v1129_v50  ;;  %1173 = vst.msk [vmem:[#allocation5] sm:$0xff] %vm469_vm1, %v1169_v51  ;;  %v996_v56 = vpop.xlane.xlu2 %995 }
 0x23c   : > { %v1681_v57 = vpop.eup %1680  ;;  %v1000_v58 = vadd.f32 %v996_v56, %v984_v53 }
 0x23d   : > { %v1131_v59 = vadd.f32 %v1677_v40, %v1130_v54  ;;  %v1142_v60 = vmul.f32 %v1681_v57, %v2128_v36  ;;  %vm1147_vm10 = vweird.f32 %v1681_v57 }
 0x23e   : > { %1682 = vrcp.f32 %v1000_v58  ;;  %vm1148_vm12 = vmor %vm1146_vm11, %vm1147_vm10  ;;  %v1166_v28 = vand.u32 2147483648, %v1000_v58  ;;  %vm1160_vm15 = vweird.f32 %v1000_v58  ;;  %v1164_v29 = vand.u32 2147483647, %v1000_v58 }
 0x23f   : > { %v1135_v63 = vsel %vm1134_vm8, %v1677_v40, %v1131_v59  ;;  %v1143_v0 = vsub.f32 1.0, %v1142_v60  ;;  %1684 = vrcp.f32 %v1755_v48  ;;  %v1332_v60 = vld [vmem:[%s2246_s9 + $0x10] sm:$0xff] }
 0x240   : > { %v1140_v1 = vsel %vm1137_vm9, %v1139_v61, %v1135_v63  ;;  %v1110_v2 = vld [vmem:[#allocation5 + $0x8] sm:$0xff]  ;;  %v1167_v31 = vor.u32 1.1754944e-38, %v1166_v28  ;;  %vm1165_vm3 = vcmp.eq.f32.partialorder %v1164_v29, 8.507059e+37  ;;  %v1365_v63 = vld [vmem:[%s2248_s11 + $0x18] sm:$0xff] }
 0x241   : > { %v1144_v3 = vmul.f32 %v1681_v57, %v1143_v0  ;;  %v1170_v4 = vmul.f32 %v1140_v1, %v1110_v2  ;;  %v1331_v61 = vld [vmem:[%s2246_s9 + $0x8] sm:$0xff]  ;;  %1385 = vmatpush.msra.mxu1 %v1365_v63 }
 0x242   : > { %v1075_v6 = vpop.f32.mrf.mxu2  ;;  %v1177_v7 = vld [vmem:[#allocation5] sm:$0xff] }
 0x243   : > { %1174 = vst.msk [vmem:[#allocation5 + $0x8] sm:$0xff] %vm469_vm1, %v1170_v4  ;;  %v1103_v9 = vadd.f32 %v1075_v6, %v1007_v5  ;;  %1589 = vmatmul.msk.f32.vlgmr.msrb.gmra.mxu1 %vm469_vm1, %v1177_v7  ;;  %v1145_v11 = vadd.f32 %v1681_v57, %v1144_v3 }
 0x244   : > { %v1683_v10 = vpop.eup %1682 }
 0x245   : > { %v1156_v12 = vmul.f32 %v1683_v10, %v1000_v58  ;;  %1107 = vst.msk [vmem:[#allocation5 + $0x10] sm:$0xff] %vm469_vm1, %v1103_v9  ;;  %v1149_v17 = vsel %vm1148_vm12, %v1681_v57, %v1145_v11  ;;  %vm1161_vm14 = vweird.f32 %v1683_v10  ;;  %v1685_v49 = vpop.eup %1684 }
 0x246   : > { %v1154_v24 = vsel %vm1151_vm13, %v1153_v20, %v1149_v17  ;;  %vm1162_vm2 = vmor %vm1160_vm15, %vm1161_vm14  ;;  %v1297_v50 = vmul.f32 32.0, %v1685_v49  ;;  %v1363_v17 = vld [vmem:[%s2248_s11 + $0x8] sm:$0xff] }
 0x247   : > { %v1157_v16 = vsub.f32 1.0, %v1156_v12 }
 0x248   : > { %v1298_v51 = vsub.f32 1.0, %v1297_v50 }
 0x249   : > { %v1158_v18 = vmul.f32 %v1683_v10, %v1157_v16  ;;  %v1364_v16 = vld [vmem:[%s2248_s11 + $0x10] sm:$0xff] }
 0x24a   : > { %v1098_v21 = vpop.f32.mrf.mxu3  ;;  %v1180_v22 = vld [vmem:[#allocation5 + $0x8] sm:$0xff]  ;;  %v1299_v52 = vmul.f32 %v1685_v49, %v1298_v51  ;;  %1386 = vmatpush.msra.mxu1 %v1364_v16 }
 0x24b   : > { %v1104_v23 = vadd.f32 %v1098_v21, %v1008_v19  ;;  %1588 = vmatmul.msk.f32.vlgmr.msrb.gmra.mxu0 %vm469_vm1, %v1180_v22  ;;  %v1159_v26 = vadd.f32 %v1683_v10, %v1158_v18  ;;  %v1362_v18 = vld [vmem:[%s2248_s11] sm:$0xff] }
 0x24c   : > { %v1111_v25 = vld [vmem:[#allocation5 + $0x10] sm:$0xff]  ;;  %v1300_v53 = vadd.f32 %v1685_v49, %v1299_v52  ;;  %1387 = vmatpush.msra.mxu1 %v1363_v17  ;;  %v1656_v19 = vld [vmem:[%s2247_s10] ss:$0 sm:$0xff] }
 0x24d   : > { %v1171_v27 = vmul.f32 %v1154_v24, %v1111_v25  ;;  %1108 = vst.msk [vmem:[#allocation5 + $0x18] sm:$0xff] %vm469_vm1, %v1104_v23  ;;  %v1163_v30 = vsel %vm1162_vm2, %v1683_v10, %v1159_v26  ;;  %v1654_v10 = vld [vmem:[%s2242_s5] ss:$0 sm:$0xff] }
 0x24e   : > { %v1168_v32 = vsel %vm1165_vm3, %v1167_v31, %v1163_v30  ;;  %1388 = vmatpush.msra.mxu1 %v1362_v18  ;;  %v1657_v23 = vld [vmem:[%s2249_s12] ss:$0 sm:$0xff] }
 0x24f   : > { %1175 = vst.msk [vmem:[#allocation5 + $0x10] sm:$0xff] %vm469_vm1, %v1171_v27 }
 0x254   : > { %v1112_v33 = vld [vmem:[#allocation5 + $0x18] sm:$0xff] }
 0x255   : > { %v1172_v34 = vmul.f32 %v1168_v32, %v1112_v33 }
 0x256   : > { %v1230_v35 = vld [vmem:[#allocation5 + $0x10] sm:$0xff] }
 0x257   : > { %1176 = vst.msk [vmem:[#allocation5 + $0x18] sm:$0xff] %vm469_vm1, %v1172_v34  ;;  %1591 = vmatmul.msk.f32.vlgmr.msrb.gmra.mxu2 %vm469_vm1, %v1230_v35 }
 0x25e   : > { %v1258_v36 = vld [vmem:[#allocation5 + $0x18] sm:$0xff] }
 0x25f   : > { %1593 = vmatmul.msk.f32.vlgmr.msrb.gmra.mxu3 %vm469_vm1, %v1258_v36  ;;  %vm1301_vm1 = vweird.f32 %v1685_v49 }
 0x260   : > { %v1302_v54 = vsel %vm1301_vm1, %v1685_v49, %v1300_v53 }
 0x2c0   : > { %v1226_v38 = vpop.f32.mrf.mxu1 }
 0x2c8   : > { %v1203_v37 = vpop.f32.mrf.mxu0 }
 0x2c9   : > { %v1227_v40 = vadd.f32 %v1226_v38, %v1203_v37 }
 0x2da   : > { %v1253_v39 = vpop.f32.mrf.mxu2 }
 0x2db   : > { %v1256_v41 = vadd.f32 %v1253_v39, %v1227_v40 }
 0x2e2   : > { %v1281_v43 = vpop.f32.mrf.mxu3 }
 0x2e3   : > { %v1284_v44 = vadd.f32 %v1281_v43, %v1256_v41 }
 0x2e5   : > { %v1289_v45 = vadd.f32 %v1653_v42, %v1284_v44  ;;  %v1658_v42 = vld [vmem:[%s2244_s7] ss:$0 sm:$0xff] }
 0x2e7   : > { %v1290_v46 = vadd.f32 %v1289_v45, %v1903_v8  ;;  %v1333_v8 = vld [vmem:[%s2246_s9 + $0x18] sm:$0xff]  ;;  %v1659_v45 = vld [vmem:[%s2245_s8] ss:$0 sm:$0xff] }
 0x2e8   : > { %1353 = vmatpush.msra.mxu0 %v1333_v8 }
 0x2e9   : > { %v1293_v47 = vsel %vm445_vm0, %v1290_v46, 0.0 }
 0x2ea   : > { %1294 = vadd.xlane.f32.xlu2 %v1293_v47  ;;  %1354 = vmatpush.msra.mxu0 %v1332_v60 }
 0x2ec   : > { %1355 = vmatpush.msra.mxu0 %v1331_v61 }
 0x2ee   : > { %1356 = vmatpush.msra.mxu0 %v1330_v62 }
 0x35d   : > { %v1295_v55 = vpop.xlane.xlu2 %1294 }
 0x35e   : > { %v1303_v56 = vmul.f32 %v1302_v54, %v1295_v55 }
 0x360   : > { %v1304_v57 = vsub.f32 %v1290_v46, %v1303_v56 }
 0x362   : > { %v1305_v58 = vmul.f32 %v1304_v57, %v1304_v57 }
 0x364   : > { %v1306_v59 = vsel %vm445_vm0, %v1305_v58, 0.0 }
 0x365   : > { %1307 = vadd.xlane.f32.xlu0 %v1306_v59 }
 0x3d8   : > { %v1308_v0 = vpop.xlane.xlu0 %1307 }
 0x3d9   : > { %v1309_v1 = vmul.f32 %v1308_v0, %v1302_v54 }
 0x3db   : > { %v1310_v2 = vadd.f32 1e-05, %v1309_v1 }
 0x3dd   : > { %1686 = vrsqrt.f32 %v1310_v2  ;;  %vm1317_vm5 = vweird.f32 %v1310_v2 }
 0x3e3   : > { %v1687_v3 = vpop.eup %1686 }
 0x3e4   : > { %v1312_v4 = vmul.f32 %v1687_v3, %v1310_v2  ;;  %vm1318_vm4 = vweird.f32 %v1687_v3 }
 0x3e5   : > { %vm1319_vm6 = vmor %vm1317_vm5, %vm1318_vm4 }
 0x3e6   : > { %v1313_v5 = vmul.f32 %v1687_v3, %v1312_v4 }
 0x3e8   : > { %v1314_v6 = vmul.f32 0.5, %v1313_v5 }
 0x3ea   : > { %v1315_v7 = vsub.f32 1.5, %v1314_v6 }
 0x3ec   : > { %v1316_v9 = vmul.f32 %v1687_v3, %v1315_v7 }
 0x3ee   : > { %v1320_v11 = vsel %vm1319_vm6, %v1687_v3, %v1316_v9 }
 0x3ef   : > { %v1321_v12 = vmul.f32 %v1320_v11, %v1304_v57 }
 0x3f1   : > { %v1325_v14 = vmul.f32 %v1654_v10, %v1321_v12 }
 0x3f3   : > { %v1329_v15 = vadd.f32 %v1655_v13, %v1325_v14 }
 0x3f5   : > { %1594 = vmatmul.msk.f32.vlgmr.msra.gmra.mxu0 %vm445_vm0, %v1329_v15 }
 0x472   : > { %v1358_v20 = vpop.f32.mrf.mxu0 }
 0x473   : > { %v1359_v21 = vadd.f32 %v1656_v19, %v1358_v20 }
 0x475   : > { %v1361_v22 = vmax.f32 %v1359_v21, 0.0 }
 0x477   : > { %1595 = vmatmul.msk.f32.vlgmr.msra.gmra.mxu1 %vm445_vm0, %v1361_v22 }
 0x4f4   : > { %v1390_v24 = vpop.f32.mrf.mxu1 }
 0x4f5   : > { %v1391_v25 = vadd.f32 %v1657_v23, %v1390_v24 }
 0x4f7   : > { %v1393_v26 = vadd.f32 %v1391_v25, %v1329_v15 }
 0x4f9   : > { %v1396_v27 = vsel %vm445_vm0, %v1393_v26, 0.0 }
 0x4fa   : > { %1397 = vadd.xlane.f32.xlu1 %v1396_v27 }
 0x56d   : > { %v1398_v28 = vpop.xlane.xlu1 %1397 }
 0x56e   : > { %v1399_v29 = vmul.f32 %v1398_v28, %v1302_v54 }
 0x570   : > { %v1400_v30 = vsub.f32 %v1393_v26, %v1399_v29 }
 0x572   : > { %v1401_v31 = vmul.f32 %v1400_v30, %v1400_v30 }
 0x574   : > { %v1402_v32 = vsel %vm445_vm0, %v1401_v31, 0.0 }
 0x575   : > { %1403 = vadd.xlane.f32.xlu2 %v1402_v32 }
 0x5e8   : > { %v1404_v33 = vpop.xlane.xlu2 %1403 }
 0x5e9   : > { %v1405_v34 = vmul.f32 %v1404_v33, %v1302_v54 }
 0x5eb   : > { %v1406_v35 = vadd.f32 1e-05, %v1405_v34 }
 0x5ed   : > { %1688 = vrsqrt.f32 %v1406_v35  ;;  %vm1413_vm8 = vweird.f32 %v1406_v35 }
 0x5f3   : > { %v1689_v36 = vpop.eup %1688 }
 0x5f4   : > { %v1408_v37 = vmul.f32 %v1689_v36, %v1406_v35  ;;  %vm1414_vm7 = vweird.f32 %v1689_v36 }
 0x5f5   : > { %vm1415_vm9 = vmor %vm1413_vm8, %vm1414_vm7 }
 0x5f6   : > { %v1409_v38 = vmul.f32 %v1689_v36, %v1408_v37 }
 0x5f8   : > { %v1410_v39 = vmul.f32 0.5, %v1409_v38 }
 0x5fa   : > { %v1411_v40 = vsub.f32 1.5, %v1410_v39 }
 0x5fc   : > { %v1412_v41 = vmul.f32 %v1689_v36, %v1411_v40 }
 0x5fe   : > { %v1416_v43 = vsel %vm1415_vm9, %v1689_v36, %v1412_v41 }
 0x5ff   : > { %v1417_v44 = vmul.f32 %v1416_v43, %v1400_v30 }
 0x601   : > { %v1421_v46 = vmul.f32 %v1658_v42, %v1417_v44 }
 0x603   : > { %v1425_v47 = vadd.f32 %v1659_v45, %v1421_v46 }
 0x605   : > { %1426 = vst.msk [vmem:[%s431_s14] sm:$0xff] %vm445_vm0, %v1425_v47 }
 0x606   : > { %1717 = shalt.err (!%p1714_p3)
}
 0x607   : > { %1600 = dma.vmem_to_hbm [thread:$0]  (%p1864_p5), %s1441_s29, 128, %s1443_s19, %s1428_s17  }
 0x608 PF: > { %p1606_p4 = scmp.ge.s32.totalorder %s1752_s28, 2  ;;  %s1454_s23 = sand.u32 1, %s1740_s25  }
 0x609   : > { %s1455_s14 = scalar_lea.sflag [#allocation7], %s1454_s23 }
 0x60a   : > { %p1603_p7 = pnand %p1606_p4, %p1868_p6 }
 0x60c   : > { %p1604_p8 = pneg %p1603_p7 }
 0x60e   : > { %1735 = dma.done.wait (%p1604_p8), %s1455_s14, 128  }
 0x60f   : > { %1737 = vsyncadd (%p1604_p8), %s1455_s14, 4294967168  ;;  %s2262_s28 = sld [smem:[#allocation10_spill]]  ;;  %s2265_s25 = smov %s1744_s26 }
 0x610   : > { %s2263_s15 = sld [smem:[#allocation9_spill]] }
 0x611   : > { %s2264_s27 = sld [smem:[#allocation11_spill]] }
 0x615   : > { %p23_p9 = scmp.ge.s32.totalorder %s2262_s28, 4  }
 0x616   : > { %s2266_s26 = smov %s2263_s15 }
 0x617   :  { %25 = sbr.rel (!%p23_p9) target bundleno = 3 (0x3), region = 144 }
 0x61c   :  { %1461 = vsyncpa [#allocation7], 1 }
 0x61d   :  { %1463 = vsyncpa [#allocation7 + $0x1], 1 }

</bundles_post_ra>
